<compile_context>
chip_gen: v5e
topology: v5e:2x2
jax: 0.10.0
libtpu: 0.0.40
codegen_flags: <defaults>
</compile_context>

<pallas_src>
import math

import jax
import jax.numpy as jnp
from jax import lax
from jax.experimental import pallas as pl
from jax.experimental.pallas import tpu as pltpu


# ----------------------------- elementwise helpers (kernel & reference) --------------------------
def _sigmoid(x):
    return 1.0 / (1.0 + jnp.exp(-x))


def _silu(x):
    return x * _sigmoid(x)


def _softplus(x):
    return jnp.maximum(x, 0.0) + jnp.log(1.0 + jnp.exp(-jnp.abs(x)))


def _round_up(a, m):
    return (a + m - 1) // m * m


# ----------------------------------------- Pallas kernel -----------------------------------------
def _make_mamba_layer_kernel(Bt, Lt, Dp, d_model, d_inner, d_state, d_conv, chunk, ci, P):
    """One MambaEncoderLayer forward for a (Bt, Lt) tile: x + LN(Mamba(x))."""
    n_chunks = Lt // chunk
    n_ci = d_inner // ci
    K = d_conv

    def kernel(x_ref, w_in_ref, conv_w_ref, conv_b_ref, w_proj_ref, b_dt_ref,
               A_ref, D_ref, w_out_ref, gamma_ref, beta_ref, o_ref,
               upad, utail, dlt_scr, du_scr, b_scr, c_scr, y_scr,
               h_scr, dA_scr, dBx_scr, hist_scr):
        l = pl.program_id(1)

        # reset sequence carries at the start of every batch tile's L sweep
        @pl.when(l == 0)
        def _():
            h_scr[...] = jnp.zeros_like(h_scr)
            utail[...] = jnp.zeros_like(utail)

        x = x_ref[...]                                              # (Bt, Lt, Dp) f32
        x2 = x.reshape(Bt * Lt, Dp)

        # ---- in_proj: (Bt*Lt, Dp) @ (Dp, 2*d_inner)  (MXU, bf16 operands, f32 acc) ----
        xz = jnp.dot(x2.astype(jnp.bfloat16), w_in_ref[...],
                     preferred_element_type=jnp.float32)            # (Bt*Lt, 2*d_inner)
        u = xz[:, :d_inner]
        z = xz[:, d_inner:]

        # ---- causal depthwise conv1d via tail-padded scratch (no iota masks, no rolls) ----
        # layout: rows [P-(K-1), P) hold the previous tile's last K-1 steps, rows [P, P+Lt) hold u
        upad[:, P - (K - 1):P, :] = utail[...]
        upad[:, P:, :] = u.reshape(Bt, Lt, d_inner)                 # aligned slab store (P % 8 == 0)
        utail[...] = upad[:, P + Lt - (K - 1):P + Lt, :]            # carry tail to the next L tile
        cw = conv_w_ref[...]                                        # (K, d_inner)
        acc = upad[:, P - (K - 1):P - (K - 1) + Lt, :] * cw[0:1, :]
        for k in range(1, K):
            acc = acc + upad[:, P - (K - 1) + k:P - (K - 1) + k + Lt, :] * cw[k:k + 1, :]
        u_conv = _silu(acc + conv_b_ref[...])                       # (Bt, Lt, d_inner) f32
        uc2 = u_conv.reshape(Bt * Lt, d_inner)

        # ---- fused x_proj (+ host-folded dt_proj): one MXU matmul -> [delta_pre | B | C | pad] --
        proj = jnp.dot(uc2.astype(jnp.bfloat16), w_proj_ref[...],
                       preferred_element_type=jnp.float32)          # (Bt*Lt, padded width)
        delta = _softplus(proj[:, :d_inner] + b_dt_ref[...])        # (Bt*Lt, d_inner)

        # stage scan inputs (2-D/3-D only; no (L, d_inner, d_state) blow-up)
        dlt_scr[...] = delta.reshape(Bt, Lt, d_inner)
        du_scr[...] = (delta * uc2).reshape(Bt, Lt, d_inner)        # fused delta*u once
        b_scr[...] = proj[:, d_inner:d_inner + d_state].reshape(Bt, Lt, d_state)
        c_scr[...] = proj[:, d_inner + d_state:d_inner + 2 * d_state].reshape(Bt, Lt, d_state)

        A = A_ref[...]                                              # (d_state, d_inner) = -exp(A_log).T

        # ---- selective scan: chunked over time, batched dA/dBx + batched C-reduce per chunk ----
        @pl.loop(0, n_chunks)
        def _scan(c):
            off = pl.multiple_of(c * chunk, chunk)
            bv = b_scr[:, pl.ds(off, chunk), :]                     # (Bt, chunk, d_state)
            cv = c_scr[:, pl.ds(off, chunk), :]
            for j in range(n_ci):                                   # static d_inner channel tiles
                js = j * ci
                dlt = dlt_scr[:, pl.ds(off, chunk), js:js + ci]     # (Bt, chunk, ci)
                du = du_scr[:, pl.ds(off, chunk), js:js + ci]
                Aj = A[:, js:js + ci]                               # (d_state, ci)
                # batched, OFF the serial chain: whole-chunk slabs
                dA_scr[...] = jnp.exp(dlt[:, :, None, :] * Aj[None, None, :, :])
                dBx_scr[...] = bv[:, :, :, None] * du[:, :, None, :]
                h = h_scr[:, :, js:js + ci]                         # (Bt, d_state, ci)
                for t in range(chunk):                              # serial chain: 2 VPU ops / step
                    h = dA_scr[:, t, :, :] * h + dBx_scr[:, t, :, :]
                    hist_scr[:, t, :, :] = h                        # store is off the chain
                h_scr[:, :, js:js + ci] = h
                # one batched C-contraction per chunk (sublane reduce over d_state)
                y_c = jnp.sum(hist_scr[...] * cv[:, :, :, None], axis=2)   # (Bt, chunk, ci)
                y_scr[:, pl.ds(off, chunk), js:js + ci] = y_c       # aligned slab store

        y = y_scr[...].reshape(Bt * Lt, d_inner) + uc2 * D_ref[...]  # skip term D * u
        y = y * _silu(z)                                             # gate

        # ---- out_proj: (Bt*Lt, d_inner) @ (d_inner, Dp) ----
        out = jnp.dot(y.astype(jnp.bfloat16), w_out_ref[...],
                      preferred_element_type=jnp.float32)            # (Bt*Lt, Dp)

        # ---- LayerNorm(eps=1e-6) over the true d_model channels (pad lanes are exactly 0) ----
        inv_n = 1.0 / d_model
        mu = jnp.sum(out, axis=-1, keepdims=True) * inv_n
        ex2 = jnp.sum(out * out, axis=-1, keepdims=True) * inv_n
        var = jnp.maximum(ex2 - mu * mu, 0.0)
        ln = (out - mu) * lax.rsqrt(var + 1e-6)
        ln = ln * gamma_ref[...] + beta_ref[...]                     # gamma/beta pad lanes are 0

        o_ref[...] = (x2 + ln).reshape(Bt, Lt, Dp)

    return kernel


def _mamba_layer_call(x_pad, p, *, d_model, Bt, Lt, chunk):
    """x_pad: (B, Lp, Dp) padded activations; p: prepared (padded, folded) params."""
    B, Lp, Dp = x_pad.shape
    d_inner = p["D"].shape[1]
    d_state = p["A_neg_t"].shape[0]
    d_conv = p["conv_w"].shape[0]

    if d_inner % 128 != 0:
        # TODO(synk): lane-pad d_inner for non-128-multiple configs (not needed for expand*d_model
        # configs that are already lane friendly).
        raise NotImplementedError("d_inner must be a multiple of 128")

    if d_inner <= 256:
        ci = d_inner
    elif d_inner % 256 == 0:
        ci = 256
    else:
        ci = 128
    P = _round_up(d_conv - 1, 8)                                     # aligned conv staging offset

    kernel = _make_mamba_layer_kernel(Bt, Lt, Dp, d_model, d_inner, d_state, d_conv, chunk, ci, P)

    weight_order = ["w_in", "conv_w", "conv_b", "w_proj", "b_dt",
                    "A_neg_t", "D", "w_out", "gamma", "beta"]
    weights = [p[k] for k in weight_order]

    def full_spec(a):
        return pl.BlockSpec(a.shape, lambda b, l, _nd=a.ndim: (0,) * _nd)

    in_specs = [pl.BlockSpec((Bt, Lt, Dp), lambda b, l: (b, l, 0))] + [full_spec(w) for w in weights]
    out_specs = pl.BlockSpec((Bt, Lt, Dp), lambda b, l: (b, l, 0))

    scratch_shapes = [
        pltpu.VMEM((Bt, P + Lt, d_inner), jnp.float32),              # conv staging (tail + u)
        pltpu.VMEM((Bt, d_conv - 1, d_inner), jnp.float32),          # conv tail carry across L tiles
        pltpu.VMEM((Bt, Lt, d_inner), jnp.float32),                  # delta
        pltpu.VMEM((Bt, Lt, d_inner), jnp.float32),                  # delta * u_conv
        pltpu.VMEM((Bt, Lt, d_state), jnp.float32),                  # B
        pltpu.VMEM((Bt, Lt, d_state), jnp.float32),                  # C
        pltpu.VMEM((Bt, Lt, d_inner), jnp.float32),                  # y (scan output)
        pltpu.VMEM((Bt, d_state, d_inner), jnp.float32),             # h carry across chunks/L tiles
        pltpu.VMEM((Bt, chunk, d_state, ci), jnp.float32),           # dA slab (per chunk)
        pltpu.VMEM((Bt, chunk, d_state, ci), jnp.float32),           # dBx slab (per chunk)
        pltpu.VMEM((Bt, chunk, d_state, ci), jnp.float32),           # h history (batched C-reduce)
    ]

    # ---- explicit scoped-VMEM budget ----
    weight_bytes = sum(int(w.size) * w.dtype.itemsize for w in weights)
    scratch_elems = (Bt * (P + Lt) * d_inner + Bt * (d_conv - 1) * d_inner
                     + 3 * Bt * Lt * d_inner + 2 * Bt * Lt * d_state
                     + Bt * d_state * d_inner + 3 * Bt * chunk * d_state * ci)
    scratch_bytes = scratch_elems * 4
    block_bytes = 2 * 2 * Bt * Lt * Dp * 4                           # x + out, double-buffered
    live_bytes = (8 * Bt * Lt * d_inner + 2 * Bt * Lt * Dp) * 4      # xz/u_conv/z/proj/y values
    budget = block_bytes + 2 * weight_bytes + scratch_bytes + live_bytes + (16 << 20)
    cap = 100 << 20                                                   # do not clamp 128 MiB parts to 64 MiB
    try:
        info = pltpu.get_tpu_info()
        phys = getattr(info, "vmem_capacity_bytes", None)
        if phys:
            cap = min(cap, int(phys * 0.85))                          # respect v7x's 64 MiB
    except Exception:
        pass
    vmem_limit = int(min(max(budget, 32 << 20), cap))

    grid = (B // Bt, Lp // Lt)
    return pl.pallas_call(
        kernel,
        out_shape=jax.ShapeDtypeStruct((B, Lp, Dp), jnp.float32),
        grid_spec=pltpu.PrefetchScalarGridSpec(
            num_scalar_prefetch=0,
            grid=grid,
            in_specs=in_specs,
            out_specs=out_specs,
            scratch_shapes=scratch_shapes,
        ),
        compiler_params=pltpu.CompilerParams(
            # batch axis parallel (megacore / dual-TC shardable); sequence axis must stay sequential
            # because h and the conv tail are carried in scratch across L tiles.
            dimension_semantics=("parallel", "arbitrary"),
            vmem_limit_bytes=vmem_limit,
        ),
    )(x_pad, *weights)


def tq_mamba_pallas(x, params_list):
    """x: (B, L, d_model) float32 -> (B, L, d_model) float32."""
    B, L, d_model = x.shape
    Dp = _round_up(d_model, 128)

    chunk = 16                                                        # fixed 16-step scan chunk
    if L <= 256:
        Lt = _round_up(L, chunk)
    else:
        Lt = 256
    Lp = _round_up(L, Lt)
    Bt = next(c for c in (4, 2, 1) if B % c == 0)                     # interleaved batch recurrences

    # lane/sequence padding (pad lanes stay exactly zero through every layer; pad timesteps are
    # causal-safe garbage that is sliced off at the end)
    x_pad = jnp.zeros((B, Lp, Dp), x.dtype).at[:, :L, :d_model].set(x)

    out = x_pad
    for p in params_list:
        out = _mamba_layer_call(out, p, d_model=d_model, Bt=Bt, Lt=Lt, chunk=chunk)
    return out[:, :L, :d_model]


# ------------------------------------ pure-JAX reference -----------------------------------------
# Mirrors the kernel's MXU precision policy (bf16 matmul operands, f32 accumulation) and the
# host-side dt_proj/A folding, but is otherwise an independent implementation (pad-based conv,
# lax.scan recurrence, unpadded shapes).
def _mamba_encoder_layer_ref(x, p):
    d_model = p["d_model"]
    d_inner = p["D"].shape[1]
    d_state = p["A_neg_t"].shape[0]
    d_conv = p["conv_w"].shape[0]
    w_in = p["w_in"][:d_model, :]
    w_proj = p["w_proj"][:, :d_inner + 2 * d_state]
    w_out = p["w_out"][:, :d_model]
    gamma = p["gamma"][:, :d_model]
    beta = p["beta"][:, :d_model]

    def per_batch(xb):                                               # xb: (L, d_model)
        L = xb.shape[0]
        xz = jnp.dot(xb.astype(jnp.bfloat16), w_in, preferred_element_type=jnp.float32)
        u, z = xz[:, :d_inner], xz[:, d_inner:]
        u_pad = jnp.concatenate([jnp.zeros((d_conv - 1, d_inner), jnp.float32), u], axis=0)
        acc = jnp.zeros((L, d_inner), jnp.float32)
        for k in range(d_conv):
            acc = acc + u_pad[k:k + L, :] * p["conv_w"][k:k + 1, :]
        uc = _silu(acc + p["conv_b"])
        proj = jnp.dot(uc.astype(jnp.bfloat16), w_proj, preferred_element_type=jnp.float32)
        delta = _softplus(proj[:, :d_inner] + p["b_dt"])
        Bs = proj[:, d_inner:d_inner + d_state]
        Cs = proj[:, d_inner + d_state:d_inner + 2 * d_state]
        A = p["A_neg_t"]                                             # (d_state, d_inner)

        def step(h, inp):
            dlt_t, uc_t, b_t, c_t = inp
            dA = jnp.exp(dlt_t[None, :] * A)
            dBx = b_t[:, None] * (dlt_t * uc_t)[None, :]
            h = dA * h + dBx
            return h, jnp.sum(h * c_t[:, None], axis=0)

        _, ys = lax.scan(step, jnp.zeros((d_state, d_inner), jnp.float32), (delta, uc, Bs, Cs))
        y = ys + uc * p["D"]
        y = y * _silu(z)
        out = jnp.dot(y.astype(jnp.bfloat16), w_out, preferred_element_type=jnp.float32)
        mu = out.mean(-1, keepdims=True)
        var = ((out - mu) ** 2).mean(-1, keepdims=True)
        ln = (out - mu) / jnp.sqrt(var + 1e-6) * gamma + beta
        return xb + ln

    return jax.vmap(per_batch)(x)


def tq_mamba_ref(x, params_list):
    out = x
    for p in params_list:
        out = _mamba_encoder_layer_ref(out, p)
    return out


# -------------------------------------- parameter init / prep ------------------------------------
def init_layer_params(key, d_model, d_state=16, d_conv=4, expand=2):
    """Raw (PyTorch-layout) parameters for one MambaEncoderLayer."""
    d_inner = expand * d_model
    dt_rank = math.ceil(d_model / 16)
    ks = jax.random.split(key, 8)

    def w(k, shape, scale):
        return (scale * jax.random.normal(k, shape)).astype(jnp.float32)

    p = {}
    p["w_in"] = w(ks[0], (d_model, 2 * d_inner), d_model ** -0.5)          # in_proj.weight.T
    p["conv_w"] = w(ks[1], (d_conv, d_inner), d_conv ** -0.5)              # depthwise conv (K, C)
    p["conv_b"] = w(ks[2], (1, d_inner), 0.02)
    p["w_xp"] = w(ks[3], (d_inner, dt_rank + 2 * d_state), d_inner ** -0.5)
    p["w_dt"] = w(ks[4], (dt_rank, d_inner), dt_rank ** -0.5)
    p["b_dt"] = w(ks[5], (1, d_inner), 0.1)
    A = jnp.tile(jnp.arange(1, d_state + 1, dtype=jnp.float32)[None, :], (d_inner, 1))
    p["A_log"] = jnp.log(A)                                                # S4D-real init
    p["D"] = jnp.ones((1, d_inner), jnp.float32)
    p["w_out"] = w(ks[6], (d_inner, d_model), d_inner ** -0.5)             # out_proj.weight.T
    p["gamma"] = jnp.ones((1, d_model), jnp.float32)
    p["beta"] = jnp.zeros((1, d_model), jnp.float32)
    return p


def prepare_layer_params(raw):
    """Host-side folding + lane padding: dt_proj folded into x_proj, A = -exp(A_log) transposed,
    d_model padded to a 128 multiple (zero rows/cols), w_proj width padded to a 128 multiple,
    bf16 MXU weights."""
    d_model = raw["w_in"].shape[0]
    dt_rank = raw["w_dt"].shape[0]
    d_inner = raw["w_dt"].shape[1]
    d_state = (raw["w_xp"].shape[1] - dt_rank) // 2
    Dp = _round_up(d_model, 128)

    w_delta = raw["w_xp"][:, :dt_rank] @ raw["w_dt"]                       # (d_inner, d_inner)
    w_proj = jnp.concatenate([w_delta, raw["w_xp"][:, dt_rank:]], axis=1)  # [delta | B | C]
    pw = _round_up(d_inner + 2 * d_state, 128)
    w_proj = jnp.pad(w_proj, ((0, 0), (0, pw - w_proj.shape[1])))

    w_in = jnp.pad(raw["w_in"], ((0, Dp - d_model), (0, 0)))               # zero pad input rows
    w_out = jnp.pad(raw["w_out"], ((0, 0), (0, Dp - d_model)))             # zero pad output cols
    gamma = jnp.pad(raw["gamma"], ((0, 0), (0, Dp - d_model)))             # pad lanes -> exactly 0
    beta = jnp.pad(raw["beta"], ((0, 0), (0, Dp - d_model)))

    return {
        "d_model": d_model,
        "w_in": w_in.astype(jnp.bfloat16),
        "conv_w": raw["conv_w"],
        "conv_b": raw["conv_b"],
        "w_proj": w_proj.astype(jnp.bfloat16),
        "b_dt": raw["b_dt"],
        "A_neg_t": jnp.asarray((-jnp.exp(raw["A_log"])).T),                # (d_state, d_inner)
        "D": raw["D"],
        "w_out": w_out.astype(jnp.bfloat16),
        "gamma": gamma,
        "beta": beta,
    }


# --------------------------------------------- main ----------------------------------------------
if __name__ == "__main__":
    B, L, d_model, num_layers = 2, 8, 64, 2

    key = jax.random.PRNGKey(0)
    kx, kp = jax.random.split(key)
    x = jax.random.normal(kx, (B, L, d_model), dtype=jnp.float32)
    layer_keys = jax.random.split(kp, num_layers)
    raw_list = [init_layer_params(k, d_model) for k in layer_keys]
    params_list = [prepare_layer_params(p) for p in raw_list]

    out = tq_mamba_pallas(x, params_list)
    out = jax.block_until_ready(out)

    ref = tq_mamba_ref(x, params_list)
    err = float(jnp.max(jnp.abs(out - ref)))
    assert bool(jnp.all(jnp.isfinite(out))), "non-finite output"
    # NOTE: reference mirrors the kernel's bf16-MXU / folded-dt_proj policy; see TODO above for a
    # full fp32 unfolded validation at long L.
    assert err < 2e-2, f"mismatch vs reference: max abs err = {err}"
    print("KERNEL_OK")
</pallas_src>

<mosaic_0001>
module attributes {stable_mosaic.version = 11 : i64} {
  func.func @kernel(%arg0: i32, %arg1: i32, %arg2: memref<2x16x128xf32, #tpu.memory_space<vmem>>, %arg3: memref<128x256xbf16, #tpu.memory_space<vmem>>, %arg4: memref<4x128xf32, #tpu.memory_space<vmem>>, %arg5: memref<1x128xf32, #tpu.memory_space<vmem>>, %arg6: memref<128x256xbf16, #tpu.memory_space<vmem>>, %arg7: memref<1x128xf32, #tpu.memory_space<vmem>>, %arg8: memref<16x128xf32, #tpu.memory_space<vmem>>, %arg9: memref<1x128xf32, #tpu.memory_space<vmem>>, %arg10: memref<128x128xbf16, #tpu.memory_space<vmem>>, %arg11: memref<1x128xf32, #tpu.memory_space<vmem>>, %arg12: memref<1x128xf32, #tpu.memory_space<vmem>>, %arg13: memref<2x16x128xf32, #tpu.memory_space<vmem>>, %arg14: memref<2x24x128xf32, #tpu.memory_space<vmem>>, %arg15: memref<2x3x128xf32, #tpu.memory_space<vmem>>, %arg16: memref<2x16x128xf32, #tpu.memory_space<vmem>>, %arg17: memref<2x16x128xf32, #tpu.memory_space<vmem>>, %arg18: memref<2x16x16xf32, #tpu.memory_space<vmem>>, %arg19: memref<2x16x16xf32, #tpu.memory_space<vmem>>, %arg20: memref<2x16x128xf32, #tpu.memory_space<vmem>>, %arg21: memref<2x16x128xf32, #tpu.memory_space<vmem>>, %arg22: memref<2x16x16x128xf32, #tpu.memory_space<vmem>>, %arg23: memref<2x16x16x128xf32, #tpu.memory_space<vmem>>, %arg24: memref<2x16x16x128xf32, #tpu.memory_space<vmem>>) attributes {dimension_semantics = [#tpu.dimension_semantics<parallel>, #tpu.dimension_semantics<arbitrary>], iteration_bounds = array<i64: 1, 1>, scalar_prefetch = 0 : i64, scratch_operands = 11 : i64, tpu.core_type = #tpu.core_type<tc>, window_params = [{transform_indices = @transform_0, window_bounds = array<i64: 2, 16, 128>}, {pipeline_mode = #tpu.pipeline_mode<synchronous>, transform_indices = @transform_1, window_bounds = array<i64: 128, 256>}, {pipeline_mode = #tpu.pipeline_mode<synchronous>, transform_indices = @transform_2, window_bounds = array<i64: 4, 128>}, {pipeline_mode = #tpu.pipeline_mode<synchronous>, transform_indices = @transform_3, window_bounds = array<i64: 1, 128>}, {pipeline_mode = #tpu.pipeline_mode<synchronous>, transform_indices = @transform_4, window_bounds = array<i64: 128, 256>}, {pipeline_mode = #tpu.pipeline_mode<synchronous>, transform_indices = @transform_5, window_bounds = array<i64: 1, 128>}, {pipeline_mode = #tpu.pipeline_mode<synchronous>, transform_indices = @transform_6, window_bounds = array<i64: 16, 128>}, {pipeline_mode = #tpu.pipeline_mode<synchronous>, transform_indices = @transform_7, window_bounds = array<i64: 1, 128>}, {pipeline_mode = #tpu.pipeline_mode<synchronous>, transform_indices = @transform_8, window_bounds = array<i64: 128, 128>}, {pipeline_mode = #tpu.pipeline_mode<synchronous>, transform_indices = @transform_9, window_bounds = array<i64: 1, 128>}, {pipeline_mode = #tpu.pipeline_mode<synchronous>, transform_indices = @transform_10, window_bounds = array<i64: 1, 128>}, {transform_indices = @transform_11, window_bounds = array<i64: 2, 16, 128>}]} {
    %c0_i32 = arith.constant 0 : i32
    %0 = arith.cmpi eq, %arg1, %c0_i32 : i32
    %1 = arith.extui %0 : i1 to i32
    %c0_i32_0 = arith.constant 0 : i32
    %2 = arith.cmpi ne, %1, %c0_i32_0 : i32
    scf.if %2 {
      %cst_293 = arith.constant 0.000000e+00 : f32
      %307 = vector.broadcast %cst_293 : f32 to vector<2x16x128xf32>
      %c0_294 = arith.constant 0 : index
      %c0_295 = arith.constant 0 : index
      %c0_296 = arith.constant 0 : index
      %308 = vector.load %arg21[%c0_294, %c0_295, %c0_296] : memref<2x16x128xf32, #tpu.memory_space<vmem>>, vector<2x16x128xf32>
      tpu.vector_store %arg21[%c0_294, %c0_295, %c0_296], %307 {strides = array<i32>} : memref<2x16x128xf32, #tpu.memory_space<vmem>>, vector<2x16x128xf32>,
      %cst_297 = arith.constant 0.000000e+00 : f32
      %309 = vector.broadcast %cst_297 : f32 to vector<2x3x128xf32>
      %c0_298 = arith.constant 0 : index
      %c0_299 = arith.constant 0 : index
      %c0_300 = arith.constant 0 : index
      %310 = vector.load %arg15[%c0_298, %c0_299, %c0_300] : memref<2x3x128xf32, #tpu.memory_space<vmem>>, vector<2x3x128xf32>
      tpu.vector_store %arg15[%c0_298, %c0_299, %c0_300], %309 {strides = array<i32>} : memref<2x3x128xf32, #tpu.memory_space<vmem>>, vector<2x3x128xf32>,
    } else {
    }
    %c0 = arith.constant 0 : index
    %c0_1 = arith.constant 0 : index
    %c0_2 = arith.constant 0 : index
    %3 = vector.load %arg2[%c0, %c0_1, %c0_2] : memref<2x16x128xf32, #tpu.memory_space<vmem>>, vector<2x16x128xf32>
    %4 = vector.shape_cast %3 : vector<2x16x128xf32> to vector<32x128xf32>
    %5 = arith.truncf %4 : vector<32x128xf32> to vector<32x128xbf16>
    %c0_3 = arith.constant 0 : index
    %c0_4 = arith.constant 0 : index
    %6 = vector.load %arg3[%c0_3, %c0_4] : memref<128x256xbf16, #tpu.memory_space<vmem>>, vector<128x256xbf16>
    %cst = arith.constant dense<0.000000e+00> : vector<32x256xf32>
    %7 = tpu.matmul %5, %6, %cst {dimension_numbers = #tpu.dot_dimension_numbers<[1], [0], [0], [1], [0, 0, 1, 1], [], []>} : vector<32x128xbf16>, vector<128x256xbf16>, vector<32x256xf32> -> vector<32x256xf32>
    %8 = vector.extract_strided_slice %7 {offsets = [0, 0], sizes = [32, 128], strides = [1, 1]} : vector<32x256xf32> to vector<32x128xf32>
    %9 = vector.extract_strided_slice %7 {offsets = [0, 128], sizes = [32, 128], strides = [1, 1]} : vector<32x256xf32> to vector<32x128xf32>
    %c0_5 = arith.constant 0 : index
    %c0_6 = arith.constant 0 : index
    %c0_7 = arith.constant 0 : index
    %10 = vector.load %arg15[%c0_5, %c0_6, %c0_7] : memref<2x3x128xf32, #tpu.memory_space<vmem>>, vector<2x3x128xf32>
    %c0_8 = arith.constant 0 : index
    %c5 = arith.constant 5 : index
    %c0_9 = arith.constant 0 : index
    %11 = vector.load %arg14[%c0_8, %c5, %c0_9] : memref<2x24x128xf32, #tpu.memory_space<vmem>>, vector<2x3x128xf32>
    tpu.vector_store %arg14[%c0_8, %c5, %c0_9], %10 {strides = array<i32>} : memref<2x24x128xf32, #tpu.memory_space<vmem>>, vector<2x3x128xf32>,
    %12 = vector.shape_cast %8 : vector<32x128xf32> to vector<2x16x128xf32>
    %c0_10 = arith.constant 0 : index
    %c8 = arith.constant 8 : index
    %c0_11 = arith.constant 0 : index
    %13 = vector.load %arg14[%c0_10, %c8, %c0_11] : memref<2x24x128xf32, #tpu.memory_space<vmem>>, vector<2x16x128xf32>
    tpu.vector_store %arg14[%c0_10, %c8, %c0_11], %12 {strides = array<i32>} : memref<2x24x128xf32, #tpu.memory_space<vmem>>, vector<2x16x128xf32>,
    %c0_12 = arith.constant 0 : index
    %c21 = arith.constant 21 : index
    %c0_13 = arith.constant 0 : index
    %14 = vector.load %arg14[%c0_12, %c21, %c0_13] : memref<2x24x128xf32, #tpu.memory_space<vmem>>, vector<2x3x128xf32>
    %c0_14 = arith.constant 0 : index
    %c0_15 = arith.constant 0 : index
    %c0_16 = arith.constant 0 : index
    %15 = vector.load %arg15[%c0_14, %c0_15, %c0_16] : memref<2x3x128xf32, #tpu.memory_space<vmem>>, vector<2x3x128xf32>
    tpu.vector_store %arg15[%c0_14, %c0_15, %c0_16], %14 {strides = array<i32>} : memref<2x3x128xf32, #tpu.memory_space<vmem>>, vector<2x3x128xf32>,
    %c0_17 = arith.constant 0 : index
    %c0_18 = arith.constant 0 : index
    %16 = vector.load %arg4[%c0_17, %c0_18] : memref<4x128xf32, #tpu.memory_space<vmem>>, vector<4x128xf32>
    %c0_19 = arith.constant 0 : index
    %c5_20 = arith.constant 5 : index
    %c0_21 = arith.constant 0 : index
    %17 = vector.load %arg14[%c0_19, %c5_20, %c0_21] : memref<2x24x128xf32, #tpu.memory_space<vmem>>, vector<2x16x128xf32>
    %18 = vector.extract_strided_slice %16 {offsets = [0, 0], sizes = [1, 128], strides = [1, 1]} : vector<4x128xf32> to vector<1x128xf32>
    %19 = vector.shape_cast %18 : vector<1x128xf32> to vector<1x1x128xf32>
    %20 = vector.broadcast %19 : vector<1x1x128xf32> to vector<2x16x128xf32>
    %21 = arith.mulf %17, %20 : vector<2x16x128xf32>
    %c0_22 = arith.constant 0 : index
    %c6 = arith.constant 6 : index
    %c0_23 = arith.constant 0 : index
    %22 = vector.load %arg14[%c0_22, %c6, %c0_23] : memref<2x24x128xf32, #tpu.memory_space<vmem>>, vector<2x16x128xf32>
    %23 = vector.extract_strided_slice %16 {offsets = [1, 0], sizes = [1, 128], strides = [1, 1]} : vector<4x128xf32> to vector<1x128xf32>
    %24 = vector.shape_cast %23 : vector<1x128xf32> to vector<1x1x128xf32>
    %25 = vector.broadcast %24 : vector<1x1x128xf32> to vector<2x16x128xf32>
    %26 = arith.mulf %22, %25 : vector<2x16x128xf32>
    %27 = arith.addf %21, %26 : vector<2x16x128xf32>
    %c0_24 = arith.constant 0 : index
    %c7 = arith.constant 7 : index
    %c0_25 = arith.constant 0 : index
    %28 = vector.load %arg14[%c0_24, %c7, %c0_25] : memref<2x24x128xf32, #tpu.memory_space<vmem>>, vector<2x16x128xf32>
    %29 = vector.extract_strided_slice %16 {offsets = [2, 0], sizes = [1, 128], strides = [1, 1]} : vector<4x128xf32> to vector<1x128xf32>
    %30 = vector.shape_cast %29 : vector<1x128xf32> to vector<1x1x128xf32>
    %31 = vector.broadcast %30 : vector<1x1x128xf32> to vector<2x16x128xf32>
    %32 = arith.mulf %28, %31 : vector<2x16x128xf32>
    %33 = arith.addf %27, %32 : vector<2x16x128xf32>
    %c0_26 = arith.constant 0 : index
    %c8_27 = arith.constant 8 : index
    %c0_28 = arith.constant 0 : index
    %34 = vector.load %arg14[%c0_26, %c8_27, %c0_28] : memref<2x24x128xf32, #tpu.memory_space<vmem>>, vector<2x16x128xf32>
    %35 = vector.extract_strided_slice %16 {offsets = [3, 0], sizes = [1, 128], strides = [1, 1]} : vector<4x128xf32> to vector<1x128xf32>
    %36 = vector.shape_cast %35 : vector<1x128xf32> to vector<1x1x128xf32>
    %37 = vector.broadcast %36 : vector<1x1x128xf32> to vector<2x16x128xf32>
    %38 = arith.mulf %34, %37 : vector<2x16x128xf32>
    %39 = arith.addf %33, %38 : vector<2x16x128xf32>
    %c0_29 = arith.constant 0 : index
    %c0_30 = arith.constant 0 : index
    %40 = vector.load %arg5[%c0_29, %c0_30] : memref<1x128xf32, #tpu.memory_space<vmem>>, vector<1x128xf32>
    %41 = vector.shape_cast %40 : vector<1x128xf32> to vector<1x1x128xf32>
    %42 = vector.broadcast %41 : vector<1x1x128xf32> to vector<2x16x128xf32>
    %43 = arith.addf %39, %42 : vector<2x16x128xf32>
    %cst_31 = arith.constant 0.000000e+00 : f32
    %44 = vector.broadcast %cst_31 : f32 to vector<2x16x128xf32>
    %45 = arith.subf %44, %43 : vector<2x16x128xf32>
    %46 = math.exp %45 : vector<2x16x128xf32>
    %cst_32 = arith.constant 1.000000e+00 : f32
    %47 = vector.broadcast %cst_32 : f32 to vector<2x16x128xf32>
    %48 = arith.addf %47, %46 : vector<2x16x128xf32>
    %cst_33 = arith.constant 1.000000e+00 : f32
    %49 = vector.broadcast %cst_33 : f32 to vector<2x16x128xf32>
    %50 = arith.divf %49, %48 : vector<2x16x128xf32>
    %51 = arith.mulf %43, %50 : vector<2x16x128xf32>
    %52 = vector.shape_cast %51 : vector<2x16x128xf32> to vector<32x128xf32>
    %53 = arith.truncf %52 : vector<32x128xf32> to vector<32x128xbf16>
    %c0_34 = arith.constant 0 : index
    %c0_35 = arith.constant 0 : index
    %54 = vector.load %arg6[%c0_34, %c0_35] : memref<128x256xbf16, #tpu.memory_space<vmem>>, vector<128x256xbf16>
    %cst_36 = arith.constant dense<0.000000e+00> : vector<32x256xf32>
    %55 = tpu.matmul %53, %54, %cst_36 {dimension_numbers = #tpu.dot_dimension_numbers<[1], [0], [0], [1], [0, 0, 1, 1], [], []>} : vector<32x128xbf16>, vector<128x256xbf16>, vector<32x256xf32> -> vector<32x256xf32>
    %56 = vector.extract_strided_slice %55 {offsets = [0, 0], sizes = [32, 128], strides = [1, 1]} : vector<32x256xf32> to vector<32x128xf32>
    %c0_37 = arith.constant 0 : index
    %c0_38 = arith.constant 0 : index
    %57 = vector.load %arg7[%c0_37, %c0_38] : memref<1x128xf32, #tpu.memory_space<vmem>>, vector<1x128xf32>
    %58 = vector.broadcast %57 : vector<1x128xf32> to vector<32x128xf32>
    %59 = arith.addf %56, %58 : vector<32x128xf32>
    %cst_39 = arith.constant 0.000000e+00 : f32
    %60 = vector.broadcast %cst_39 : f32 to vector<32x128xf32>
    %61 = arith.maximumf %59, %60 : vector<32x128xf32>
    %62 = math.absf %59 : vector<32x128xf32>
    %cst_40 = arith.constant 0.000000e+00 : f32
    %63 = vector.broadcast %cst_40 : f32 to vector<32x128xf32>
    %64 = arith.subf %63, %62 : vector<32x128xf32>
    %65 = math.exp %64 : vector<32x128xf32>
    %cst_41 = arith.constant 1.000000e+00 : f32
    %66 = vector.broadcast %cst_41 : f32 to vector<32x128xf32>
    %67 = arith.addf %66, %65 : vector<32x128xf32>
    %68 = math.log %67 : vector<32x128xf32>
    %69 = arith.addf %61, %68 : vector<32x128xf32>
    %70 = vector.shape_cast %69 : vector<32x128xf32> to vector<2x16x128xf32>
    %c0_42 = arith.constant 0 : index
    %c0_43 = arith.constant 0 : index
    %c0_44 = arith.constant 0 : index
    %71 = vector.load %arg16[%c0_42, %c0_43, %c0_44] : memref<2x16x128xf32, #tpu.memory_space<vmem>>, vector<2x16x128xf32>
    tpu.vector_store %arg16[%c0_42, %c0_43, %c0_44], %70 {strides = array<i32>} : memref<2x16x128xf32, #tpu.memory_space<vmem>>, vector<2x16x128xf32>,
    %72 = arith.mulf %69, %52 : vector<32x128xf32>
    %73 = vector.shape_cast %72 : vector<32x128xf32> to vector<2x16x128xf32>
    %c0_45 = arith.constant 0 : index
    %c0_46 = arith.constant 0 : index
    %c0_47 = arith.constant 0 : index
    %74 = vector.load %arg17[%c0_45, %c0_46, %c0_47] : memref<2x16x128xf32, #tpu.memory_space<vmem>>, vector<2x16x128xf32>
    tpu.vector_store %arg17[%c0_45, %c0_46, %c0_47], %73 {strides = array<i32>} : memref<2x16x128xf32, #tpu.memory_space<vmem>>, vector<2x16x128xf32>,
    %75 = vector.extract_strided_slice %55 {offsets = [0, 128], sizes = [32, 16], strides = [1, 1]} : vector<32x256xf32> to vector<32x16xf32>
    %76 = vector.shape_cast %75 : vector<32x16xf32> to vector<2x16x16xf32>
    %c0_48 = arith.constant 0 : index
    %c0_49 = arith.constant 0 : index
    %c0_50 = arith.constant 0 : index
    %77 = vector.load %arg18[%c0_48, %c0_49, %c0_50] : memref<2x16x16xf32, #tpu.memory_space<vmem>>, vector<2x16x16xf32>
    tpu.vector_store %arg18[%c0_48, %c0_49, %c0_50], %76 {strides = array<i32>} : memref<2x16x16xf32, #tpu.memory_space<vmem>>, vector<2x16x16xf32>,
    %78 = vector.extract_strided_slice %55 {offsets = [0, 144], sizes = [32, 16], strides = [1, 1]} : vector<32x256xf32> to vector<32x16xf32>
    %79 = vector.shape_cast %78 : vector<32x16xf32> to vector<2x16x16xf32>
    %c0_51 = arith.constant 0 : index
    %c0_52 = arith.constant 0 : index
    %c0_53 = arith.constant 0 : index
    %80 = vector.load %arg19[%c0_51, %c0_52, %c0_53] : memref<2x16x16xf32, #tpu.memory_space<vmem>>, vector<2x16x16xf32>
    tpu.vector_store %arg19[%c0_51, %c0_52, %c0_53], %79 {strides = array<i32>} : memref<2x16x16xf32, #tpu.memory_space<vmem>>, vector<2x16x16xf32>,
    %c0_54 = arith.constant 0 : index
    %c0_55 = arith.constant 0 : index
    %81 = vector.load %arg8[%c0_54, %c0_55] : memref<16x128xf32, #tpu.memory_space<vmem>>, vector<16x128xf32>
    %c0_i32_56 = arith.constant 0 : i32
    %c1_i32 = arith.constant 1 : i32
    %82 = arith.muli %c0_i32_56, %c1_i32 : i32
    %c0_i32_57 = arith.constant 0 : i32
    %83 = arith.addi %c0_i32_57, %82 : i32
    %c16_i32 = arith.constant 16 : i32
    %84 = arith.muli %83, %c16_i32 : i32
    %85 = tpu.assume_multiple %84, 16 : i32
    %c0_58 = arith.constant 0 : index
    %86 = arith.index_cast %85 : i32 to index
    %c0_59 = arith.constant 0 : index
    %87 = vector.load %arg18[%c0_58, %86, %c0_59] : memref<2x16x16xf32, #tpu.memory_space<vmem>>, vector<2x16x16xf32>
    %c0_60 = arith.constant 0 : index
    %88 = arith.index_cast %85 : i32 to index
    %c0_61 = arith.constant 0 : index
    %89 = vector.load %arg19[%c0_60, %88, %c0_61] : memref<2x16x16xf32, #tpu.memory_space<vmem>>, vector<2x16x16xf32>
    %c0_62 = arith.constant 0 : index
    %90 = arith.index_cast %85 : i32 to index
    %c0_63 = arith.constant 0 : index
    %91 = vector.load %arg16[%c0_62, %90, %c0_63] : memref<2x16x128xf32, #tpu.memory_space<vmem>>, vector<2x16x128xf32>
    %c0_64 = arith.constant 0 : index
    %92 = arith.index_cast %85 : i32 to index
    %c0_65 = arith.constant 0 : index
    %93 = vector.load %arg17[%c0_64, %92, %c0_65] : memref<2x16x128xf32, #tpu.memory_space<vmem>>, vector<2x16x128xf32>
    %94 = vector.shape_cast %91 : vector<2x16x128xf32> to vector<2x16x1x128xf32>
    %95 = vector.shape_cast %81 : vector<16x128xf32> to vector<1x1x16x128xf32>
    %96 = vector.broadcast %94 : vector<2x16x1x128xf32> to vector<2x16x16x128xf32>
    %97 = vector.broadcast %95 : vector<1x1x16x128xf32> to vector<2x16x16x128xf32>
    %98 = arith.mulf %96, %97 : vector<2x16x16x128xf32>
    %99 = math.exp %98 : vector<2x16x16x128xf32>
    %c0_66 = arith.constant 0 : index
    %c0_67 = arith.constant 0 : index
    %c0_68 = arith.constant 0 : index
    %c0_69 = arith.constant 0 : index
    %100 = vector.load %arg22[%c0_66, %c0_67, %c0_68, %c0_69] : memref<2x16x16x128xf32, #tpu.memory_space<vmem>>, vector<2x16x16x128xf32>
    tpu.vector_store %arg22[%c0_66, %c0_67, %c0_68, %c0_69], %99 {strides = array<i32>} : memref<2x16x16x128xf32, #tpu.memory_space<vmem>>, vector<2x16x16x128xf32>,
    %101 = vector.shape_cast %87 : vector<2x16x16xf32> to vector<2x16x16x1xf32>
    %102 = vector.shape_cast %93 : vector<2x16x128xf32> to vector<2x16x1x128xf32>
    %103 = vector.broadcast %101 : vector<2x16x16x1xf32> to vector<2x16x16x128xf32>
    %104 = vector.broadcast %102 : vector<2x16x1x128xf32> to vector<2x16x16x128xf32>
    %105 = arith.mulf %103, %104 : vector<2x16x16x128xf32>
    %c0_70 = arith.constant 0 : index
    %c0_71 = arith.constant 0 : index
    %c0_72 = arith.constant 0 : index
    %c0_73 = arith.constant 0 : index
    %106 = vector.load %arg23[%c0_70, %c0_71, %c0_72, %c0_73] : memref<2x16x16x128xf32, #tpu.memory_space<vmem>>, vector<2x16x16x128xf32>
    tpu.vector_store %arg23[%c0_70, %c0_71, %c0_72, %c0_73], %105 {strides = array<i32>} : memref<2x16x16x128xf32, #tpu.memory_space<vmem>>, vector<2x16x16x128xf32>,
    %c0_74 = arith.constant 0 : index
    %c0_75 = arith.constant 0 : index
    %c0_76 = arith.constant 0 : index
    %107 = vector.load %arg21[%c0_74, %c0_75, %c0_76] : memref<2x16x128xf32, #tpu.memory_space<vmem>>, vector<2x16x128xf32>
    %c0_77 = arith.constant 0 : index
    %c0_78 = arith.constant 0 : index
    %c0_79 = arith.constant 0 : index
    %c0_80 = arith.constant 0 : index
    %108 = vector.load %arg22[%c0_77, %c0_78, %c0_79, %c0_80] : memref<2x16x16x128xf32, #tpu.memory_space<vmem>>, vector<2x1x16x128xf32>
    %109 = vector.shape_cast %108 : vector<2x1x16x128xf32> to vector<2x16x128xf32>
    %110 = arith.mulf %109, %107 : vector<2x16x128xf32>
    %c0_81 = arith.constant 0 : index
    %c0_82 = arith.constant 0 : index
    %c0_83 = arith.constant 0 : index
    %c0_84 = arith.constant 0 : index
    %111 = vector.load %arg23[%c0_81, %c0_82, %c0_83, %c0_84] : memref<2x16x16x128xf32, #tpu.memory_space<vmem>>, vector<2x1x16x128xf32>
    %112 = vector.shape_cast %111 : vector<2x1x16x128xf32> to vector<2x16x128xf32>
    %113 = arith.addf %110, %112 : vector<2x16x128xf32>
    %c0_85 = arith.constant 0 : index
    %c0_86 = arith.constant 0 : index
    %c0_87 = arith.constant 0 : index
    %c0_88 = arith.constant 0 : index
    %114 = vector.load %arg24[%c0_85, %c0_86, %c0_87, %c0_88] : memref<2x16x16x128xf32, #tpu.memory_space<vmem>>, vector<2x1x16x128xf32>
    %115 = vector.shape_cast %114 : vector<2x1x16x128xf32> to vector<2x16x128xf32>
    %116 = vector.shape_cast %113 : vector<2x16x128xf32> to vector<2x1x16x128xf32>
    tpu.vector_store %arg24[%c0_85, %c0_86, %c0_87, %c0_88], %116 {strides = array<i32>} : memref<2x16x16x128xf32, #tpu.memory_space<vmem>>, vector<2x1x16x128xf32>,
    %c0_89 = arith.constant 0 : index
    %c1 = arith.constant 1 : index
    %c0_90 = arith.constant 0 : index
    %c0_91 = arith.constant 0 : index
    %117 = vector.load %arg22[%c0_89, %c1, %c0_90, %c0_91] : memref<2x16x16x128xf32, #tpu.memory_space<vmem>>, vector<2x1x16x128xf32>
    %118 = vector.shape_cast %117 : vector<2x1x16x128xf32> to vector<2x16x128xf32>
    %119 = arith.mulf %118, %113 : vector<2x16x128xf32>
    %c0_92 = arith.constant 0 : index
    %c1_93 = arith.constant 1 : index
    %c0_94 = arith.constant 0 : index
    %c0_95 = arith.constant 0 : index
    %120 = vector.load %arg23[%c0_92, %c1_93, %c0_94, %c0_95] : memref<2x16x16x128xf32, #tpu.memory_space<vmem>>, vector<2x1x16x128xf32>
    %121 = vector.shape_cast %120 : vector<2x1x16x128xf32> to vector<2x16x128xf32>
    %122 = arith.addf %119, %121 : vector<2x16x128xf32>
    %c0_96 = arith.constant 0 : index
    %c1_97 = arith.constant 1 : index
    %c0_98 = arith.constant 0 : index
    %c0_99 = arith.constant 0 : index
    %123 = vector.load %arg24[%c0_96, %c1_97, %c0_98, %c0_99] : memref<2x16x16x128xf32, #tpu.memory_space<vmem>>, vector<2x1x16x128xf32>
    %124 = vector.shape_cast %123 : vector<2x1x16x128xf32> to vector<2x16x128xf32>
    %125 = vector.shape_cast %122 : vector<2x16x128xf32> to vector<2x1x16x128xf32>
    tpu.vector_store %arg24[%c0_96, %c1_97, %c0_98, %c0_99], %125 {strides = array<i32>} : memref<2x16x16x128xf32, #tpu.memory_space<vmem>>, vector<2x1x16x128xf32>,
    %c0_100 = arith.constant 0 : index
    %c2 = arith.constant 2 : index
    %c0_101 = arith.constant 0 : index
    %c0_102 = arith.constant 0 : index
    %126 = vector.load %arg22[%c0_100, %c2, %c0_101, %c0_102] : memref<2x16x16x128xf32, #tpu.memory_space<vmem>>, vector<2x1x16x128xf32>
    %127 = vector.shape_cast %126 : vector<2x1x16x128xf32> to vector<2x16x128xf32>
    %128 = arith.mulf %127, %122 : vector<2x16x128xf32>
    %c0_103 = arith.constant 0 : index
    %c2_104 = arith.constant 2 : index
    %c0_105 = arith.constant 0 : index
    %c0_106 = arith.constant 0 : index
    %129 = vector.load %arg23[%c0_103, %c2_104, %c0_105, %c0_106] : memref<2x16x16x128xf32, #tpu.memory_space<vmem>>, vector<2x1x16x128xf32>
    %130 = vector.shape_cast %129 : vector<2x1x16x128xf32> to vector<2x16x128xf32>
    %131 = arith.addf %128, %130 : vector<2x16x128xf32>
    %c0_107 = arith.constant 0 : index
    %c2_108 = arith.constant 2 : index
    %c0_109 = arith.constant 0 : index
    %c0_110 = arith.constant 0 : index
    %132 = vector.load %arg24[%c0_107, %c2_108, %c0_109, %c0_110] : memref<2x16x16x128xf32, #tpu.memory_space<vmem>>, vector<2x1x16x128xf32>
    %133 = vector.shape_cast %132 : vector<2x1x16x128xf32> to vector<2x16x128xf32>
    %134 = vector.shape_cast %131 : vector<2x16x128xf32> to vector<2x1x16x128xf32>
    tpu.vector_store %arg24[%c0_107, %c2_108, %c0_109, %c0_110], %134 {strides = array<i32>} : memref<2x16x16x128xf32, #tpu.memory_space<vmem>>, vector<2x1x16x128xf32>,
    %c0_111 = arith.constant 0 : index
    %c3 = arith.constant 3 : index
    %c0_112 = arith.constant 0 : index
    %c0_113 = arith.constant 0 : index
    %135 = vector.load %arg22[%c0_111, %c3, %c0_112, %c0_113] : memref<2x16x16x128xf32, #tpu.memory_space<vmem>>, vector<2x1x16x128xf32>
    %136 = vector.shape_cast %135 : vector<2x1x16x128xf32> to vector<2x16x128xf32>
    %137 = arith.mulf %136, %131 : vector<2x16x128xf32>
    %c0_114 = arith.constant 0 : index
    %c3_115 = arith.constant 3 : index
    %c0_116 = arith.constant 0 : index
    %c0_117 = arith.constant 0 : index
    %138 = vector.load %arg23[%c0_114, %c3_115, %c0_116, %c0_117] : memref<2x16x16x128xf32, #tpu.memory_space<vmem>>, vector<2x1x16x128xf32>
    %139 = vector.shape_cast %138 : vector<2x1x16x128xf32> to vector<2x16x128xf32>
    %140 = arith.addf %137, %139 : vector<2x16x128xf32>
    %c0_118 = arith.constant 0 : index
    %c3_119 = arith.constant 3 : index
    %c0_120 = arith.constant 0 : index
    %c0_121 = arith.constant 0 : index
    %141 = vector.load %arg24[%c0_118, %c3_119, %c0_120, %c0_121] : memref<2x16x16x128xf32, #tpu.memory_space<vmem>>, vector<2x1x16x128xf32>
    %142 = vector.shape_cast %141 : vector<2x1x16x128xf32> to vector<2x16x128xf32>
    %143 = vector.shape_cast %140 : vector<2x16x128xf32> to vector<2x1x16x128xf32>
    tpu.vector_store %arg24[%c0_118, %c3_119, %c0_120, %c0_121], %143 {strides = array<i32>} : memref<2x16x16x128xf32, #tpu.memory_space<vmem>>, vector<2x1x16x128xf32>,
    %c0_122 = arith.constant 0 : index
    %c4 = arith.constant 4 : index
    %c0_123 = arith.constant 0 : index
    %c0_124 = arith.constant 0 : index
    %144 = vector.load %arg22[%c0_122, %c4, %c0_123, %c0_124] : memref<2x16x16x128xf32, #tpu.memory_space<vmem>>, vector<2x1x16x128xf32>
    %145 = vector.shape_cast %144 : vector<2x1x16x128xf32> to vector<2x16x128xf32>
    %146 = arith.mulf %145, %140 : vector<2x16x128xf32>
    %c0_125 = arith.constant 0 : index
    %c4_126 = arith.constant 4 : index
    %c0_127 = arith.constant 0 : index
    %c0_128 = arith.constant 0 : index
    %147 = vector.load %arg23[%c0_125, %c4_126, %c0_127, %c0_128] : memref<2x16x16x128xf32, #tpu.memory_space<vmem>>, vector<2x1x16x128xf32>
    %148 = vector.shape_cast %147 : vector<2x1x16x128xf32> to vector<2x16x128xf32>
    %149 = arith.addf %146, %148 : vector<2x16x128xf32>
    %c0_129 = arith.constant 0 : index
    %c4_130 = arith.constant 4 : index
    %c0_131 = arith.constant 0 : index
    %c0_132 = arith.constant 0 : index
    %150 = vector.load %arg24[%c0_129, %c4_130, %c0_131, %c0_132] : memref<2x16x16x128xf32, #tpu.memory_space<vmem>>, vector<2x1x16x128xf32>
    %151 = vector.shape_cast %150 : vector<2x1x16x128xf32> to vector<2x16x128xf32>
    %152 = vector.shape_cast %149 : vector<2x16x128xf32> to vector<2x1x16x128xf32>
    tpu.vector_store %arg24[%c0_129, %c4_130, %c0_131, %c0_132], %152 {strides = array<i32>} : memref<2x16x16x128xf32, #tpu.memory_space<vmem>>, vector<2x1x16x128xf32>,
    %c0_133 = arith.constant 0 : index
    %c5_134 = arith.constant 5 : index
    %c0_135 = arith.constant 0 : index
    %c0_136 = arith.constant 0 : index
    %153 = vector.load %arg22[%c0_133, %c5_134, %c0_135, %c0_136] : memref<2x16x16x128xf32, #tpu.memory_space<vmem>>, vector<2x1x16x128xf32>
    %154 = vector.shape_cast %153 : vector<2x1x16x128xf32> to vector<2x16x128xf32>
    %155 = arith.mulf %154, %149 : vector<2x16x128xf32>
    %c0_137 = arith.constant 0 : index
    %c5_138 = arith.constant 5 : index
    %c0_139 = arith.constant 0 : index
    %c0_140 = arith.constant 0 : index
    %156 = vector.load %arg23[%c0_137, %c5_138, %c0_139, %c0_140] : memref<2x16x16x128xf32, #tpu.memory_space<vmem>>, vector<2x1x16x128xf32>
    %157 = vector.shape_cast %156 : vector<2x1x16x128xf32> to vector<2x16x128xf32>
    %158 = arith.addf %155, %157 : vector<2x16x128xf32>
    %c0_141 = arith.constant 0 : index
    %c5_142 = arith.constant 5 : index
    %c0_143 = arith.constant 0 : index
    %c0_144 = arith.constant 0 : index
    %159 = vector.load %arg24[%c0_141, %c5_142, %c0_143, %c0_144] : memref<2x16x16x128xf32, #tpu.memory_space<vmem>>, vector<2x1x16x128xf32>
    %160 = vector.shape_cast %159 : vector<2x1x16x128xf32> to vector<2x16x128xf32>
    %161 = vector.shape_cast %158 : vector<2x16x128xf32> to vector<2x1x16x128xf32>
    tpu.vector_store %arg24[%c0_141, %c5_142, %c0_143, %c0_144], %161 {strides = array<i32>} : memref<2x16x16x128xf32, #tpu.memory_space<vmem>>, vector<2x1x16x128xf32>,
    %c0_145 = arith.constant 0 : index
    %c6_146 = arith.constant 6 : index
    %c0_147 = arith.constant 0 : index
    %c0_148 = arith.constant 0 : index
    %162 = vector.load %arg22[%c0_145, %c6_146, %c0_147, %c0_148] : memref<2x16x16x128xf32, #tpu.memory_space<vmem>>, vector<2x1x16x128xf32>
    %163 = vector.shape_cast %162 : vector<2x1x16x128xf32> to vector<2x16x128xf32>
    %164 = arith.mulf %163, %158 : vector<2x16x128xf32>
    %c0_149 = arith.constant 0 : index
    %c6_150 = arith.constant 6 : index
    %c0_151 = arith.constant 0 : index
    %c0_152 = arith.constant 0 : index
    %165 = vector.load %arg23[%c0_149, %c6_150, %c0_151, %c0_152] : memref<2x16x16x128xf32, #tpu.memory_space<vmem>>, vector<2x1x16x128xf32>
    %166 = vector.shape_cast %165 : vector<2x1x16x128xf32> to vector<2x16x128xf32>
    %167 = arith.addf %164, %166 : vector<2x16x128xf32>
    %c0_153 = arith.constant 0 : index
    %c6_154 = arith.constant 6 : index
    %c0_155 = arith.constant 0 : index
    %c0_156 = arith.constant 0 : index
    %168 = vector.load %arg24[%c0_153, %c6_154, %c0_155, %c0_156] : memref<2x16x16x128xf32, #tpu.memory_space<vmem>>, vector<2x1x16x128xf32>
    %169 = vector.shape_cast %168 : vector<2x1x16x128xf32> to vector<2x16x128xf32>
    %170 = vector.shape_cast %167 : vector<2x16x128xf32> to vector<2x1x16x128xf32>
    tpu.vector_store %arg24[%c0_153, %c6_154, %c0_155, %c0_156], %170 {strides = array<i32>} : memref<2x16x16x128xf32, #tpu.memory_space<vmem>>, vector<2x1x16x128xf32>,
    %c0_157 = arith.constant 0 : index
    %c7_158 = arith.constant 7 : index
    %c0_159 = arith.constant 0 : index
    %c0_160 = arith.constant 0 : index
    %171 = vector.load %arg22[%c0_157, %c7_158, %c0_159, %c0_160] : memref<2x16x16x128xf32, #tpu.memory_space<vmem>>, vector<2x1x16x128xf32>
    %172 = vector.shape_cast %171 : vector<2x1x16x128xf32> to vector<2x16x128xf32>
    %173 = arith.mulf %172, %167 : vector<2x16x128xf32>
    %c0_161 = arith.constant 0 : index
    %c7_162 = arith.constant 7 : index
    %c0_163 = arith.constant 0 : index
    %c0_164 = arith.constant 0 : index
    %174 = vector.load %arg23[%c0_161, %c7_162, %c0_163, %c0_164] : memref<2x16x16x128xf32, #tpu.memory_space<vmem>>, vector<2x1x16x128xf32>
    %175 = vector.shape_cast %174 : vector<2x1x16x128xf32> to vector<2x16x128xf32>
    %176 = arith.addf %173, %175 : vector<2x16x128xf32>
    %c0_165 = arith.constant 0 : index
    %c7_166 = arith.constant 7 : index
    %c0_167 = arith.constant 0 : index
    %c0_168 = arith.constant 0 : index
    %177 = vector.load %arg24[%c0_165, %c7_166, %c0_167, %c0_168] : memref<2x16x16x128xf32, #tpu.memory_space<vmem>>, vector<2x1x16x128xf32>
    %178 = vector.shape_cast %177 : vector<2x1x16x128xf32> to vector<2x16x128xf32>
    %179 = vector.shape_cast %176 : vector<2x16x128xf32> to vector<2x1x16x128xf32>
    tpu.vector_store %arg24[%c0_165, %c7_166, %c0_167, %c0_168], %179 {strides = array<i32>} : memref<2x16x16x128xf32, #tpu.memory_space<vmem>>, vector<2x1x16x128xf32>,
    %c0_169 = arith.constant 0 : index
    %c8_170 = arith.constant 8 : index
    %c0_171 = arith.constant 0 : index
    %c0_172 = arith.constant 0 : index
    %180 = vector.load %arg22[%c0_169, %c8_170, %c0_171, %c0_172] : memref<2x16x16x128xf32, #tpu.memory_space<vmem>>, vector<2x1x16x128xf32>
    %181 = vector.shape_cast %180 : vector<2x1x16x128xf32> to vector<2x16x128xf32>
    %182 = arith.mulf %181, %176 : vector<2x16x128xf32>
    %c0_173 = arith.constant 0 : index
    %c8_174 = arith.constant 8 : index
    %c0_175 = arith.constant 0 : index
    %c0_176 = arith.constant 0 : index
    %183 = vector.load %arg23[%c0_173, %c8_174, %c0_175, %c0_176] : memref<2x16x16x128xf32, #tpu.memory_space<vmem>>, vector<2x1x16x128xf32>
    %184 = vector.shape_cast %183 : vector<2x1x16x128xf32> to vector<2x16x128xf32>
    %185 = arith.addf %182, %184 : vector<2x16x128xf32>
    %c0_177 = arith.constant 0 : index
    %c8_178 = arith.constant 8 : index
    %c0_179 = arith.constant 0 : index
    %c0_180 = arith.constant 0 : index
    %186 = vector.load %arg24[%c0_177, %c8_178, %c0_179, %c0_180] : memref<2x16x16x128xf32, #tpu.memory_space<vmem>>, vector<2x1x16x128xf32>
    %187 = vector.shape_cast %186 : vector<2x1x16x128xf32> to vector<2x16x128xf32>
    %188 = vector.shape_cast %185 : vector<2x16x128xf32> to vector<2x1x16x128xf32>
    tpu.vector_store %arg24[%c0_177, %c8_178, %c0_179, %c0_180], %188 {strides = array<i32>} : memref<2x16x16x128xf32, #tpu.memory_space<vmem>>, vector<2x1x16x128xf32>,
    %c0_181 = arith.constant 0 : index
    %c9 = arith.constant 9 : index
    %c0_182 = arith.constant 0 : index
    %c0_183 = arith.constant 0 : index
    %189 = vector.load %arg22[%c0_181, %c9, %c0_182, %c0_183] : memref<2x16x16x128xf32, #tpu.memory_space<vmem>>, vector<2x1x16x128xf32>
    %190 = vector.shape_cast %189 : vector<2x1x16x128xf32> to vector<2x16x128xf32>
    %191 = arith.mulf %190, %185 : vector<2x16x128xf32>
    %c0_184 = arith.constant 0 : index
    %c9_185 = arith.constant 9 : index
    %c0_186 = arith.constant 0 : index
    %c0_187 = arith.constant 0 : index
    %192 = vector.load %arg23[%c0_184, %c9_185, %c0_186, %c0_187] : memref<2x16x16x128xf32, #tpu.memory_space<vmem>>, vector<2x1x16x128xf32>
    %193 = vector.shape_cast %192 : vector<2x1x16x128xf32> to vector<2x16x128xf32>
    %194 = arith.addf %191, %193 : vector<2x16x128xf32>
    %c0_188 = arith.constant 0 : index
    %c9_189 = arith.constant 9 : index
    %c0_190 = arith.constant 0 : index
    %c0_191 = arith.constant 0 : index
    %195 = vector.load %arg24[%c0_188, %c9_189, %c0_190, %c0_191] : memref<2x16x16x128xf32, #tpu.memory_space<vmem>>, vector<2x1x16x128xf32>
    %196 = vector.shape_cast %195 : vector<2x1x16x128xf32> to vector<2x16x128xf32>
    %197 = vector.shape_cast %194 : vector<2x16x128xf32> to vector<2x1x16x128xf32>
    tpu.vector_store %arg24[%c0_188, %c9_189, %c0_190, %c0_191], %197 {strides = array<i32>} : memref<2x16x16x128xf32, #tpu.memory_space<vmem>>, vector<2x1x16x128xf32>,
    %c0_192 = arith.constant 0 : index
    %c10 = arith.constant 10 : index
    %c0_193 = arith.constant 0 : index
    %c0_194 = arith.constant 0 : index
    %198 = vector.load %arg22[%c0_192, %c10, %c0_193, %c0_194] : memref<2x16x16x128xf32, #tpu.memory_space<vmem>>, vector<2x1x16x128xf32>
    %199 = vector.shape_cast %198 : vector<2x1x16x128xf32> to vector<2x16x128xf32>
    %200 = arith.mulf %199, %194 : vector<2x16x128xf32>
    %c0_195 = arith.constant 0 : index
    %c10_196 = arith.constant 10 : index
    %c0_197 = arith.constant 0 : index
    %c0_198 = arith.constant 0 : index
    %201 = vector.load %arg23[%c0_195, %c10_196, %c0_197, %c0_198] : memref<2x16x16x128xf32, #tpu.memory_space<vmem>>, vector<2x1x16x128xf32>
    %202 = vector.shape_cast %201 : vector<2x1x16x128xf32> to vector<2x16x128xf32>
    %203 = arith.addf %200, %202 : vector<2x16x128xf32>
    %c0_199 = arith.constant 0 : index
    %c10_200 = arith.constant 10 : index
    %c0_201 = arith.constant 0 : index
    %c0_202 = arith.constant 0 : index
    %204 = vector.load %arg24[%c0_199, %c10_200, %c0_201, %c0_202] : memref<2x16x16x128xf32, #tpu.memory_space<vmem>>, vector<2x1x16x128xf32>
    %205 = vector.shape_cast %204 : vector<2x1x16x128xf32> to vector<2x16x128xf32>
    %206 = vector.shape_cast %203 : vector<2x16x128xf32> to vector<2x1x16x128xf32>
    tpu.vector_store %arg24[%c0_199, %c10_200, %c0_201, %c0_202], %206 {strides = array<i32>} : memref<2x16x16x128xf32, #tpu.memory_space<vmem>>, vector<2x1x16x128xf32>,
    %c0_203 = arith.constant 0 : index
    %c11 = arith.constant 11 : index
    %c0_204 = arith.constant 0 : index
    %c0_205 = arith.constant 0 : index
    %207 = vector.load %arg22[%c0_203, %c11, %c0_204, %c0_205] : memref<2x16x16x128xf32, #tpu.memory_space<vmem>>, vector<2x1x16x128xf32>
    %208 = vector.shape_cast %207 : vector<2x1x16x128xf32> to vector<2x16x128xf32>
    %209 = arith.mulf %208, %203 : vector<2x16x128xf32>
    %c0_206 = arith.constant 0 : index
    %c11_207 = arith.constant 11 : index
    %c0_208 = arith.constant 0 : index
    %c0_209 = arith.constant 0 : index
    %210 = vector.load %arg23[%c0_206, %c11_207, %c0_208, %c0_209] : memref<2x16x16x128xf32, #tpu.memory_space<vmem>>, vector<2x1x16x128xf32>
    %211 = vector.shape_cast %210 : vector<2x1x16x128xf32> to vector<2x16x128xf32>
    %212 = arith.addf %209, %211 : vector<2x16x128xf32>
    %c0_210 = arith.constant 0 : index
    %c11_211 = arith.constant 11 : index
    %c0_212 = arith.constant 0 : index
    %c0_213 = arith.constant 0 : index
    %213 = vector.load %arg24[%c0_210, %c11_211, %c0_212, %c0_213] : memref<2x16x16x128xf32, #tpu.memory_space<vmem>>, vector<2x1x16x128xf32>
    %214 = vector.shape_cast %213 : vector<2x1x16x128xf32> to vector<2x16x128xf32>
    %215 = vector.shape_cast %212 : vector<2x16x128xf32> to vector<2x1x16x128xf32>
    tpu.vector_store %arg24[%c0_210, %c11_211, %c0_212, %c0_213], %215 {strides = array<i32>} : memref<2x16x16x128xf32, #tpu.memory_space<vmem>>, vector<2x1x16x128xf32>,
    %c0_214 = arith.constant 0 : index
    %c12 = arith.constant 12 : index
    %c0_215 = arith.constant 0 : index
    %c0_216 = arith.constant 0 : index
    %216 = vector.load %arg22[%c0_214, %c12, %c0_215, %c0_216] : memref<2x16x16x128xf32, #tpu.memory_space<vmem>>, vector<2x1x16x128xf32>
    %217 = vector.shape_cast %216 : vector<2x1x16x128xf32> to vector<2x16x128xf32>
    %218 = arith.mulf %217, %212 : vector<2x16x128xf32>
    %c0_217 = arith.constant 0 : index
    %c12_218 = arith.constant 12 : index
    %c0_219 = arith.constant 0 : index
    %c0_220 = arith.constant 0 : index
    %219 = vector.load %arg23[%c0_217, %c12_218, %c0_219, %c0_220] : memref<2x16x16x128xf32, #tpu.memory_space<vmem>>, vector<2x1x16x128xf32>
    %220 = vector.shape_cast %219 : vector<2x1x16x128xf32> to vector<2x16x128xf32>
    %221 = arith.addf %218, %220 : vector<2x16x128xf32>
    %c0_221 = arith.constant 0 : index
    %c12_222 = arith.constant 12 : index
    %c0_223 = arith.constant 0 : index
    %c0_224 = arith.constant 0 : index
    %222 = vector.load %arg24[%c0_221, %c12_222, %c0_223, %c0_224] : memref<2x16x16x128xf32, #tpu.memory_space<vmem>>, vector<2x1x16x128xf32>
    %223 = vector.shape_cast %222 : vector<2x1x16x128xf32> to vector<2x16x128xf32>
    %224 = vector.shape_cast %221 : vector<2x16x128xf32> to vector<2x1x16x128xf32>
    tpu.vector_store %arg24[%c0_221, %c12_222, %c0_223, %c0_224], %224 {strides = array<i32>} : memref<2x16x16x128xf32, #tpu.memory_space<vmem>>, vector<2x1x16x128xf32>,
    %c0_225 = arith.constant 0 : index
    %c13 = arith.constant 13 : index
    %c0_226 = arith.constant 0 : index
    %c0_227 = arith.constant 0 : index
    %225 = vector.load %arg22[%c0_225, %c13, %c0_226, %c0_227] : memref<2x16x16x128xf32, #tpu.memory_space<vmem>>, vector<2x1x16x128xf32>
    %226 = vector.shape_cast %225 : vector<2x1x16x128xf32> to vector<2x16x128xf32>
    %227 = arith.mulf %226, %221 : vector<2x16x128xf32>
    %c0_228 = arith.constant 0 : index
    %c13_229 = arith.constant 13 : index
    %c0_230 = arith.constant 0 : index
    %c0_231 = arith.constant 0 : index
    %228 = vector.load %arg23[%c0_228, %c13_229, %c0_230, %c0_231] : memref<2x16x16x128xf32, #tpu.memory_space<vmem>>, vector<2x1x16x128xf32>
    %229 = vector.shape_cast %228 : vector<2x1x16x128xf32> to vector<2x16x128xf32>
    %230 = arith.addf %227, %229 : vector<2x16x128xf32>
    %c0_232 = arith.constant 0 : index
    %c13_233 = arith.constant 13 : index
    %c0_234 = arith.constant 0 : index
    %c0_235 = arith.constant 0 : index
    %231 = vector.load %arg24[%c0_232, %c13_233, %c0_234, %c0_235] : memref<2x16x16x128xf32, #tpu.memory_space<vmem>>, vector<2x1x16x128xf32>
    %232 = vector.shape_cast %231 : vector<2x1x16x128xf32> to vector<2x16x128xf32>
    %233 = vector.shape_cast %230 : vector<2x16x128xf32> to vector<2x1x16x128xf32>
    tpu.vector_store %arg24[%c0_232, %c13_233, %c0_234, %c0_235], %233 {strides = array<i32>} : memref<2x16x16x128xf32, #tpu.memory_space<vmem>>, vector<2x1x16x128xf32>,
    %c0_236 = arith.constant 0 : index
    %c14 = arith.constant 14 : index
    %c0_237 = arith.constant 0 : index
    %c0_238 = arith.constant 0 : index
    %234 = vector.load %arg22[%c0_236, %c14, %c0_237, %c0_238] : memref<2x16x16x128xf32, #tpu.memory_space<vmem>>, vector<2x1x16x128xf32>
    %235 = vector.shape_cast %234 : vector<2x1x16x128xf32> to vector<2x16x128xf32>
    %236 = arith.mulf %235, %230 : vector<2x16x128xf32>
    %c0_239 = arith.constant 0 : index
    %c14_240 = arith.constant 14 : index
    %c0_241 = arith.constant 0 : index
    %c0_242 = arith.constant 0 : index
    %237 = vector.load %arg23[%c0_239, %c14_240, %c0_241, %c0_242] : memref<2x16x16x128xf32, #tpu.memory_space<vmem>>, vector<2x1x16x128xf32>
    %238 = vector.shape_cast %237 : vector<2x1x16x128xf32> to vector<2x16x128xf32>
    %239 = arith.addf %236, %238 : vector<2x16x128xf32>
    %c0_243 = arith.constant 0 : index
    %c14_244 = arith.constant 14 : index
    %c0_245 = arith.constant 0 : index
    %c0_246 = arith.constant 0 : index
    %240 = vector.load %arg24[%c0_243, %c14_244, %c0_245, %c0_246] : memref<2x16x16x128xf32, #tpu.memory_space<vmem>>, vector<2x1x16x128xf32>
    %241 = vector.shape_cast %240 : vector<2x1x16x128xf32> to vector<2x16x128xf32>
    %242 = vector.shape_cast %239 : vector<2x16x128xf32> to vector<2x1x16x128xf32>
    tpu.vector_store %arg24[%c0_243, %c14_244, %c0_245, %c0_246], %242 {strides = array<i32>} : memref<2x16x16x128xf32, #tpu.memory_space<vmem>>, vector<2x1x16x128xf32>,
    %c0_247 = arith.constant 0 : index
    %c15 = arith.constant 15 : index
    %c0_248 = arith.constant 0 : index
    %c0_249 = arith.constant 0 : index
    %243 = vector.load %arg22[%c0_247, %c15, %c0_248, %c0_249] : memref<2x16x16x128xf32, #tpu.memory_space<vmem>>, vector<2x1x16x128xf32>
    %244 = vector.shape_cast %243 : vector<2x1x16x128xf32> to vector<2x16x128xf32>
    %245 = arith.mulf %244, %239 : vector<2x16x128xf32>
    %c0_250 = arith.constant 0 : index
    %c15_251 = arith.constant 15 : index
    %c0_252 = arith.constant 0 : index
    %c0_253 = arith.constant 0 : index
    %246 = vector.load %arg23[%c0_250, %c15_251, %c0_252, %c0_253] : memref<2x16x16x128xf32, #tpu.memory_space<vmem>>, vector<2x1x16x128xf32>
    %247 = vector.shape_cast %246 : vector<2x1x16x128xf32> to vector<2x16x128xf32>
    %248 = arith.addf %245, %247 : vector<2x16x128xf32>
    %c0_254 = arith.constant 0 : index
    %c15_255 = arith.constant 15 : index
    %c0_256 = arith.constant 0 : index
    %c0_257 = arith.constant 0 : index
    %249 = vector.load %arg24[%c0_254, %c15_255, %c0_256, %c0_257] : memref<2x16x16x128xf32, #tpu.memory_space<vmem>>, vector<2x1x16x128xf32>
    %250 = vector.shape_cast %249 : vector<2x1x16x128xf32> to vector<2x16x128xf32>
    %251 = vector.shape_cast %248 : vector<2x16x128xf32> to vector<2x1x16x128xf32>
    tpu.vector_store %arg24[%c0_254, %c15_255, %c0_256, %c0_257], %251 {strides = array<i32>} : memref<2x16x16x128xf32, #tpu.memory_space<vmem>>, vector<2x1x16x128xf32>,
    %c0_258 = arith.constant 0 : index
    %c0_259 = arith.constant 0 : index
    %c0_260 = arith.constant 0 : index
    %252 = vector.load %arg21[%c0_258, %c0_259, %c0_260] : memref<2x16x128xf32, #tpu.memory_space<vmem>>, vector<2x16x128xf32>
    tpu.vector_store %arg21[%c0_258, %c0_259, %c0_260], %248 {strides = array<i32>} : memref<2x16x128xf32, #tpu.memory_space<vmem>>, vector<2x16x128xf32>,
    %c0_261 = arith.constant 0 : index
    %c0_262 = arith.constant 0 : index
    %c0_263 = arith.constant 0 : index
    %c0_264 = arith.constant 0 : index
    %253 = vector.load %arg24[%c0_261, %c0_262, %c0_263, %c0_264] : memref<2x16x16x128xf32, #tpu.memory_space<vmem>>, vector<2x16x16x128xf32>
    %254 = vector.shape_cast %89 : vector<2x16x16xf32> to vector<2x16x16x1xf32>
    %255 = vector.broadcast %254 : vector<2x16x16x1xf32> to vector<2x16x16x128xf32>
    %256 = arith.mulf %253, %255 : vector<2x16x16x128xf32>
    %cst_265 = arith.constant dense<0.000000e+00> : vector<2x16x128xf32>
    %257 = vector.multi_reduction <add>, %256, %cst_265 [2] : vector<2x16x16x128xf32> to vector<2x16x128xf32>
    %c0_266 = arith.constant 0 : index
    %258 = arith.index_cast %85 : i32 to index
    %c0_267 = arith.constant 0 : index
    %259 = vector.load %arg20[%c0_266, %258, %c0_267] : memref<2x16x128xf32, #tpu.memory_space<vmem>>, vector<2x16x128xf32>
    tpu.vector_store %arg20[%c0_266, %258, %c0_267], %257 {strides = array<i32>} : memref<2x16x128xf32, #tpu.memory_space<vmem>>, vector<2x16x128xf32>,
    %c1_i32_268 = arith.constant 1 : i32
    %c0_269 = arith.constant 0 : index
    %c0_270 = arith.constant 0 : index
    %c0_271 = arith.constant 0 : index
    %260 = vector.load %arg20[%c0_269, %c0_270, %c0_271] : memref<2x16x128xf32, #tpu.memory_space<vmem>>, vector<2x16x128xf32>
    %261 = vector.shape_cast %260 : vector<2x16x128xf32> to vector<32x128xf32>
    %c0_272 = arith.constant 0 : index
    %c0_273 = arith.constant 0 : index
    %262 = vector.load %arg9[%c0_272, %c0_273] : memref<1x128xf32, #tpu.memory_space<vmem>>, vector<1x128xf32>
    %263 = vector.broadcast %262 : vector<1x128xf32> to vector<32x128xf32>
    %264 = arith.mulf %52, %263 : vector<32x128xf32>
    %265 = arith.addf %261, %264 : vector<32x128xf32>
    %cst_274 = arith.constant 0.000000e+00 : f32
    %266 = vector.broadcast %cst_274 : f32 to vector<32x128xf32>
    %267 = arith.subf %266, %9 : vector<32x128xf32>
    %268 = math.exp %267 : vector<32x128xf32>
    %cst_275 = arith.constant 1.000000e+00 : f32
    %269 = vector.broadcast %cst_275 : f32 to vector<32x128xf32>
    %270 = arith.addf %269, %268 : vector<32x128xf32>
    %cst_276 = arith.constant 1.000000e+00 : f32
    %271 = vector.broadcast %cst_276 : f32 to vector<32x128xf32>
    %272 = arith.divf %271, %270 : vector<32x128xf32>
    %273 = arith.mulf %9, %272 : vector<32x128xf32>
    %274 = arith.mulf %265, %273 : vector<32x128xf32>
    %275 = arith.truncf %274 : vector<32x128xf32> to vector<32x128xbf16>
    %c0_277 = arith.constant 0 : index
    %c0_278 = arith.constant 0 : index
    %276 = vector.load %arg10[%c0_277, %c0_278] : memref<128x128xbf16, #tpu.memory_space<vmem>>, vector<128x128xbf16>
    %cst_279 = arith.constant dense<0.000000e+00> : vector<32x128xf32>
    %277 = tpu.matmul %275, %276, %cst_279 {dimension_numbers = #tpu.dot_dimension_numbers<[1], [0], [0], [1], [0, 0, 1, 1], [], []>} : vector<32x128xbf16>, vector<128x128xbf16>, vector<32x128xf32> -> vector<32x128xf32>
    %cst_280 = arith.constant dense<0.000000e+00> : vector<32xf32>
    %278 = vector.multi_reduction <add>, %277, %cst_280 [1] : vector<32x128xf32> to vector<32xf32>
    %279 = vector.shape_cast %278 : vector<32xf32> to vector<32x1xf32>
    %cst_281 = arith.constant 1.562500e-02 : f32
    %280 = vector.broadcast %cst_281 : f32 to vector<32x1xf32>
    %281 = arith.mulf %279, %280 : vector<32x1xf32>
    %282 = arith.mulf %277, %277 : vector<32x128xf32>
    %cst_282 = arith.constant dense<0.000000e+00> : vector<32xf32>
    %283 = vector.multi_reduction <add>, %282, %cst_282 [1] : vector<32x128xf32> to vector<32xf32>
    %284 = vector.shape_cast %283 : vector<32xf32> to vector<32x1xf32>
    %cst_283 = arith.constant 1.562500e-02 : f32
    %285 = vector.broadcast %cst_283 : f32 to vector<32x1xf32>
    %286 = arith.mulf %284, %285 : vector<32x1xf32>
    %287 = arith.mulf %281, %281 : vector<32x1xf32>
    %288 = arith.subf %286, %287 : vector<32x1xf32>
    %cst_284 = arith.constant 0.000000e+00 : f32
    %289 = vector.broadcast %cst_284 : f32 to vector<32x1xf32>
    %290 = arith.maximumf %288, %289 : vector<32x1xf32>
    %291 = vector.broadcast %281 : vector<32x1xf32> to vector<32x128xf32>
    %292 = arith.subf %277, %291 : vector<32x128xf32>
    %cst_285 = arith.constant 9.99999997E-7 : f32
    %293 = vector.broadcast %cst_285 : f32 to vector<32x1xf32>
    %294 = arith.addf %290, %293 : vector<32x1xf32>
    %295 = math.rsqrt %294 : vector<32x1xf32>
    %296 = vector.broadcast %295 : vector<32x1xf32> to vector<32x128xf32>
    %297 = arith.mulf %292, %296 : vector<32x128xf32>
    %c0_286 = arith.constant 0 : index
    %c0_287 = arith.constant 0 : index
    %298 = vector.load %arg11[%c0_286, %c0_287] : memref<1x128xf32, #tpu.memory_space<vmem>>, vector<1x128xf32>
    %299 = vector.broadcast %298 : vector<1x128xf32> to vector<32x128xf32>
    %300 = arith.mulf %297, %299 : vector<32x128xf32>
    %c0_288 = arith.constant 0 : index
    %c0_289 = arith.constant 0 : index
    %301 = vector.load %arg12[%c0_288, %c0_289] : memref<1x128xf32, #tpu.memory_space<vmem>>, vector<1x128xf32>
    %302 = vector.broadcast %301 : vector<1x128xf32> to vector<32x128xf32>
    %303 = arith.addf %300, %302 : vector<32x128xf32>
    %304 = arith.addf %4, %303 : vector<32x128xf32>
    %305 = vector.shape_cast %304 : vector<32x128xf32> to vector<2x16x128xf32>
    %c0_290 = arith.constant 0 : index
    %c0_291 = arith.constant 0 : index
    %c0_292 = arith.constant 0 : index
    %306 = vector.load %arg13[%c0_290, %c0_291, %c0_292] : memref<2x16x128xf32, #tpu.memory_space<vmem>>, vector<2x16x128xf32>
    tpu.vector_store %arg13[%c0_290, %c0_291, %c0_292], %305 {strides = array<i32>} : memref<2x16x128xf32, #tpu.memory_space<vmem>>, vector<2x16x128xf32>,
    return
  }
  func.func @transform_0(%arg0: i32, %arg1: i32) -> (i32, i32, i32) {
    %c0_i32 = arith.constant 0 : i32
    %c0_i32_0 = arith.constant 0 : i32
    return %arg0, %arg1, %c0_i32 : i32, i32, i32
  }
  func.func @transform_1(%arg0: i32, %arg1: i32) -> (i32, i32) {
    %c0_i32 = arith.constant 0 : i32
    %c0_i32_0 = arith.constant 0 : i32
    %c0_i32_1 = arith.constant 0 : i32
    return %c0_i32, %c0_i32_0 : i32, i32
  }
  func.func @transform_2(%arg0: i32, %arg1: i32) -> (i32, i32) {
    %c0_i32 = arith.constant 0 : i32
    %c0_i32_0 = arith.constant 0 : i32
    %c0_i32_1 = arith.constant 0 : i32
    return %c0_i32, %c0_i32_0 : i32, i32
  }
  func.func @transform_3(%arg0: i32, %arg1: i32) -> (i32, i32) {
    %c0_i32 = arith.constant 0 : i32
    %c0_i32_0 = arith.constant 0 : i32
    %c0_i32_1 = arith.constant 0 : i32
    return %c0_i32, %c0_i32_0 : i32, i32
  }
  func.func @transform_4(%arg0: i32, %arg1: i32) -> (i32, i32) {
    %c0_i32 = arith.constant 0 : i32
    %c0_i32_0 = arith.constant 0 : i32
    %c0_i32_1 = arith.constant 0 : i32
    return %c0_i32, %c0_i32_0 : i32, i32
  }
  func.func @transform_5(%arg0: i32, %arg1: i32) -> (i32, i32) {
    %c0_i32 = arith.constant 0 : i32
    %c0_i32_0 = arith.constant 0 : i32
    %c0_i32_1 = arith.constant 0 : i32
    return %c0_i32, %c0_i32_0 : i32, i32
  }
  func.func @transform_6(%arg0: i32, %arg1: i32) -> (i32, i32) {
    %c0_i32 = arith.constant 0 : i32
    %c0_i32_0 = arith.constant 0 : i32
    %c0_i32_1 = arith.constant 0 : i32
    return %c0_i32, %c0_i32_0 : i32, i32
  }
  func.func @transform_7(%arg0: i32, %arg1: i32) -> (i32, i32) {
    %c0_i32 = arith.constant 0 : i32
    %c0_i32_0 = arith.constant 0 : i32
    %c0_i32_1 = arith.constant 0 : i32
    return %c0_i32, %c0_i32_0 : i32, i32
  }
  func.func @transform_8(%arg0: i32, %arg1: i32) -> (i32, i32) {
    %c0_i32 = arith.constant 0 : i32
    %c0_i32_0 = arith.constant 0 : i32
    %c0_i32_1 = arith.constant 0 : i32
    return %c0_i32, %c0_i32_0 : i32, i32
  }
  func.func @transform_9(%arg0: i32, %arg1: i32) -> (i32, i32) {
    %c0_i32 = arith.constant 0 : i32
    %c0_i32_0 = arith.constant 0 : i32
    %c0_i32_1 = arith.constant 0 : i32
    return %c0_i32, %c0_i32_0 : i32, i32
  }
  func.func @transform_10(%arg0: i32, %arg1: i32) -> (i32, i32) {
    %c0_i32 = arith.constant 0 : i32
    %c0_i32_0 = arith.constant 0 : i32
    %c0_i32_1 = arith.constant 0 : i32
    return %c0_i32, %c0_i32_0 : i32, i32
  }
  func.func @transform_11(%arg0: i32, %arg1: i32) -> (i32, i32, i32) {
    %c0_i32 = arith.constant 0 : i32
    %c0_i32_0 = arith.constant 0 : i32
    return %arg0, %arg1, %c0_i32 : i32, i32, i32
  }
}

</mosaic_0001>

<bundles_post_ra>
// kernel: tpu_custom_call.1
= control target key start
LH: loop header
LB: loop body
LE: loop exit
PB: predicated region body
PF: predicated region fallthrough
CT: control target
= control target key end

     0   :  { %16 = vsyncpa [#allocation14], 0  ;;  %s5086_s0 = inlined_call_operand.hbm [shape: f32[2,16,128], index: 0, kind: input, shape index: {}]   ;;  %s5087_s1 = inlined_call_operand.hbm [shape: bf16[128,256], index: 1, kind: input, shape index: {}]   ;;  %s5088_s2 = inlined_call_operand.hbm [shape: f32[4,128], index: 2, kind: input, shape index: {}]   ;;  %s5089_s3 = inlined_call_operand.vmem [shape: f32[1,128], index: 3, kind: input, shape index: {}]   ;;  %s5090_s4 = inlined_call_operand.hbm [shape: bf16[128,256], index: 4, kind: input, shape index: {}]   ;;  %s5091_s5 = inlined_call_operand.vmem [shape: f32[1,128], index: 5, kind: input, shape index: {}]   ;;  %s5092_s6 = inlined_call_operand.hbm [shape: f32[16,128], index: 6, kind: input, shape index: {}]   ;;  %s5093_s7 = inlined_call_operand.vmem [shape: f32[1,128], index: 7, kind: input, shape index: {}]   ;;  %s5094_s8 = inlined_call_operand.hbm [shape: bf16[128,128], index: 8, kind: input, shape index: {}]   ;;  %s5095_s9 = inlined_call_operand.vmem [shape: f32[1,128], index: 9, kind: input, shape index: {}]   ;;  %s5096_s10 = inlined_call_operand.vmem [shape: f32[1,128], index: 10, kind: input, shape index: {}]   ;;  %s5097_s11 = inlined_call_operand.hbm [shape: f32[2,16,128], index: 11, kind: output, shape index: {}]  }
   0x1   :  { %17 = vsyncpa [#allocation17], 0 }
   0x2   :  { %18 = vsyncpa [#allocation20], 0 }
   0x3   :  { %19 = vsyncpa [#allocation23], 0 }
   0x4   :  { %20 = vsyncpa [#allocation15], 0  ;;  %s38_s19 = sshll.u32 %s5087_s1, 4  ;;  %s3873_s20 = smov [#allocation16]   ;;  %s39_s19 = int_to_ptr.hbm [resolvable:$true] %s38_s19 }
   0x5   :  { %s40_s21 = sshll.u32 %s3873_s20, 4  ;;  %s64_s24 = sshll.u32 %s5090_s4, 4  ;;  %s41_s21 = int_to_ptr.vmem [resolvable:$true] %s40_s21  ;;  %s65_s24 = int_to_ptr.hbm [resolvable:$true] %s64_s24 }
   0x6   :  { %s3874_s25 = smov 128   ;;  %s3875_s26 = smov 8  }
   0x7   :  { %46 = dma.hbm_to_vmem [thread:$0]  %s39_s19, 2048, %s41_s21, [#allocation17], %s3874_s25, %s3874_s25, %s3875_s26  }
   0x8   :  { %s3876_s27 = smov [#allocation19]   ;;  %s25_s1 = sshll.u32 %s5086_s0, 4  ;;  %s26_s1 = int_to_ptr.hbm [resolvable:$true] %s25_s1 }
   0x9   :  { %s66_s28 = sshll.u32 %s3876_s27, 4  ;;  %s52_s13 = sshll.u32 %s5088_s2, 4  ;;  %s67_s28 = int_to_ptr.vmem [resolvable:$true] %s66_s28  ;;  %s53_s13 = int_to_ptr.hbm [resolvable:$true] %s52_s13 }
   0xa   :  { %72 = dma.hbm_to_vmem [thread:$0]  %s65_s24, 2048, %s67_s28, [#allocation20], %s3874_s25, %s3874_s25, %s3875_s26  }
   0xb   :  { %s3877_s14 = smov [#allocation13]   ;;  %s3878_s16 = smov [#allocation18]  }
   0xc   :  { %s27_s15 = sshll.u32 %s3877_s14, 4  ;;  %s54_s0 = sshll.u32 %s3878_s16, 4  ;;  %s28_s15 = int_to_ptr.vmem [resolvable:$true] %s27_s15  ;;  %s55_s0 = int_to_ptr.vmem [resolvable:$true] %s54_s0 }
   0xd   :  { %33 = dma.hbm_to_vmem [thread:$0]  %s26_s1, 512, %s28_s15, [#allocation14], %s3874_s25, %s3874_s25, %s3875_s26  }
   0xe   :  { %s79_s19 = sshll.u32 %s5092_s6, 4  ;;  %s94_s2 = sshll.u32 %s5094_s8, 4  ;;  %s80_s19 = int_to_ptr.hbm [resolvable:$true] %s79_s19  ;;  %s95_s2 = int_to_ptr.hbm [resolvable:$true] %s94_s2 }
   0xf   :  { %57 = dma.hbm_to_vmem [thread:$0]  %s53_s13, 64, %s55_s0, [#allocation17]  }
  0x10   :  { %s3879_s22 = smov [#allocation21]   ;;  %s3880_s24 = smov [#allocation22]  }
  0x11   :  { %s81_s23 = sshll.u32 %s3879_s22, 4  ;;  %s96_s27 = sshll.u32 %s3880_s24, 4  ;;  %s82_s23 = int_to_ptr.vmem [resolvable:$true] %s81_s23  ;;  %s97_s27 = int_to_ptr.vmem [resolvable:$true] %s96_s27 }
  0x12   :  { %87 = dma.hbm_to_vmem [thread:$0]  %s80_s19, 256, %s82_s23, [#allocation20], %s3874_s25, %s3874_s25, %s3875_s26  }
  0x13   :  { %s3881_s28 = smov 64   ;;  %s3882_s6 = smov 4  }
  0x14   :  { %102 = dma.hbm_to_vmem [thread:$0]  %s95_s2, 1024, %s97_s27, [#allocation23], %s3881_s28, %s3881_s28, %s3882_s6  }
  0x15   :  { %3863 = dma.done.wait [#allocation14], 512  }
  0x16   :  { %3864 = vsyncadd [#allocation14], 4294966784 }
  0x17   :  { %3865 = dma.done.wait [#allocation17], 2112  }
  0x18   :  { %3866 = vsyncadd [#allocation17], 4294965184 }
  0x19   :  { %3867 = dma.done.wait [#allocation20], 2304  }
  0x1a   :  { %3868 = vsyncadd [#allocation20], 4294964992 }
  0x1b   :  { %3869 = dma.done.wait [#allocation23], 1024  }
  0x1c   :  { %3870 = vsyncadd [#allocation23], 4294966272  ;;  %v3254_v0 = vld [vmem:[#allocation16 + $0x70] sm:$0xf]  ;;  %v3371_v1 = vld [vmem:[#allocation16 + $0x74] sm:$0xf0] }
  0x1d   :  { %v3246_v2 = vld [vmem:[#allocation16 + $0x60] sm:$0xf]  ;;  %v3255_v3 = vor.u32 %v3371_v1, %v3254_v0  ;;  %v3369_v4 = vld [vmem:[#allocation16 + $0x64] sm:$0xf0]  ;;  %v3238_v6 = vld [vmem:[#allocation16 + $0x50] sm:$0xf] }
  0x1e   :  { %v3247_v5 = vor.u32 %v3369_v4, %v3246_v2  ;;  %v3367_v7 = vld [vmem:[#allocation16 + $0x54] sm:$0xf0]  ;;  %v3230_v9 = vld [vmem:[#allocation16 + $0x40] sm:$0xf]  ;;  %v3365_v10 = vld [vmem:[#allocation16 + $0x44] sm:$0xf0] }
  0x1f   :  { %243 = vmatpush.bf16.msra.mxu0 %v3255_v3  ;;  %v3239_v8 = vor.u32 %v3367_v7, %v3238_v6  ;;  %v3231_v11 = vor.u32 %v3365_v10, %v3230_v9  ;;  %v3222_v12 = vld [vmem:[#allocation16 + $0x30] sm:$0xf]  ;;  %v3363_v13 = vld [vmem:[#allocation16 + $0x34] sm:$0xf0]  ;;  %v3214_v15 = vld [vmem:[#allocation16 + $0x20] sm:$0xf] }
  0x20   :  { %v3223_v14 = vor.u32 %v3363_v13, %v3222_v12  ;;  %v3361_v16 = vld [vmem:[#allocation16 + $0x24] sm:$0xf0]  ;;  %v3206_v18 = vld [vmem:[#allocation16 + $0x10] sm:$0xf]  ;;  %v3359_v19 = vld [vmem:[#allocation16 + $0x14] sm:$0xf0] }
  0x21   :  { %v3215_v17 = vor.u32 %v3361_v16, %v3214_v15  ;;  %v3207_v20 = vor.u32 %v3359_v19, %v3206_v18  ;;  %v3198_v21 = vld [vmem:[#allocation16] sm:$0xf]  ;;  %v3357_v22 = vld [vmem:[#allocation16 + $0x4] sm:$0xf0]  ;;  %v143_v27 = vld [vmem:[#allocation13 + $0x10] sm:$0xff]  ;;  %v3883_v30 = vmov 0.0  }
  0x22   :  { %v3199_v23 = vor.u32 %v3357_v22, %v3198_v21  ;;  %v141_v24 = vld [vmem:[#allocation13] sm:$0xff]  ;;  %v142_v25 = vld [vmem:[#allocation13 + $0x8] sm:$0xff]  ;;  %v144_v28 = vld [vmem:[#allocation13 + $0x18] sm:$0xff]  ;;  %139 = vst [vmem:[#allocation3] sm:$0x7] %v3883_v30  ;;  %s3180_s0 = sshll.u32 %s5097_s11, 4  ;;  %s3181_s0 = int_to_ptr.hbm [resolvable:$true] %s3180_s0 }
  0x23   :  { %244 = vmatpush.bf16.msra.mxu0 %v3247_v5  ;;  %v3976_v26 = vpack.c.bf16 %v142_v25, %v141_v24  ;;  %v3979_v29 = vpack.c.bf16 %v144_v28, %v143_v27  ;;  %140 = vst [vmem:[#allocation3 + $0x4] sm:$0x7] %v3883_v30  ;;  %v3318_v33 = vld [vmem:[#allocation19 + $0x70] sm:$0xf]  ;;  %v3387_v34 = vld [vmem:[#allocation19 + $0x74] sm:$0xf0] }
  0x24   :  { %v3386_v35 = vld [vmem:[#allocation19 + $0x74] sm:$0xf]  ;;  %v3319_v36 = vor.u32 %v3387_v34, %v3318_v33  ;;  %v3320_v37 = vld [vmem:[#allocation19 + $0x78] sm:$0xf0]  ;;  %v3310_v39 = vld [vmem:[#allocation19 + $0x60] sm:$0xf] }
  0x25   :  { %v3323_v38 = vor.u32 %v3386_v35, %v3320_v37  ;;  %v3385_v40 = vld [vmem:[#allocation19 + $0x64] sm:$0xf0]  ;;  %v3384_v41 = vld [vmem:[#allocation19 + $0x64] sm:$0xf]  ;;  %v3312_v44 = vld [vmem:[#allocation19 + $0x68] sm:$0xf0] }
  0x26   :  { %528 = vmatpush.bf16.msra.mxu2 %v3319_v36  ;;  %v3311_v43 = vor.u32 %v3385_v40, %v3310_v39  ;;  %v3315_v45 = vor.u32 %v3384_v41, %v3312_v44  ;;  %v3302_v46 = vld [vmem:[#allocation19 + $0x50] sm:$0xf]  ;;  %v3383_v47 = vld [vmem:[#allocation19 + $0x54] sm:$0xf0]  ;;  %v3382_v49 = vld [vmem:[#allocation19 + $0x54] sm:$0xf] }
  0x27   :  { %245 = vmatpush.bf16.msra.mxu0 %v3239_v8  ;;  %547 = vmatpush.bf16.msra.mxu3 %v3323_v38  ;;  %v3303_v48 = vor.u32 %v3383_v47, %v3302_v46  ;;  %v3304_v50 = vld [vmem:[#allocation19 + $0x58] sm:$0xf0]  ;;  %v3294_v52 = vld [vmem:[#allocation19 + $0x40] sm:$0xf]  ;;  %v3381_v53 = vld [vmem:[#allocation19 + $0x44] sm:$0xf0] }
  0x28   :  { %v3307_v51 = vor.u32 %v3382_v49, %v3304_v50  ;;  %v3380_v54 = vld [vmem:[#allocation19 + $0x44] sm:$0xf]  ;;  %v3296_v55 = vld [vmem:[#allocation19 + $0x48] sm:$0xf0]  ;;  %v293_v56 = vld [vmem:[#allocation18] sm:$0xf]  ;;  %v3295_v57 = vor.u32 %v3381_v53, %v3294_v52 }
  0x29   :  { %v281_v31 = vld [vmem:[#allocation3] sm:$0x7]  ;;  %v3982_v58 = vperm.slane %v293_v56, 0  ;;  %v3984_v59 = vperm.slane %v293_v56, 1  ;;  %v3299_v60 = vor.u32 %v3380_v54, %v3296_v55  ;;  %v3286_v61 = vld [vmem:[#allocation19 + $0x30] sm:$0xf] }
  0x2a   :  { %283 = vst [vmem:[#allocation2 + $0x5] sm:$0x7] %v281_v31  ;;  %v282_v32 = vld [vmem:[#allocation3 + $0x4] sm:$0x7]  ;;  %529 = vmatpush.bf16.msra.mxu2 %v3311_v43  ;;  %v3378_v0 = vld [vmem:[#allocation19 + $0x34] sm:$0xf] }
  0x2b   :  { %246 = vmatpush.bf16.msra.mxu0 %v3231_v11  ;;  %284 = vst [vmem:[#allocation2 + $0x1d] sm:$0x7] %v282_v32  ;;  %548 = vmatpush.bf16.msra.mxu3 %v3315_v45  ;;  %v3379_v62 = vld [vmem:[#allocation19 + $0x34] sm:$0xf0]  ;;  %v3288_v1 = vld [vmem:[#allocation19 + $0x38] sm:$0xf0] }
  0x2c   :  { %v3986_v2 = vperm.slane %v293_v56, 2  ;;  %v3287_v5 = vor.u32 %v3379_v62, %v3286_v61  ;;  %v3990_v9 = vperm.slane %v293_v56, 3  ;;  %v3291_v10 = vor.u32 %v3378_v0, %v3288_v1  ;;  %v3278_v11 = vld [vmem:[#allocation19 + $0x20] sm:$0xf]  ;;  %v3377_v12 = vld [vmem:[#allocation19 + $0x24] sm:$0xf0] }
  0x2d   :  { %v3376_v13 = vld [vmem:[#allocation19 + $0x24] sm:$0xf]  ;;  %v3270_v18 = vld [vmem:[#allocation19 + $0x10] sm:$0xf]  ;;  %v3374_v24 = vld [vmem:[#allocation19 + $0x14] sm:$0xf] }
  0x2e   :  { %530 = vmatpush.bf16.msra.mxu2 %v3303_v48  ;;  %v3997_v21 = vld [vmem:[%s5089_s3] ss:$0 sm:$0xff]  ;;  %v3272_v25 = vld [vmem:[#allocation19 + $0x18] sm:$0xf0]  ;;  %v3262_v39 = vld [vmem:[#allocation19] sm:$0xf] }
  0x2f   :  { %247 = vmatpush.bf16.msra.mxu0 %v3223_v14  ;;  %549 = vmatpush.bf16.msra.mxu3 %v3307_v51  ;;  %v3280_v14 = vld [vmem:[#allocation19 + $0x28] sm:$0xf0]  ;;  %v3275_v38 = vor.u32 %v3374_v24, %v3272_v25  ;;  %v3373_v40 = vld [vmem:[#allocation19 + $0x4] sm:$0xf0]  ;;  %v3372_v43 = vld [vmem:[#allocation19 + $0x4] sm:$0xf] }
  0x30   :  { %v3283_v22 = vor.u32 %v3376_v13, %v3280_v14  ;;  %v3264_v44 = vld [vmem:[#allocation19 + $0x8] sm:$0xf0]  ;;  %v3263_v48 = vor.u32 %v3373_v40, %v3262_v39  ;;  %s3884_s3 = smov 112  }
  0x31   :  { %v3267_v50 = vor.u32 %v3372_v43, %v3264_v44 }
  0x32   :  { %531 = vmatpush.bf16.msra.mxu2 %v3295_v57 }
  0x33   :  { %248 = vmatpush.bf16.msra.mxu0 %v3215_v17  ;;  %550 = vmatpush.bf16.msra.mxu3 %v3299_v60  ;;  %v3279_v17 = vor.u32 %v3377_v12, %v3278_v11 }
  0x36   :  { %532 = vmatpush.bf16.msra.mxu2 %v3287_v5 }
  0x37   :  { %249 = vmatpush.bf16.msra.mxu0 %v3207_v20  ;;  %551 = vmatpush.bf16.msra.mxu3 %v3291_v10 }
  0x3a   :  { %533 = vmatpush.bf16.msra.mxu2 %v3279_v17 }
  0x3b   :  { %250 = vmatpush.bf16.msra.mxu0 %v3199_v23  ;;  %v3375_v23 = vld [vmem:[#allocation19 + $0x14] sm:$0xf0]  ;;  %552 = vmatpush.bf16.msra.mxu3 %v3283_v22 }
  0x3c   :  { %v3271_v36 = vor.u32 %v3375_v23, %v3270_v18 }
  0x3e   :  { %251 = vmatmul.bf16.vlgmr.msra.gmra.mxu0 %v3976_v26  ;;  %534 = vmatpush.bf16.msra.mxu2 %v3271_v36 }
  0x3f   :  { %553 = vmatpush.bf16.msra.mxu3 %v3275_v38 }
  0x42   :  { %535 = vmatpush.bf16.msra.mxu2 %v3263_v48 }
  0x43   :  { %554 = vmatpush.bf16.msra.mxu3 %v3267_v50 }
  0x4e   :  { %256 = vmatmul.bf16.gmra.mxu0 %v3979_v29 }
  0xbb   :  { %v252_v42 = vpop.f32.mrf.mxu0 }
  0xbc   :  { %285 = vst [vmem:[#allocation2 + $0x8] sm:$0xff] %v252_v42  ;;  %v334_v20 = vmul.f32 %v3990_v9, %v252_v42 }
  0xc3   :  { %v254_v63 = vpop.f32.mrf.mxu0  ;;  %v294_v3 = vld [vmem:[#allocation2 + $0x5] sm:$0xff] }
  0xc4   :  { %286 = vst [vmem:[#allocation2 + $0x10] sm:$0xff] %v254_v63  ;;  %v303_v4 = vld [vmem:[#allocation2 + $0x6] sm:$0xff]  ;;  %v299_v6 = vmul.f32 %v3982_v58, %v294_v3  ;;  %v335_v47 = vmul.f32 %v3990_v9, %v254_v63 }
  0xc5   :  { %v308_v7 = vmul.f32 %v3984_v59, %v303_v4  ;;  %v316_v8 = vld [vmem:[#allocation2 + $0x7] sm:$0xff] }
  0xc6   :  { %v321_v16 = vmul.f32 %v3986_v2, %v316_v8 }
  0xc7   :  { %v312_v15 = vadd.f32 %v308_v7, %v299_v6 }
  0xc9   :  { %v325_v19 = vadd.f32 %v321_v16, %v312_v15 }
  0xcb   :  { %v289_v27 = vld [vmem:[#allocation2 + $0x15] sm:$0x7]  ;;  %v257_v28 = vpop.f32.mrf.mxu0  ;;  %v295_v30 = vld [vmem:[#allocation2 + $0xd] sm:$0xff]  ;;  %v338_v32 = vadd.f32 %v334_v20, %v325_v19 }
  0xcc   :  { %v304_v31 = vld [vmem:[#allocation2 + $0xe] sm:$0xff]  ;;  %291 = vst [vmem:[#allocation3] sm:$0x7] %v289_v27  ;;  %v300_v33 = vmul.f32 %v3982_v58, %v295_v30  ;;  %v336_v0 = vmul.f32 %v3990_v9, %v257_v28 }
  0xcd   :  { %v309_v34 = vmul.f32 %v3984_v59, %v304_v31  ;;  %v317_v35 = vld [vmem:[#allocation2 + $0xf] sm:$0xff]  ;;  %287 = vst [vmem:[#allocation2 + $0x20] sm:$0xff] %v257_v28  ;;  %v4002_v37 = vadd.f32 %v3997_v21, %v338_v32 }
  0xce   :  { %v322_v42 = vmul.f32 %v3986_v2, %v317_v35 }
  0xcf   :  { %v313_v41 = vadd.f32 %v309_v34, %v300_v33  ;;  %v350_v45 = vsub.f32 0.0, %v4002_v37 }
  0xd1   :  { %v326_v46 = vadd.f32 %v322_v42, %v313_v41  ;;  %v354_v49 = vmul.f32 1.442695, %v350_v45 }
  0xd3   :  { %v339_v51 = vadd.f32 %v335_v47, %v326_v46  ;;  %v259_v52 = vpop.f32.mrf.mxu0  ;;  %3504 = vpow2.f32 %v354_v49 }
  0xd4   :  { %288 = vst [vmem:[#allocation2 + $0x28] sm:$0xff] %v259_v52  ;;  %v296_v54 = vld [vmem:[#allocation2 + $0x1d] sm:$0xff]  ;;  %v337_v19 = vmul.f32 %v3990_v9, %v259_v52 }
  0xd5   :  { %v4008_v53 = vadd.f32 %v3997_v21, %v339_v51  ;;  %v305_v55 = vld [vmem:[#allocation2 + $0x1e] sm:$0xff]  ;;  %v301_v57 = vmul.f32 %v3982_v58, %v296_v54 }
  0xd6   :  { %v318_v56 = vld [vmem:[#allocation2 + $0x1f] sm:$0xff]  ;;  %v310_v60 = vmul.f32 %v3984_v59, %v305_v55 }
  0xd7   :  { %v323_v61 = vmul.f32 %v3986_v2, %v318_v56  ;;  %v351_v62 = vsub.f32 0.0, %v4008_v53 }
  0xd8   :  { %v314_v63 = vadd.f32 %v310_v60, %v301_v57 }
  0xd9   :  { %v356_v1 = vmul.f32 1.442695, %v351_v62  ;;  %v3505_v3 = vpop.eup %3504 }
  0xda   :  { %v327_v4 = vadd.f32 %v323_v61, %v314_v63  ;;  %v362_v5 = vadd.f32 1.0, %v3505_v3 }
  0xdb   :  { %3506 = vpow2.f32 %v356_v1  ;;  %v290_v6 = vld [vmem:[#allocation2 + $0x2d] sm:$0x7]  ;;  %v297_v7 = vld [vmem:[#allocation2 + $0x25] sm:$0xff] }
  0xdc   :  { %v306_v8 = vld [vmem:[#allocation2 + $0x26] sm:$0xff]  ;;  %v340_v10 = vadd.f32 %v336_v0, %v327_v4  ;;  %292 = vst [vmem:[#allocation3 + $0x4] sm:$0x7] %v290_v6  ;;  %3508 = vrcp.f32 %v362_v5  ;;  %v302_v12 = vmul.f32 %v3982_v58, %v297_v7  ;;  %v377_v34 = vand.u32 2147483648, %v362_v5 }
  0xdd   :  { %v319_v11 = vld [vmem:[#allocation2 + $0x27] sm:$0xff]  ;;  %v311_v13 = vmul.f32 %v3984_v59, %v306_v8  ;;  %vm371_vm1 = vweird.f32 %v362_v5  ;;  %v375_v36 = vand.u32 2147483647, %v362_v5 }
  0xde   :  { %v324_v14 = vmul.f32 %v3986_v2, %v319_v11  ;;  %v4019_v15 = vadd.f32 %v3997_v21, %v340_v10  ;;  %v378_v42 = vor.u32 1.1754944e-38, %v377_v34 }
  0xdf   :  { %v315_v16 = vadd.f32 %v311_v13, %v302_v12  ;;  %vm376_vm4 = vcmp.eq.f32.partialorder %v375_v36, 8.507059e+37 }
  0xe0   :  { %v352_v17 = vsub.f32 0.0, %v4019_v15 }
  0xe1   :  { %v3507_v18 = vpop.eup %3506  ;;  %v328_v22 = vadd.f32 %v324_v14, %v315_v16  ;;  %v1018_v16 = vlaneseq }
  0xe2   :  { %v363_v20 = vadd.f32 1.0, %v3507_v18  ;;  %v358_v23 = vmul.f32 1.442695, %v352_v17  ;;  %v3509_v24 = vpop.eup %3508 }
  0xe3   :  { %v367_v25 = vmul.f32 %v3509_v24, %v362_v5  ;;  %v341_v58 = vadd.f32 %v337_v19, %v328_v22  ;;  %vm372_vm0 = vweird.f32 %v3509_v24  ;;  %v4043_v17 = vshrl.u32 %v1018_v16, 7 }
  0xe4   :  { %3510 = vrcp.f32 %v363_v20  ;;  %vm373_vm2 = vmor %vm371_vm1, %vm372_vm0  ;;  %v392_v39 = vand.u32 2147483648, %v363_v20  ;;  %v390_v41 = vand.u32 2147483647, %v363_v20  ;;  %vm386_vm5 = vweird.f32 %v363_v20 }
  0xe5   :  { %3512 = vpow2.f32 %v358_v23  ;;  %v368_v59 = vsub.f32 1.0, %v367_v25  ;;  %v4024_v2 = vadd.f32 %v3997_v21, %v341_v58  ;;  %3417 = vset.pattern.permute.xlu2 %v4043_v17  ;;  %v4047_v18 = vadd.s32 8, %v4043_v17  ;;  %3419 = vset.pattern.permute.xlu0 %v4043_v17 }
  0xe6   :  { %v393_v45 = vor.u32 1.1754944e-38, %v392_v39  ;;  %vm391_vm7 = vcmp.eq.f32.partialorder %v390_v41, 8.507059e+37  ;;  %vm622_vm0 = vcmask 130048   ;;  %vm2830_vm1 = vcmask 1041409  }
  0xe7   :  { %v369_v27 = vmul.f32 %v3509_v24, %v368_v59  ;;  %v353_v28 = vsub.f32 0.0, %v4024_v2  ;;  %3420 = vset.pattern.permute.xlu1 %v4047_v18 }
  0xe9   :  { %v370_v32 = vadd.f32 %v3509_v24, %v369_v27  ;;  %v360_v33 = vmul.f32 1.442695, %v353_v28 }
  0xea   :  { %v3511_v30 = vpop.eup %3510 }
  0xeb   :  { %v3513_v31 = vpop.eup %3512  ;;  %v382_v9 = vmul.f32 %v3511_v30, %v363_v20  ;;  %3514 = vpow2.f32 %v360_v33  ;;  %v374_v21 = vsel %vm373_vm2, %v3509_v24, %v370_v32  ;;  %vm387_vm3 = vweird.f32 %v3511_v30 }
  0xec   :  { %v364_v35 = vadd.f32 1.0, %v3513_v31  ;;  %v379_v44 = vsel %vm376_vm4, %v378_v42, %v374_v21  ;;  %vm388_vm6 = vmor %vm386_vm5, %vm387_vm3  ;;  %vm2832_vm2 = vcmask 1042434   ;;  %vm2834_vm3 = vcmask 1043459  }
  0xed   :  { %v383_v38 = vsub.f32 1.0, %v382_v9  ;;  %v4028_v51 = vmul.f32 %v379_v44, %v4002_v37  ;;  %vm2836_vm4 = vcmask 1044484   ;;  %vm2838_vm5 = vcmask 1045509  }
  0xee   :  { %3516 = vrcp.f32 %v364_v35  ;;  %vm401_vm8 = vweird.f32 %v364_v35  ;;  %v405_v60 = vand.u32 2147483647, %v364_v35  ;;  %v407_v61 = vand.u32 2147483648, %v364_v35 }
  0xef   :  { %v384_v40 = vmul.f32 %v3511_v30, %v383_v38  ;;  %5155 = vst [vmem:[#allocation30_spill] sm:$0xff] %v4028_v51 }
  0xf0   :  { %vm406_vm11 = vcmp.eq.f32.partialorder %v405_v60, 8.507059e+37 }
  0xf1   :  { %v385_v43 = vadd.f32 %v3511_v30, %v384_v40  ;;  %v3515_v46 = vpop.eup %3514 }
  0xf2   :  { %v365_v50 = vadd.f32 1.0, %v3515_v46 }
  0xf3   :  { %v389_v47 = vsel %vm388_vm6, %v3511_v30, %v385_v43  ;;  %v4069_v30 = vld [vmem:[%s5091_s5] ss:$0 sm:$0xff]  ;;  %vm2840_vm6 = vcmask 1046534  }
  0xf4   :  { %v3517_v48 = vpop.eup %3516  ;;  %v394_v49 = vsel %vm391_vm7, %v393_v45, %v389_v47  ;;  %3518 = vrcp.f32 %v365_v50  ;;  %vm416_vm12 = vweird.f32 %v365_v50  ;;  %v422_v0 = vand.u32 2147483648, %v365_v50 }
  0xf5   :  { %v4031_v52 = vmul.f32 %v394_v49, %v4008_v53  ;;  %v397_v54 = vmul.f32 %v3517_v48, %v364_v35  ;;  %vm402_vm9 = vweird.f32 %v3517_v48  ;;  %v408_v53 = vor.u32 1.1754944e-38, %v407_v61  ;;  %v4093_v49 = vld [vmem:[#allocation21] sm:$0xff] }
  0xf6   :  { %vm403_vm10 = vmor %vm401_vm8, %vm402_vm9  ;;  %v420_v4 = vand.u32 2147483647, %v365_v50  ;;  %v423_v7 = vor.u32 1.1754944e-38, %v422_v0  ;;  %vm2842_vm7 = vcmask 1047559  }
  0xf7   :  { %5156 = vst [vmem:[#allocation31_spill] sm:$0xff] %v4031_v52  ;;  %v430_v55 = vpack.c.bf16 %v4031_v52, %v4028_v51  ;;  %v398_v56 = vsub.f32 1.0, %v397_v54 }
  0xf8   :  { %vm421_vm15 = vcmp.eq.f32.partialorder %v420_v4, 8.507059e+37 }
  0xf9   :  { %536 = vmatmul.bf16.vlgmr.msra.gmra.mxu2 %v430_v55  ;;  %555 = vmatmul.bf16.vlgmr.msra.gmra.mxu3 %v430_v55  ;;  %v399_v57 = vmul.f32 %v3517_v48, %v398_v56 }
  0xfa   :  { %v3519_v63 = vpop.eup %3518 }
  0xfb   :  { %v400_v62 = vadd.f32 %v3517_v48, %v399_v57  ;;  %v412_v37 = vmul.f32 %v3519_v63, %v365_v50  ;;  %vm417_vm13 = vweird.f32 %v3519_v63 }
  0xfc   :  { %vm418_vm14 = vmor %vm416_vm12, %vm417_vm13 }
  0xfd   :  { %v404_v1 = vsel %vm403_vm10, %v3517_v48, %v400_v62  ;;  %v413_v3 = vsub.f32 1.0, %v412_v37 }
  0xfe   :  { %v409_v6 = vsel %vm406_vm11, %v408_v53, %v404_v1 }
  0xff   :  { %v414_v5 = vmul.f32 %v3519_v63, %v413_v3  ;;  %v4036_v11 = vmul.f32 %v409_v6, %v4019_v15  ;;  %v4113_v3 = vld [vmem:[#allocation21 + $0x8] sm:$0xff] }
 0x101   :  { %v415_v8 = vadd.f32 %v3519_v63, %v414_v5  ;;  %5157 = vst [vmem:[#allocation32_spill] sm:$0xff] %v4036_v11 }
 0x103   :  { %v419_v10 = vsel %vm418_vm14, %v3519_v63, %v415_v8 }
 0x104   :  { %v424_v12 = vsel %vm421_vm15, %v423_v7, %v419_v10 }
 0x105   :  { %v4039_v13 = vmul.f32 %v424_v12, %v4024_v2 }
 0x107   :  { %5158 = vst [vmem:[#allocation33_spill] sm:$0xff] %v4039_v13  ;;  %v431_v14 = vpack.c.bf16 %v4039_v13, %v4036_v11 }
 0x109   :  { %541 = vmatmul.bf16.gmra.mxu2 %v431_v14  ;;  %560 = vmatmul.bf16.gmra.mxu3 %v431_v14 }
 0x17c   :  { %v556_v15 = vpop.f32.mrf.mxu3  ;;  %v537_v31 = vpop.f32.mrf.mxu2 }
 0x17d   :  { %623 = vst.msk [vmem:[#allocation6] sm:$0xff] %vm622_vm0, %v556_v15  ;;  %631 = vrot.lane.b32.xlu0 %v556_v15, %s3884_s3  ;;  %v570_v32 = vadd.f32 %v4069_v30, %v537_v31 }
 0x17f   :  { %v578_v33 = vand.u32 2147483647, %v570_v32  ;;  %v574_v46 = vmax.f32 %v570_v32, 0.0 }
 0x181   :  { %v582_v36 = vsub.f32 0.0, %v578_v33 }
 0x183   :  { %v586_v38 = vmul.f32 1.442695, %v582_v36 }
 0x184   :  { %v558_v19 = vpop.f32.mrf.mxu3  ;;  %v649_v20 = vld [vmem:[#allocation6] sm:$0xff]  ;;  %v539_v37 = vpop.f32.mrf.mxu2 }
 0x185   :  { %624 = vst.msk [vmem:[#allocation6 + $0x8] sm:$0xff] %vm622_vm0, %v558_v19  ;;  %633 = vrot.lane.b32.xlu0 %v558_v19, %s3884_s3  ;;  %v1030_v22 = vperm.slane %v649_v20, 1  ;;  %v1017_v23 = vperm.slane %v649_v20, 0  ;;  %v1043_v24 = vperm.slane %v649_v20, 2  ;;  %v1056_v59 = vperm.slane %v649_v20, 3 }
 0x186   :  { %v1069_v2 = vperm.slane %v649_v20, 4  ;;  %v1082_v27 = vperm.slane %v649_v20, 5  ;;  %v1095_v28 = vperm.slane %v649_v20, 6  ;;  %v1108_v35 = vperm.slane %v649_v20, 7 }
 0x187   :  { %1041 = vperm.xlu1 %3420, %v1030_v22   ;;  %1022 = vperm.xlu2 %3417, %v1017_v23   ;;  %3520 = vpow2.f32 %v586_v38  ;;  %v4116_v5 = vadd.f32 %v4069_v30, %v539_v37 }
 0x189   :  { %v579_v15 = vand.u32 2147483647, %v4116_v5 }
 0x18c   :  { %v561_v25 = vpop.f32.mrf.mxu3  ;;  %v4074_v9 = vld [vmem:[#allocation6 + $0x8] sm:$0xff] }
 0x18d   :  { %1035 = vperm.xlu0 %3419, %v1030_v22   ;;  %625 = vst.msk [vmem:[#allocation6 + $0x10] sm:$0xff] %vm622_vm0, %v561_v25  ;;  %v1121_v34 = vperm.slane %v4074_v9, 0  ;;  %v1160_v39 = vperm.slane %v4074_v9, 3  ;;  %v3521_v21 = vpop.eup %3520  ;;  %v1134_v40 = vperm.slane %v4074_v9, 1  ;;  %v1147_v42 = vperm.slane %v4074_v9, 2 }
 0x18e   :  { %v594_v41 = vadd.f32 1.0, %v3521_v21  ;;  %v1186_v44 = vperm.slane %v4074_v9, 5  ;;  %v1173_v61 = vperm.slane %v4074_v9, 4  ;;  %v1212_v37 = vperm.slane %v4074_v9, 7 }
 0x18f   :  { %1054 = vperm.xlu1 %3420, %v1043_v24   ;;  %3418 = vset.pattern.permute.xlu2 %v4047_v18 }
 0x190   :  { %3522 = vlog2.f32 %v594_v41 }
 0x194   :  { %v4058_v58 = vpop.f32.mrf.mxu3  ;;  %v4096_v50 = vld [vmem:[#allocation6 + $0x10] sm:$0xff] }
 0x195   :  { %3422 = vset.pattern.permute.xlu0 %v4047_v18  ;;  %626 = vst.msk [vmem:[#allocation6 + $0x18] sm:$0xff] %vm622_vm0, %v4058_v58  ;;  %v1225_v56 = vperm.slane %v4096_v50, 0 }
 0x196   :  { %v3523_v43 = vpop.eup %3522 }
 0x197   :  { %3423 = vset.pattern.permute.xlu1 %v4043_v17  ;;  %1028 = vperm.xlu2 %3418, %v1017_v23   ;;  %v599_v45 = vmul.f32 0.6931472, %v3523_v43 }
 0x199   :  { %v4089_v47 = vadd.f32 %v599_v45, %v574_v46 }
 0x19b   :  { %v697_v48 = vperm.slane %v4089_v47, 0  ;;  %v669_v55 = vrot.slane %v4089_v47, 1  ;;  %v670_v63 = vrot.slane %v4089_v47, 2  ;;  %v4111_v1 = vmul.f32 %v4089_v47, %v4028_v51 }
 0x19c   :  { %v671_v16 = vrot.slane %v4089_v47, 3  ;;  %v672_v31 = vrot.slane %v4089_v47, 4 }
 0x19d   :  { %1067 = vperm.xlu0 %3422, %v1056_v59   ;;  %v761_v54 = vmul.f32 %v697_v48, %v4093_v49  ;;  %v698_v60 = vperm.slane %v669_v55, 0  ;;  %v699_v4 = vperm.slane %v670_v63, 0  ;;  %v1465_v7 = vperm.slane %v4111_v1, 0 }
 0x19e   :  { %v762_v8 = vmul.f32 %v697_v48, %v4113_v3  ;;  %v701_v45 = vperm.slane %v672_v31, 0  ;;  %v673_v55 = vrot.slane %v4089_v47, 5 }
 0x19f   :  { %1074 = vperm.xlu1 %3423, %v1069_v2   ;;  %3421 = vset.pattern.permute.xlu2 %v4043_v17  ;;  %v825_v57 = vmul.f32 1.442695, %v761_v54  ;;  %v763_v0 = vmul.f32 %v698_v60, %v4093_v49  ;;  %v765_v14 = vmul.f32 %v699_v4, %v4093_v49  ;;  %v764_v32 = vmul.f32 %v698_v60, %v4113_v3 }
 0x1a0   :  { %v827_v23 = vmul.f32 1.442695, %v762_v8  ;;  %v766_v60 = vmul.f32 %v699_v4, %v4113_v3  ;;  %v1439_v8 = vrot.slane %v4111_v1, 3 }
 0x1a1   :  { %3524 = vpow2.f32 %v825_v57  ;;  %v829_v6 = vmul.f32 1.442695, %v763_v0  ;;  %v831_v46 = vmul.f32 1.442695, %v764_v32 }
 0x1a3   :  { %3526 = vpow2.f32 %v829_v6 }
 0x1a4   :  { %3528 = vpow2.f32 %v827_v23 }
 0x1a5   :  { %3425 = vset.pattern.permute.xlu0 %v4043_v17 }
 0x1a7   :  { %1087 = vperm.xlu1 %3423, %v1082_v27   ;;  %1048 = vperm.xlu2 %3421, %v1043_v24   ;;  %v3525_v10 = vpop.eup %3524  ;;  %v1437_v24 = vrot.slane %v4111_v1, 1 }
 0x1a8   :  { %v1665_v22 = vmul.f32 0.0, %v3525_v10  ;;  %v702_v10 = vperm.slane %v673_v55, 0 }
 0x1a9   :  { %v1466_v33 = vperm.slane %v1437_v24, 0  ;;  %v1468_v24 = vperm.slane %v1439_v8, 0  ;;  %v1441_v8 = vrot.slane %v4111_v1, 5 }
 0x1ad   :  { %1100 = vperm.xlu0 %3425, %v1095_v28  }
 0x1af   :  { %3426 = vset.pattern.permute.xlu1 %v4047_v18  ;;  %1061 = vperm.xlu2 %3421, %v1056_v59   ;;  %v833_v59 = vmul.f32 1.442695, %v765_v14 }
 0x1b1   :  { %3530 = vpow2.f32 %v833_v59  ;;  %v1290_v59 = vperm.slane %v4096_v50, 5 }
 0x1b5   :  { %3428 = vset.pattern.permute.xlu0 %v4047_v18 }
 0x1b7   :  { %1106 = vperm.xlu1 %3426, %v1095_v28   ;;  %3424 = vset.pattern.permute.xlu2 %v4047_v18 }
 0x1bd   :  { %1132 = vperm.xlu0 %3428, %v1121_v34  }
 0x1bf   :  { %1119 = vperm.xlu1 %3426, %v1108_v35   ;;  %1080 = vperm.xlu2 %3424, %v1069_v2   ;;  %v700_v2 = vperm.slane %v671_v16, 0 }
 0x1c5   :  { %3431 = vset.pattern.permute.xlu0 %v4043_v17 }
 0x1c7   :  { %3429 = vset.pattern.permute.xlu1 %v4043_v17  ;;  %1093 = vperm.xlu2 %3424, %v1082_v27   ;;  %v583_v27 = vsub.f32 0.0, %v579_v15 }
 0x1c8   :  { %635 = vrot.lane.b32.xlu1 %v561_v25, %s3884_s3  ;;  %v1251_v25 = vperm.slane %v4096_v50, 2 }
 0x1c9   :  { %v588_v21 = vmul.f32 1.442695, %v583_v27  ;;  %v771_v27 = vmul.f32 %v702_v10, %v4093_v49 }
 0x1cb   :  { %3532 = vpow2.f32 %v588_v21 }
 0x1cc   :  { %3534 = vpow2.f32 %v831_v46  ;;  %v770_v46 = vmul.f32 %v701_v45, %v4113_v3 }
 0x1cd   :  { %1165 = vperm.xlu0 %3431, %v1160_v39  }
 0x1cf   :  { %3427 = vset.pattern.permute.xlu2 %v4043_v17 }
 0x1d0   :  { %1139 = vperm.xlu1 %3429, %v1134_v40  }
 0x1d5   :  { %3434 = vset.pattern.permute.xlu0 %v4047_v18 }
 0x1d7   :  { %1113 = vperm.xlu2 %3427, %v1108_v35   ;;  %v3527_v35 = vpop.eup %3526 }
 0x1d8   :  { %1152 = vperm.xlu1 %3429, %v1147_v42   ;;  %v3529_v57 = vpop.eup %3528 }
 0x1d9   :  { %v1666_v4 = vmul.f32 0.0, %v3529_v57 }
 0x1dd   :  { %1197 = vperm.xlu0 %3434, %v1186_v44  }
 0x1df   :  { %1126 = vperm.xlu2 %3427, %v1121_v34   ;;  %v1199_v34 = vperm.slane %v4074_v9, 6 }
 0x1e0   :  { %3432 = vset.pattern.permute.xlu1 %v4047_v18 }
 0x1e1   :  { %v1023_v53 = vpop.permute.xlu2 %1022 }
 0x1e2   :  { %v1529_v19 = vmul.f32 %v1465_v7, %v1023_v53  ;;  %v769_v53 = vmul.f32 %v701_v45, %v4093_v49 }
 0x1e4   :  { %v4128_v28 = vadd.f32 %v1665_v22, %v1529_v19  ;;  %v841_v19 = vmul.f32 1.442695, %v769_v53 }
 0x1e5   :  { %3437 = vset.pattern.permute.xlu0 %v4043_v17 }
 0x1e6   :  { %v1686_v41 = vmul.f32 %v3527_v35, %v4128_v28 }
 0x1e7   :  { %3430 = vset.pattern.permute.xlu2 %v4047_v18 }
 0x1e8   :  { %1171 = vperm.xlu1 %3432, %v1160_v39   ;;  %v767_v39 = vmul.f32 %v700_v2, %v4093_v49 }
 0x1ea   :  { %v837_v54 = vmul.f32 1.442695, %v767_v39 }
 0x1ec   :  { %3536 = vpow2.f32 %v837_v54 }
 0x1ed   :  { %1230 = vperm.xlu0 %3437, %v1225_v56  }
 0x1ef   :  { %v632_v62 = vpop.permute.xlu0 %631  ;;  %1145 = vperm.xlu2 %3430, %v1134_v40  }
 0x1f0   :  { %643 = vst.msk [vmem:[#allocation7] sm:$0xff] %vm622_vm0, %v632_v62  ;;  %1184 = vperm.xlu1 %3432, %v1173_v61   ;;  %v3531_v62 = vpop.eup %3530 }
 0x1f1   :  { %v1029_v20 = vpop.permute.xlu2 %1028 }
 0x1f2   :  { %v1530_v0 = vmul.f32 %v1465_v7, %v1029_v20  ;;  %v674_v7 = vrot.slane %v4089_v47, 6  ;;  %v3533_v20 = vpop.eup %3532 }
 0x1f3   :  { %v3535_v31 = vpop.eup %3534  ;;  %v595_v21 = vadd.f32 1.0, %v3533_v20  ;;  %v1470_v20 = vperm.slane %v1441_v8, 0 }
 0x1f4   :  { %v4155_v22 = vadd.f32 %v1666_v4, %v1530_v0  ;;  %v3537_v39 = vpop.eup %3536 }
 0x1f5   :  { %3440 = vset.pattern.permute.xlu0 %v4047_v18 }
 0x1f7   :  { %v634_v12 = vpop.permute.xlu0 %633  ;;  %1158 = vperm.xlu2 %3430, %v1147_v42   ;;  %v1438_v42 = vrot.slane %v4111_v1, 2 }
 0x1f8   :  { %644 = vst.msk [vmem:[#allocation7 + $0x8] sm:$0xff] %vm622_vm0, %v634_v12  ;;  %3435 = vset.pattern.permute.xlu1 %v4043_v17  ;;  %v835_v12 = vmul.f32 1.442695, %v766_v60 }
 0x1f9   :  { %v1042_v36 = vpop.permute.xlu1 %1041  ;;  %v1467_v63 = vperm.slane %v1438_v42, 0 }
 0x1fa   :  { %v1532_v32 = vmul.f32 %v1466_v33, %v1042_v36  ;;  %3538 = vpow2.f32 %v835_v12 }
 0x1fb   :  { %3540 = vpow2.f32 %v841_v19  ;;  %v542_v19 = vpop.f32.mrf.mxu2 }
 0x1fc   :  { %3542 = vlog2.f32 %v595_v21  ;;  %v5103_v21 = vperm.slane %v4096_v50, 7 }
 0x1fd   :  { %1262 = vperm.xlu0 %3440, %v1251_v25  }
 0x1ff   :  { %v1036_v38 = vpop.permute.xlu0 %1035  ;;  %3433 = vset.pattern.permute.xlu2 %v4043_v17 }
 0x200   :  { %v1531_v40 = vmul.f32 %v1466_v33, %v1036_v38  ;;  %1204 = vperm.xlu1 %3435, %v1199_v34   ;;  %v1440_v38 = vrot.slane %v4111_v1, 4  ;;  %v845_v33 = vmul.f32 1.442695, %v771_v27  ;;  %v3539_v60 = vpop.eup %3538 }
 0x201   :  { %v1049_v43 = vpop.permute.xlu2 %1048  ;;  %v1055_v16 = vpop.permute.xlu1 %1054 }
 0x202   :  { %v4141_v48 = vadd.f32 %v1686_v41, %v1531_v40  ;;  %v1533_v14 = vmul.f32 %v1467_v63, %v1049_v43  ;;  %v703_v40 = vperm.slane %v674_v7, 0  ;;  %v1687_v41 = vmul.f32 %v3535_v31, %v4155_v22  ;;  %v3541_v53 = vpop.eup %3540 }
 0x203   :  { %v1469_v54 = vperm.slane %v1440_v38, 0 }
 0x204   :  { %v1709_v6 = vmul.f32 %v3531_v62, %v4141_v48  ;;  %v4169_v36 = vadd.f32 %v1687_v41, %v1532_v32  ;;  %v773_v57 = vmul.f32 %v703_v40, %v4093_v49  ;;  %v1534_v62 = vmul.f32 %v1467_v63, %v1055_v16  ;;  %v3543_v63 = vpop.eup %3542 }
 0x205   :  { %3443 = vset.pattern.permute.xlu0 %v4043_v17  ;;  %v772_v16 = vmul.f32 %v702_v10, %v4113_v3  ;;  %v601_v10 = vmul.f32 0.6931472, %v3543_v63 }
 0x206   :  { %v4157_v23 = vadd.f32 %v1709_v6, %v1533_v14  ;;  %v1710_v0 = vmul.f32 %v3539_v60, %v4169_v36  ;;  %v843_v6 = vmul.f32 1.442695, %v770_v46  ;;  %v774_v46 = vmul.f32 %v703_v40, %v4113_v3 }
 0x207   :  { %1178 = vperm.xlu2 %3433, %v1173_v61   ;;  %v768_v61 = vmul.f32 %v700_v2, %v4113_v3  ;;  %v847_v41 = vmul.f32 1.442695, %v772_v16 }
 0x208   :  { %1217 = vperm.xlu1 %3435, %v1212_v37   ;;  %v1732_v2 = vmul.f32 %v3537_v39, %v4157_v23  ;;  %v4182_v12 = vadd.f32 %v1710_v0, %v1534_v62  ;;  %v1442_v39 = vrot.slane %v4111_v1, 6  ;;  %v1238_v0 = vperm.slane %v4096_v50, 1 }
 0x209   :  { %v1062_v15 = vpop.permute.xlu2 %1061  ;;  %v839_v42 = vmul.f32 1.442695, %v768_v61  ;;  %v851_v8 = vmul.f32 1.442695, %v774_v46  ;;  %v1443_v46 = vrot.slane %v4111_v1, 7 }
 0x20a   :  { %v1535_v35 = vmul.f32 %v1468_v24, %v1062_v15  ;;  %v1471_v60 = vperm.slane %v1442_v39, 0 }
 0x20b   :  { %3544 = vpow2.f32 %v839_v42 }
 0x20c   :  { %v4171_v43 = vadd.f32 %v1732_v2, %v1535_v35  ;;  %3546 = vpow2.f32 %v845_v33  ;;  %v4196_v2 = vadd.f32 %v4069_v30, %v542_v19  ;;  %v575_v33 = vmax.f32 %v4116_v5, 0.0 }
 0x20d   :  { %1295 = vperm.xlu0 %3443, %v1290_v59   ;;  %3548 = vpow2.f32 %v843_v6 }
 0x20e   :  { %v1755_v45 = vmul.f32 %v3541_v53, %v4171_v43  ;;  %v580_v5 = vand.u32 2147483647, %v4196_v2 }
 0x20f   :  { %1191 = vperm.xlu2 %3433, %v1186_v44   ;;  %v1068_v4 = vpop.permute.xlu0 %1067 }
 0x210   :  { %3438 = vset.pattern.permute.xlu1 %v4047_v18  ;;  %v1536_v7 = vmul.f32 %v1468_v24, %v1068_v4  ;;  %v675_v24 = vrot.slane %v4089_v47, 7  ;;  %v4206_v47 = vadd.f32 %v601_v10, %v575_v33  ;;  %v584_v16 = vsub.f32 0.0, %v580_v5 }
 0x211   :  { %637 = vrot.lane.b32.xlu1 %v4058_v58, %s3884_s3  ;;  %v1075_v55 = vpop.permute.xlu1 %1074  ;;  %v849_v58 = vmul.f32 1.442695, %v773_v57  ;;  %v3545_v15 = vpop.eup %3544 }
 0x212   :  { %v1537_v44 = vmul.f32 %v1469_v54, %v1075_v55  ;;  %v3547_v61 = vpop.eup %3546  ;;  %v1733_v32 = vmul.f32 %v3545_v15, %v4182_v12  ;;  %v704_v53 = vperm.slane %v675_v24, 0 }
 0x213   :  { %3550 = vpow2.f32 %v849_v58  ;;  %v3549_v55 = vpop.eup %3548 }
 0x214   :  { %v4184_v14 = vadd.f32 %v1755_v45, %v1537_v44  ;;  %3552 = vpow2.f32 %v847_v41  ;;  %v776_v63 = vmul.f32 %v704_v53, %v4113_v3 }
 0x215   :  { %3446 = vset.pattern.permute.xlu0 %v4047_v18  ;;  %3554 = vpow2.f32 %v851_v8 }
 0x216   :  { %v1778_v38 = vmul.f32 %v3547_v61, %v4184_v14 }
 0x217   :  { %3436 = vset.pattern.permute.xlu2 %v4047_v18 }
 0x219   :  { %1236 = vperm.xlu1 %3438, %v1225_v56   ;;  %v1088_v27 = vpop.permute.xlu1 %1087  ;;  %v1081_v31 = vpop.permute.xlu2 %1080  ;;  %v4198_v56 = vadd.f32 %v1733_v32, %v1536_v7  ;;  %v775_v7 = vmul.f32 %v704_v53, %v4093_v49  ;;  %v590_v32 = vmul.f32 1.442695, %v584_v16  ;;  %v1472_v53 = vperm.slane %v1443_v46, 0 }
 0x21a   :  { %v1539_v35 = vmul.f32 %v1470_v20, %v1088_v27  ;;  %v1538_v57 = vmul.f32 %v1469_v54, %v1081_v31  ;;  %v3551_v62 = vpop.eup %3550  ;;  %v855_v31 = vmul.f32 1.442695, %v776_v63 }
 0x21b   :  { %v1756_v6 = vmul.f32 %v3549_v55, %v4198_v56  ;;  %v3553_v19 = vpop.eup %3552  ;;  %v676_v55 = vrot.slane %v4206_v47, 1 }
 0x21c   :  { %v4200_v42 = vadd.f32 %v1778_v38, %v1539_v35  ;;  %v4230_v38 = vld [vmem:[#allocation6 + $0x18] sm:$0xff]  ;;  %v3555_v24 = vpop.eup %3554  ;;  %3556 = vpow2.f32 %v855_v31 }
 0x21d   :  { %1327 = vperm.xlu0 %3446, %v5103_v21   ;;  %v4216_v4 = vadd.f32 %v1756_v6, %v1538_v57  ;;  %v5102_v41 = vperm.slane %v4230_v38, 2  ;;  %3558 = vpow2.f32 %v590_v32  ;;  %v706_v1 = vperm.slane %v676_v55, 0 }
 0x21e   :  { %v1801_v40 = vmul.f32 %v3551_v62, %v4200_v42  ;;  %v1264_v62 = vperm.slane %v4096_v50, 3 }
 0x21f   :  { %v1101_v44 = vpop.permute.xlu0 %1100  ;;  %1210 = vperm.xlu2 %3436, %v1199_v34   ;;  %v705_v34 = vperm.slane %v4206_v47, 0  ;;  %v1779_v61 = vmul.f32 %v3553_v19, %v4216_v4 }
 0x220   :  { %v1541_v45 = vmul.f32 %v1471_v60, %v1101_v44 }
 0x221   :  { %1249 = vperm.xlu1 %3438, %v1238_v0   ;;  %v1094_v54 = vpop.permute.xlu2 %1093  ;;  %v778_v27 = vmul.f32 %v705_v34, %v4113_v3  ;;  %v777_v9 = vmul.f32 %v705_v34, %v4093_v49 }
 0x222   :  { %v4218_v58 = vadd.f32 %v1801_v40, %v1541_v45  ;;  %v1540_v15 = vmul.f32 %v1470_v20, %v1094_v54  ;;  %v853_v20 = vmul.f32 1.442695, %v775_v7  ;;  %v3557_v5 = vpop.eup %3556 }
 0x223   :  { %v859_v33 = vmul.f32 1.442695, %v778_v27  ;;  %v857_v44 = vmul.f32 1.442695, %v777_v9  ;;  %v3559_v40 = vpop.eup %3558  ;;  %v677_v27 = vrot.slane %v4206_v47, 2 }
 0x224   :  { %v4228_v35 = vadd.f32 %v1779_v61, %v1540_v15  ;;  %3560 = vpow2.f32 %v853_v20  ;;  %v779_v61 = vmul.f32 %v706_v1, %v4093_v49  ;;  %v596_v32 = vadd.f32 1.0, %v3559_v40 }
 0x225   :  { %3449 = vset.pattern.permute.xlu0 %v4043_v17  ;;  %3562 = vpow2.f32 %v859_v33  ;;  %v707_v46 = vperm.slane %v677_v27, 0 }
 0x226   :  { %3564 = vpow2.f32 %v857_v44  ;;  %v861_v33 = vmul.f32 1.442695, %v779_v61 }
 0x227   :  { %1223 = vperm.xlu2 %3436, %v1212_v37   ;;  %v1802_v37 = vmul.f32 %v3555_v24, %v4228_v35  ;;  %v1277_v24 = vperm.slane %v4096_v50, 4  ;;  %3566 = vlog2.f32 %v596_v32 }
 0x228   :  { %3568 = vpow2.f32 %v861_v33  ;;  %v576_v33 = vmax.f32 %v4196_v2, 0.0 }
 0x229   :  { %3441 = vset.pattern.permute.xlu1 %v4043_v17  ;;  %v1107_v39 = vpop.permute.xlu1 %1106 }
 0x22a   :  { %v1542_v10 = vmul.f32 %v1471_v60, %v1107_v39  ;;  %v4244_v60 = vmul.f32 %v4206_v47, %v4031_v52  ;;  %v3561_v63 = vpop.eup %3560 }
 0x22b   :  { %v1824_v19 = vmul.f32 %v3561_v63, %v4218_v58  ;;  %v3563_v31 = vpop.eup %3562 }
 0x22c   :  { %v4240_v57 = vadd.f32 %v1802_v37, %v1542_v10  ;;  %v1473_v15 = vperm.slane %v4244_v60, 0  ;;  %v678_v37 = vrot.slane %v4206_v47, 3  ;;  %v3565_v55 = vpop.eup %3564 }
 0x22d   :  { %1360 = vperm.xlu0 %3449, %v5102_v41   ;;  %v3567_v63 = vpop.eup %3566 }
 0x22e   :  { %v1825_v8 = vmul.f32 %v3557_v5, %v4240_v57  ;;  %v3569_v61 = vpop.eup %3568  ;;  %v603_v27 = vmul.f32 0.6931472, %v3567_v63 }
 0x22f   :  { %3439 = vset.pattern.permute.xlu2 %v4043_v17  ;;  %v1133_v16 = vpop.permute.xlu0 %1132 }
 0x230   :  { %v1546_v20 = vmul.f32 %v1473_v15, %v1133_v16 }
 0x231   :  { %1269 = vperm.xlu1 %3441, %v1264_v62   ;;  %v1120_v6 = vpop.permute.xlu1 %1119  ;;  %v1114_v45 = vpop.permute.xlu2 %1113 }
 0x232   :  { %v1544_v54 = vmul.f32 %v1472_v53, %v1120_v6  ;;  %v1543_v34 = vmul.f32 %v1472_v53, %v1114_v45  ;;  %v780_v45 = vmul.f32 %v706_v1, %v4113_v3 }
 0x234   :  { %v4253_v7 = vadd.f32 %v1825_v8, %v1544_v54  ;;  %v4259_v10 = vadd.f32 %v1824_v19, %v1543_v34  ;;  %v708_v54 = vperm.slane %v678_v37, 0  ;;  %v781_v8 = vmul.f32 %v707_v46, %v4093_v49 }
 0x235   :  { %3452 = vset.pattern.permute.xlu0 %v4047_v18  ;;  %v1444_v34 = vrot.slane %v4244_v60, 1  ;;  %v863_v16 = vmul.f32 1.442695, %v780_v45 }
 0x236   :  { %5159 = vst [vmem:[#allocation34_spill] sm:$0xff] %v4253_v7  ;;  %v1848_v39 = vmul.f32 %v3563_v31, %v4253_v7  ;;  %v1847_v5 = vmul.f32 %v3565_v55, %v4259_v10  ;;  %v865_v19 = vmul.f32 1.442695, %v781_v8  ;;  %v1445_v55 = vrot.slane %v4244_v60, 2 }
 0x237   :  { %5160 = vst [vmem:[#allocation35_spill] sm:$0xff] %v4259_v10  ;;  %1243 = vperm.xlu2 %3439, %v1238_v0   ;;  %v5099_v0 = vperm.slane %v4230_v38, 4  ;;  %v1474_v1 = vperm.slane %v1444_v34, 0  ;;  %3570 = vpow2.f32 %v863_v16  ;;  %v5098_v16 = vperm.slane %v4230_v38, 7 }
 0x238   :  { %v4264_v9 = vadd.f32 %v1848_v39, %v1546_v20  ;;  %v782_v39 = vmul.f32 %v707_v46, %v4113_v3  ;;  %3572 = vpow2.f32 %v865_v19  ;;  %v1475_v46 = vperm.slane %v1445_v55, 0 }
 0x239   :  { %1282 = vperm.xlu1 %3441, %v1277_v24   ;;  %v1127_v44 = vpop.permute.xlu2 %1126 }
 0x23a   :  { %5161 = vst [vmem:[#allocation36_spill] sm:$0xff] %v4264_v9  ;;  %v1545_v53 = vmul.f32 %v1473_v15, %v1127_v44  ;;  %v636_v6 = vpop.permute.xlu1 %635  ;;  %v783_v15 = vmul.f32 %v708_v54, %v4093_v49  ;;  %v4290_v44 = vadd.f32 %v603_v27, %v576_v33  ;;  %v679_v27 = vrot.slane %v4206_v47, 4 }
 0x23b   :  { %645 = vst.msk [vmem:[#allocation7 + $0x10] sm:$0xff] %vm622_vm0, %v636_v6  ;;  %v1446_v6 = vrot.slane %v4244_v60, 3  ;;  %v5104_v33 = vperm.slane %v4096_v50, 6 }
 0x23c   :  { %v4273_v40 = vadd.f32 %v1847_v5, %v1545_v53  ;;  %v867_v53 = vmul.f32 1.442695, %v782_v39 }
 0x23d   :  { %1392 = vperm.xlu0 %3452, %v5099_v0   ;;  %v3571_v5 = vpop.eup %3570 }
 0x23e   :  { %5162 = vst [vmem:[#allocation37_spill] sm:$0xff] %v4273_v40  ;;  %v1870_v20 = vmul.f32 %v3569_v61, %v4273_v40  ;;  %v3573_v45 = vpop.eup %3572  ;;  %v1871_v34 = vmul.f32 %v3571_v5, %v4264_v9  ;;  %v709_v5 = vperm.slane %v679_v27, 0 }
 0x23f   :  { %1256 = vperm.xlu2 %3439, %v1251_v25   ;;  %v869_v25 = vmul.f32 1.442695, %v783_v15  ;;  %v5100_v15 = vperm.slane %v4290_v44, 0 }
 0x240   :  { %v786_v27 = vmul.f32 %v709_v5, %v4113_v3 }
 0x241   :  { %3444 = vset.pattern.permute.xlu1 %v4047_v18  ;;  %3574 = vpow2.f32 %v869_v25  ;;  %v683_v25 = vrot.slane %v4290_v44, 1 }
 0x242   :  { %v1140_v31 = vpop.permute.xlu1 %1139  ;;  %3576 = vpow2.f32 %v867_v53 }
 0x243   :  { %v1547_v32 = vmul.f32 %v1474_v1, %v1140_v31  ;;  %v1166_v31 = vpop.permute.xlu0 %1165 }
 0x245   :  { %v4286_v37 = vadd.f32 %v1870_v20, %v1547_v32  ;;  %3455 = vset.pattern.permute.xlu0 %v4043_v17  ;;  %v1476_v20 = vperm.slane %v1446_v6, 0 }
 0x247   :  { %5163 = vst [vmem:[#allocation38_spill] sm:$0xff] %v4286_v37  ;;  %3442 = vset.pattern.permute.xlu2 %v4047_v18  ;;  %v1893_v61 = vmul.f32 %v3573_v45, %v4286_v37  ;;  %v3575_v39 = vpop.eup %3574  ;;  %v1551_v55 = vmul.f32 %v1476_v20, %v1166_v31  ;;  %v785_v31 = vmul.f32 %v709_v5, %v4093_v49 }
 0x249   :  { %1301 = vperm.xlu1 %3444, %v1290_v59   ;;  %v1146_v2 = vpop.permute.xlu2 %1145  ;;  %v784_v59 = vmul.f32 %v708_v54, %v4113_v3  ;;  %v793_v54 = vmul.f32 %v5100_v15, %v4093_v49 }
 0x24a   :  { %v1548_v8 = vmul.f32 %v1474_v1, %v1146_v2  ;;  %v1153_v63 = vpop.permute.xlu1 %1152  ;;  %v3577_v2 = vpop.eup %3576 }
 0x24b   :  { %v1549_v19 = vmul.f32 %v1475_v46, %v1153_v63  ;;  %v871_v6 = vmul.f32 1.442695, %v784_v59 }
 0x24c   :  { %v4301_v32 = vadd.f32 %v1871_v34, %v1548_v8 }
 0x24d   :  { %v4304_v1 = vadd.f32 %v1893_v61, %v1549_v19  ;;  %1425 = vperm.xlu0 %3455, %v5098_v16   ;;  %v680_v19 = vrot.slane %v4206_v47, 5  ;;  %v4322_v61 = vperm.slane %v683_v25, 0  ;;  %3578 = vpow2.f32 %v871_v6 }
 0x24e   :  { %5164 = vst [vmem:[#allocation39_spill] sm:$0xff] %v4301_v32  ;;  %v1894_v63 = vmul.f32 %v3577_v2, %v4301_v32  ;;  %v873_v25 = vmul.f32 1.442695, %v785_v31  ;;  %v4342_v2 = vmul.f32 %v4290_v44, %v4036_v11  ;;  %v681_v31 = vrot.slane %v4206_v47, 6 }
 0x24f   :  { %5165 = vst [vmem:[#allocation40_spill] sm:$0xff] %v4304_v1  ;;  %v1916_v53 = vmul.f32 %v3575_v39, %v4304_v1  ;;  %1275 = vperm.xlu2 %3442, %v1264_v62   ;;  %v889_v62 = vmul.f32 1.442695, %v793_v54  ;;  %v4329_v59 = vperm.slane %v680_v19, 0  ;;  %v875_v54 = vmul.f32 1.442695, %v786_v27 }
 0x250   :  { %v5106_v0 = vperm.slane %v4342_v2, 0  ;;  %v4359_v15 = vperm.slane %v681_v31, 0 }
 0x251   :  { %1314 = vperm.xlu1 %3444, %v5104_v33   ;;  %v1159_v45 = vpop.permute.xlu2 %1158  ;;  %v4318_v8 = vadd.f32 %v1916_v53, %v1551_v55  ;;  %v4333_v55 = vpop.permute.xlu0 %1197  ;;  %3580 = vpow2.f32 %v889_v62  ;;  %v4337_v53 = vld [vmem:[#allocation7] sm:$0xff]  ;;  %v1447_v62 = vrot.slane %v4244_v60, 4 }
 0x252   :  { %v1550_v34 = vmul.f32 %v1475_v46, %v1159_v45  ;;  %v795_v46 = vmul.f32 %v4322_v61, %v4093_v49  ;;  %v787_v45 = vmul.f32 %v4329_v59, %v4093_v49  ;;  %v5101_v19 = vperm.slane %v4337_v53, 1 }
 0x253   :  { %5166 = vst [vmem:[#allocation41_spill] sm:$0xff] %v4318_v8  ;;  %v3579_v5 = vpop.eup %3578  ;;  %3582 = vpow2.f32 %v873_v25 }
 0x254   :  { %v4325_v39 = vadd.f32 %v1894_v63, %v1550_v34  ;;  %v893_v34 = vmul.f32 1.442695, %v795_v46  ;;  %3584 = vpow2.f32 %v875_v54  ;;  %v5107_v46 = vperm.slane %v4230_v38, 0 }
 0x255   :  { %3458 = vset.pattern.permute.xlu0 %v4047_v18  ;;  %v877_v25 = vmul.f32 1.442695, %v787_v45 }
 0x256   :  { %5167 = vst [vmem:[#allocation42_spill] sm:$0xff] %v4325_v39  ;;  %3586 = vpow2.f32 %v893_v34 }
 0x257   :  { %1288 = vperm.xlu2 %3442, %v1277_v24   ;;  %v1917_v24 = vmul.f32 %v3579_v5, %v4325_v39  ;;  %v3581_v27 = vpop.eup %3580  ;;  %3588 = vpow2.f32 %v877_v25 }
 0x258   :  { %v1667_v5 = vmul.f32 0.0, %v3581_v27 }
 0x259   :  { %3447 = vset.pattern.permute.xlu1 %v4043_v17 }
 0x25a   :  { %v1172_v6 = vpop.permute.xlu1 %1171 }
 0x25b   :  { %v1552_v63 = vmul.f32 %v1476_v20, %v1172_v6  ;;  %v1477_v6 = vperm.slane %v1447_v62, 0  ;;  %v1448_v62 = vrot.slane %v4244_v60, 5 }
 0x25d   :  { %v4350_v16 = vadd.f32 %v1917_v24, %v1552_v63  ;;  %2118 = vperm.xlu0 %3458, %v5101_v19   ;;  %v3583_v63 = vpop.eup %3582 }
 0x25e   :  { %v3585_v19 = vpop.eup %3584  ;;  %v1939_v21 = vmul.f32 %v3583_v63, %v4318_v8 }
 0x25f   :  { %5168 = vst [vmem:[#allocation43_spill] sm:$0xff] %v4350_v16  ;;  %3445 = vset.pattern.permute.xlu2 %v4043_v17  ;;  %v1231_v20 = vpop.permute.xlu0 %1230  ;;  %v1940_v11 = vmul.f32 %v3585_v19, %v4350_v16  ;;  %v3587_v27 = vpop.eup %3586  ;;  %v5109_v19 = vperm.slane %v4230_v38, 1 }
 0x260   :  { %v1561_v54 = vmul.f32 %v5106_v0, %v1231_v20  ;;  %v789_v20 = vmul.f32 %v4359_v15, %v4093_v49  ;;  %v544_v0 = vpop.f32.mrf.mxu2 }
 0x261   :  { %1334 = vperm.xlu1 %3447, %v5107_v46   ;;  %v1179_v24 = vpop.permute.xlu2 %1178  ;;  %v4382_v25 = vadd.f32 %v4069_v30, %v544_v0  ;;  %v1449_v0 = vrot.slane %v4244_v60, 6 }
 0x262   :  { %v4363_v34 = vadd.f32 %v1667_v5, %v1561_v54  ;;  %v1553_v41 = vmul.f32 %v1477_v6, %v1179_v24  ;;  %v1185_v33 = vpop.permute.xlu1 %1184  ;;  %v3589_v5 = vpop.eup %3588  ;;  %v1452_v24 = vrot.slane %v4342_v2, 2 }
 0x263   :  { %v1554_v45 = vmul.f32 %v1477_v6, %v1185_v33  ;;  %v5172_v33 = vperm.slane %v4096_v50, 6 }
 0x264   :  { %5169 = vst [vmem:[#allocation44_spill] sm:$0xff] %v4363_v34  ;;  %v4368_v31 = vadd.f32 %v1939_v21, %v1553_v41  ;;  %v4376_v54 = vmul.f32 %v3587_v27, %v4363_v34  ;;  %v4384_v21 = vperm.slane %v1448_v62, 0  ;;  %v881_v41 = vmul.f32 1.442695, %v789_v20 }
 0x265   :  { %v4372_v46 = vadd.f32 %v1940_v11, %v1554_v45  ;;  %3461 = vset.pattern.permute.xlu0 %v4043_v17  ;;  %v5108_v45 = vperm.slane %v4337_v53, 4  ;;  %v581_v27 = vand.u32 2147483647, %v4382_v25  ;;  %v4398_v62 = vperm.slane %v1452_v24, 0 }
 0x266   :  { %5170 = vst [vmem:[#allocation45_spill] sm:$0xff] %v4368_v31  ;;  %v1962_v63 = vmul.f32 %v3589_v5, %v4368_v31  ;;  %3590 = vpow2.f32 %v881_v41  ;;  %v5174_v20 = vperm.slane %v4096_v50, 7  ;;  %v788_v50 = vmul.f32 %v4329_v59, %v4113_v3 }
 0x267   :  { %5171 = vst [vmem:[#allocation46_spill] sm:$0xff] %v4372_v46  ;;  %1308 = vperm.xlu2 %3445, %v5172_v33   ;;  %v585_v5 = vsub.f32 0.0, %v581_v27  ;;  %v5175_v27 = vperm.slane %v4230_v38, 2  ;;  %v684_v34 = vrot.slane %v4290_v44, 2  ;;  %v5178_v31 = vperm.slane %v4230_v38, 1 }
 0x269   :  { %1347 = vperm.xlu1 %3447, %v5109_v19   ;;  %v1192_v11 = vpop.permute.xlu2 %1191  ;;  %v592_v24 = vmul.f32 1.442695, %v585_v5  ;;  %v5114_v5 = vperm.slane %v4337_v53, 6 }
 0x26a   :  { %v1555_v6 = vmul.f32 %v4384_v21, %v1192_v11 }
 0x26b   :  { %3592 = vpow2.f32 %v592_v24 }
 0x26c   :  { %v4393_v30 = vadd.f32 %v1962_v63, %v1555_v6  ;;  %v4406_v6 = vperm.slane %v1449_v0, 0  ;;  %v3591_v41 = vpop.eup %3590 }
 0x26d   :  { %2151 = vperm.xlu0 %3461, %v5108_v45  }
 0x26e   :  { %5173 = vst [vmem:[#allocation47_spill] sm:$0xff] %v4393_v30  ;;  %v1985_v19 = vmul.f32 %v3591_v41, %v4393_v30 }
 0x26f   :  { %1321 = vperm.xlu2 %3445, %v5174_v20   ;;  %v1263_v33 = vpop.permute.xlu0 %1262  ;;  %v1455_v20 = vrot.slane %v4342_v2, 5 }
 0x270   :  { %v4403_v11 = vmul.f32 %v4398_v62, %v1263_v33  ;;  %v879_v33 = vmul.f32 1.442695, %v788_v50  ;;  %v5116_v50 = vperm.slane %v4230_v38, 3 }
 0x271   :  { %3450 = vset.pattern.permute.xlu1 %v4047_v18  ;;  %v3593_v59 = vpop.eup %3592  ;;  %v4427_v41 = vperm.slane %v1455_v20, 0  ;;  %v796_v20 = vmul.f32 %v4322_v61, %v4113_v3  ;;  %v4451_v61 = vld [vmem:[#allocation7 + $0x8] sm:$0xff] }
 0x272   :  { %v1205_v63 = vpop.permute.xlu1 %1204  ;;  %3594 = vpow2.f32 %v879_v33  ;;  %v597_v30 = vadd.f32 1.0, %v3593_v59 }
 0x273   :  { %v1557_v45 = vmul.f32 %v4406_v6, %v1205_v63 }
 0x275   :  { %v4410_v52 = vadd.f32 %v1985_v19, %v1557_v45  ;;  %3464 = vset.pattern.permute.xlu0 %v4047_v18  ;;  %v5176_v19 = vperm.slane %v4290_v44, 0 }
 0x277   :  { %3448 = vset.pattern.permute.xlu2 %v4047_v18  ;;  %v794_v45 = vmul.f32 %v5176_v19, %v4113_v3 }
 0x279   :  { %1366 = vperm.xlu1 %3450, %v5175_v27   ;;  %v4429_v63 = vpop.permute.xlu2 %1210  ;;  %v5177_v27 = vperm.slane %v4230_v38, 0  ;;  %v891_v51 = vmul.f32 1.442695, %v794_v45  ;;  %v3595_v45 = vpop.eup %3594 }
 0x27a   :  { %v4418_v0 = vpop.permute.xlu1 %1217  ;;  %v1963_v59 = vmul.f32 %v3595_v45, %v4372_v46 }
 0x27b   :  { %3596 = vpow2.f32 %v891_v51  ;;  %v1556_v51 = vmul.f32 %v4384_v21, %v4333_v55  ;;  %v5125_v55 = vperm.slane %v4451_v61, 1  ;;  %v1451_v21 = vrot.slane %v4342_v2, 1 }
 0x27c   :  { %3598 = vlog2.f32 %v597_v30 }
 0x27d   :  { %2183 = vperm.xlu0 %3464, %v5114_v5   ;;  %v715_v5 = vperm.slane %v684_v34, 0  ;;  %v4459_v45 = vadd.f32 %v1963_v59, %v1556_v51  ;;  %v790_v59 = vmul.f32 %v4359_v15, %v4113_v3 }
 0x27f   :  { %v1296_v24 = vpop.permute.xlu0 %1295  ;;  %1340 = vperm.xlu2 %3448, %v5177_v27   ;;  %v685_v27 = vrot.slane %v4290_v44, 3 }
 0x280   :  { %v4436_v19 = vmul.f32 %v4427_v41, %v1296_v24  ;;  %v895_v24 = vmul.f32 1.442695, %v796_v20  ;;  %v798_v20 = vmul.f32 %v715_v5, %v4113_v3 }
 0x281   :  { %1379 = vperm.xlu1 %3450, %v5116_v50   ;;  %v797_v50 = vmul.f32 %v715_v5, %v4093_v49  ;;  %v716_v34 = vperm.slane %v685_v27, 0  ;;  %v3597_v8 = vpop.eup %3596  ;;  %v4454_v30 = vpop.permute.xlu2 %1223  ;;  %v577_v5 = vmax.f32 %v4382_v25, 0.0 }
 0x282   :  { %3600 = vpow2.f32 %v895_v24  ;;  %v3599_v46 = vpop.eup %3598  ;;  %v1668_v1 = vmul.f32 0.0, %v3597_v8  ;;  %v899_v24 = vmul.f32 1.442695, %v798_v20  ;;  %v686_v20 = vrot.slane %v4290_v44, 4 }
 0x283   :  { %v638_v33 = vpop.permute.xlu1 %637  ;;  %v897_v27 = vmul.f32 1.442695, %v797_v50  ;;  %v800_v32 = vmul.f32 %v716_v34, %v4113_v3  ;;  %v605_v51 = vmul.f32 0.6931472, %v3599_v46  ;;  %v799_v25 = vmul.f32 %v716_v34, %v4093_v49 }
 0x284   :  { %646 = vst.msk [vmem:[#allocation7 + $0x18] sm:$0xff] %vm622_vm0, %v638_v33  ;;  %v682_v33 = vrot.slane %v4206_v47, 7  ;;  %v5179_v47 = vperm.slane %v4342_v2, 0  ;;  %v717_v7 = vperm.slane %v686_v20, 0  ;;  %v4504_v20 = vld [vmem:[#allocation21] sm:$0xff] }
 0x285   :  { %3467 = vset.pattern.permute.xlu0 %v4043_v17  ;;  %3602 = vpow2.f32 %v897_v27  ;;  %v901_v40 = vmul.f32 1.442695, %v799_v25 }
 0x286   :  { %v712_v37 = vperm.slane %v682_v33, 0  ;;  %v1482_v33 = vperm.slane %v1451_v21, 0  ;;  %3604 = vpow2.f32 %v899_v24  ;;  %v4486_v21 = vadd.f32 %v605_v51, %v577_v5 }
 0x287   :  { %1353 = vperm.xlu2 %3448, %v5178_v31   ;;  %v1457_v31 = vrot.slane %v4342_v2, 7  ;;  %v1450_v51 = vrot.slane %v4244_v60, 7 }
 0x288   :  { %v3601_v8 = vpop.eup %3600  ;;  %v4497_v5 = vmul.f32 %v4486_v21, %v4039_v13  ;;  %v792_v60 = vmul.f32 %v712_v37, %v4113_v3 }
 0x289   :  { %3453 = vset.pattern.permute.xlu1 %v4043_v17  ;;  %v4473_v50 = vperm.slane %v1457_v31, 0  ;;  %v883_v31 = vmul.f32 1.442695, %v790_v59 }
 0x28b   :  { %v1237_v16 = vpop.permute.xlu1 %1236 }
 0x28c   :  { %v1562_v39 = vmul.f32 %v5179_v47, %v1237_v16  ;;  %v5131_v16 = vperm.slane %v4230_v38, 5 }
 0x28d   :  { %2216 = vperm.xlu0 %3467, %v5125_v55  }
 0x28e   :  { %v4471_v9 = vadd.f32 %v1668_v1, %v1562_v39  ;;  %v903_v1 = vmul.f32 1.442695, %v800_v32  ;;  %v791_v39 = vmul.f32 %v712_v37, %v4093_v49 }
 0x28f   :  { %v1328_v47 = vpop.permute.xlu0 %1327  ;;  %3451 = vset.pattern.permute.xlu2 %v4043_v17 }
 0x290   :  { %5180 = vst [vmem:[#allocation48_spill] sm:$0xff] %v4471_v9  ;;  %v4480_v55 = vmul.f32 %v4473_v50, %v1328_v47  ;;  %v1689_v15 = vmul.f32 %v3601_v8, %v4471_v9  ;;  %3606 = vpow2.f32 %v903_v1  ;;  %v885_v32 = vmul.f32 1.442695, %v791_v39  ;;  %v3603_v8 = vpop.eup %3602  ;;  %v3364_v9 = vld [vmem:[#allocation16 + $0x44] sm:$0xf] }
 0x291   :  { %1399 = vperm.xlu1 %3453, %v5131_v16   ;;  %v1244_v46 = vpop.permute.xlu2 %1243  ;;  %3608 = vpow2.f32 %v883_v31  ;;  %v3605_v59 = vpop.eup %3604  ;;  %v687_v1 = vrot.slane %v4290_v44, 5  ;;  %v1459_v31 = vrot.slane %v4497_v5, 2 }
 0x292   :  { %v1563_v27 = vmul.f32 %v1482_v33, %v1244_v46  ;;  %3610 = vpow2.f32 %v901_v40  ;;  %v1558_v46 = vmul.f32 %v4406_v6, %v4429_v63  ;;  %v688_v63 = vrot.slane %v4290_v44, 6 }
 0x293   :  { %v1250_v34 = vpop.permute.xlu1 %1249  ;;  %3612 = vpow2.f32 %v885_v32  ;;  %v1480_v32 = vperm.slane %v1450_v51, 0  ;;  %v887_v51 = vmul.f32 1.442695, %v792_v60 }
 0x294   :  { %v4489_v47 = vadd.f32 %v4376_v54, %v1563_v27  ;;  %v1564_v10 = vmul.f32 %v1482_v33, %v1250_v34  ;;  %v5183_v54 = vperm.slane %v4230_v38, 3  ;;  %v5130_v33 = vperm.slane %v4230_v38, 6 }
 0x295   :  { %3470 = vset.pattern.permute.xlu0 %v4047_v18 }
 0x296   :  { %5181 = vst [vmem:[#allocation49_spill] sm:$0xff] %v4489_v47  ;;  %v4492_v49 = vadd.f32 %v1689_v15, %v1564_v10  ;;  %v1711_v24 = vmul.f32 %v3603_v8, %v4489_v47  ;;  %v801_v10 = vmul.f32 %v4504_v20, %v717_v7  ;;  %v3607_v39 = vpop.eup %3606  ;;  %v5129_v8 = vperm.slane %v4451_v61, 3 }
 0x297   :  { %1373 = vperm.xlu2 %3451, %v5183_v54   ;;  %v3609_v34 = vpop.eup %3608 }
 0x298   :  { %5182 = vst [vmem:[#allocation50_spill] sm:$0xff] %v4492_v49  ;;  %v1712_v25 = vmul.f32 %v3605_v59, %v4492_v49  ;;  %v905_v3 = vmul.f32 1.442695, %v801_v10  ;;  %v1986_v37 = vmul.f32 %v3609_v34, %v4459_v45  ;;  %v3611_v6 = vpop.eup %3610  ;;  %v5186_v34 = vperm.slane %v4230_v38, 4 }
 0x299   :  { %1412 = vperm.xlu1 %3453, %v5130_v33   ;;  %v1257_v15 = vpop.permute.xlu2 %1256 }
 0x29a   :  { %v1565_v40 = vmul.f32 %v4398_v62, %v1257_v15  ;;  %v4516_v27 = vadd.f32 %v1712_v25, %v4403_v11  ;;  %v1559_v62 = vmul.f32 %v1480_v32, %v4418_v0  ;;  %v718_v11 = vperm.slane %v687_v1, 0  ;;  %v3613_v25 = vpop.eup %3612  ;;  %v4537_v0 = vld [vmem:[#allocation21 + $0x8] sm:$0xff] }
 0x29b   :  { %v4529_v15 = vperm.slane %v1459_v31, 0  ;;  %v4533_v10 = vadd.f32 %v1986_v37, %v1558_v46  ;;  %v802_v1 = vmul.f32 %v4537_v0, %v717_v7  ;;  %3614 = vpow2.f32 %v905_v3  ;;  %v3370_v46 = vld [vmem:[#allocation16 + $0x74] sm:$0xf]  ;;  %v3256_v37 = vld [vmem:[#allocation16 + $0x78] sm:$0xf0] }
 0x29c   :  { %5184 = vst [vmem:[#allocation51_spill] sm:$0xff] %v4516_v27  ;;  %v4519_v59 = vadd.f32 %v1711_v24, %v1565_v40  ;;  %v4522_v54 = vmul.f32 %v3607_v39, %v4516_v27  ;;  %v1453_v24 = vrot.slane %v4342_v2, 3  ;;  %v803_v31 = vmul.f32 %v4504_v20, %v718_v11 }
 0x29d   :  { %2248 = vperm.xlu0 %3470, %v5129_v8   ;;  %v2008_v8 = vmul.f32 %v3613_v25, %v4410_v52  ;;  %3616 = vpow2.f32 %v887_v51  ;;  %v3259_v16 = vor.u32 %v3370_v46, %v3256_v37  ;;  %v5135_v7 = vperm.slane %v4451_v61, 6  ;;  %v3240_v37 = vld [vmem:[#allocation16 + $0x58] sm:$0xf0] }
 0x29e   :  { %5185 = vst [vmem:[#allocation52_spill] sm:$0xff] %v4519_v59  ;;  %v1734_v39 = vmul.f32 %v3611_v6, %v4519_v59  ;;  %v719_v6 = vperm.slane %v688_v63, 0  ;;  %v907_v25 = vmul.f32 1.442695, %v802_v1  ;;  %v909_v3 = vmul.f32 1.442695, %v803_v31 }
 0x29f   :  { %v1361_v40 = vpop.permute.xlu0 %1360  ;;  %1386 = vperm.xlu2 %3451, %v5186_v34   ;;  %v4546_v33 = vadd.f32 %v2008_v8, %v1559_v62  ;;  %v1484_v34 = vperm.slane %v1453_v24, 0  ;;  %262 = vmatpush.bf16.msra.mxu1 %v3259_v16  ;;  %v1560_v63 = vmul.f32 %v1480_v32, %v4454_v30  ;;  %v1454_v62 = vrot.slane %v4342_v2, 4  ;;  %v3368_v24 = vld [vmem:[#allocation16 + $0x64] sm:$0xf]  ;;  %v3248_v1 = vld [vmem:[#allocation16 + $0x68] sm:$0xf0] }
 0x2a0   :  { %v4542_v60 = vmul.f32 %v4529_v15, %v1361_v40  ;;  %v805_v40 = vmul.f32 %v4504_v20, %v719_v6  ;;  %3618 = vpow2.f32 %v907_v25  ;;  %v5188_v46 = vperm.slane %v4230_v38, 7 }
 0x2a1   :  { %3456 = vset.pattern.permute.xlu1 %v4047_v18  ;;  %v3615_v27 = vpop.eup %3614  ;;  %3620 = vpow2.f32 %v909_v3  ;;  %v1485_v49 = vperm.slane %v1454_v62, 0  ;;  %v1461_v25 = vrot.slane %v4497_v5, 4  ;;  %v3232_v3 = vld [vmem:[#allocation16 + $0x48] sm:$0xf0] }
 0x2a2   :  { %v913_v32 = vmul.f32 1.442695, %v805_v40 }
 0x2a3   :  { %v1270_v13 = vpop.permute.xlu1 %1269  ;;  %v3617_v51 = vpop.eup %3616  ;;  %v4571_v62 = vperm.slane %v1461_v25, 0 }
 0x2a4   :  { %v1567_v59 = vmul.f32 %v1484_v34, %v1270_v13  ;;  %v804_v13 = vmul.f32 %v4537_v0, %v718_v11  ;;  %v2009_v31 = vmul.f32 %v3617_v51, %v4533_v10  ;;  %3622 = vpow2.f32 %v913_v32 }
 0x2a5   :  { %2287 = vperm.xlu0 %3470, %v5135_v7  }
 0x2a6   :  { %v4553_v8 = vadd.f32 %v1734_v39, %v1567_v59  ;;  %v3251_v59 = vor.u32 %v3368_v24, %v3248_v1  ;;  %v3366_v39 = vld [vmem:[#allocation16 + $0x54] sm:$0xf]  ;;  %v4563_v11 = vadd.f32 %v2009_v31, %v1560_v63  ;;  %v3619_v40 = vpop.eup %3618  ;;  %v5189_v1 = vperm.slane %v4230_v38, 5 }
 0x2a7   :  { %3454 = vset.pattern.permute.xlu2 %v4047_v18  ;;  %v3243_v47 = vor.u32 %v3366_v39, %v3240_v37  ;;  %v3621_v24 = vpop.eup %3620  ;;  %v3235_v31 = vor.u32 %v3364_v9, %v3232_v3  ;;  %v3362_v39 = vld [vmem:[#allocation16 + $0x34] sm:$0xf]  ;;  %v3224_v37 = vld [vmem:[#allocation16 + $0x38] sm:$0xf0]  ;;  %v5140_v9 = vperm.slane %v4451_v61, 7 }
 0x2a8   :  { %5187 = vst [vmem:[#allocation53_spill] sm:$0xff] %v4553_v8  ;;  %v1757_v16 = vmul.f32 %v3615_v27, %v4553_v8  ;;  %v911_v8 = vmul.f32 1.442695, %v804_v13  ;;  %263 = vmatpush.bf16.msra.mxu1 %v3251_v59  ;;  %v806_v59 = vmul.f32 %v4537_v0, %v719_v6 }
 0x2a9   :  { %1431 = vperm.xlu1 %3456, %v5188_v46   ;;  %v1276_v30 = vpop.permute.xlu2 %1275 }
 0x2aa   :  { %v1568_v7 = vmul.f32 %v1484_v34, %v1276_v30  ;;  %3624 = vpow2.f32 %v911_v8  ;;  %v915_v6 = vmul.f32 1.442695, %v806_v59  ;;  %v1464_v59 = vrot.slane %v4497_v5, 7 }
 0x2ab   :  { %v1283_v27 = vpop.permute.xlu1 %1282 }
 0x2ac   :  { %v4566_v51 = vadd.f32 %v4522_v54, %v1568_v7  ;;  %v1569_v46 = vmul.f32 %v1485_v49, %v1283_v27  ;;  %v2094_v54 = vperm.slane %v4337_v53, 0  ;;  %v689_v7 = vrot.slane %v4290_v44, 7  ;;  %264 = vmatpush.bf16.msra.mxu1 %v3243_v47  ;;  %v3623_v44 = vpop.eup %3622 }
 0x2ad   :  { %3474 = vset.pattern.permute.xlu0 %v4043_v17  ;;  %v3227_v27 = vor.u32 %v3362_v39, %v3224_v37  ;;  %3626 = vpow2.f32 %v915_v6  ;;  %v4608_v6 = vperm.slane %v1464_v59, 0 }
 0x2ae   :  { %v4569_v34 = vadd.f32 %v1757_v16, %v1569_v46  ;;  %v1758_v63 = vmul.f32 %v3619_v40, %v4566_v51  ;;  %v720_v47 = vperm.slane %v689_v7, 0 }
 0x2af   :  { %v1393_v13 = vpop.permute.xlu0 %1392  ;;  %1405 = vperm.xlu2 %3454, %v5189_v1  }
 0x2b0   :  { %v1780_v30 = vmul.f32 %v3621_v24, %v4569_v34  ;;  %v4580_v16 = vmul.f32 %v4571_v62, %v1393_v13  ;;  %265 = vmatpush.bf16.msra.mxu1 %v3235_v31  ;;  %v3625_v40 = vpop.eup %3624  ;;  %v3360_v24 = vld [vmem:[#allocation16 + $0x24] sm:$0xf]  ;;  %v5190_v13 = vperm.slane %v4230_v38, 6  ;;  %v807_v1 = vmul.f32 %v4504_v20, %v720_v47 }
 0x2b1   :  { %2105 = vperm.xlu1 %3456, %v2094_v54   ;;  %v1289_v32 = vpop.permute.xlu2 %1288  ;;  %v721_v31 = vperm.slane %v4486_v21, 0 }
 0x2b2   :  { %v1570_v25 = vmul.f32 %v1485_v49, %v1289_v32  ;;  %v4586_v8 = vadd.f32 %v1780_v30, %v4436_v19  ;;  %v3216_v19 = vld [vmem:[#allocation16 + $0x28] sm:$0xf0]  ;;  %v3358_v30 = vld [vmem:[#allocation16 + $0x14] sm:$0xf]  ;;  %v3208_v32 = vld [vmem:[#allocation16 + $0x18] sm:$0xf0] }
 0x2b3   :  { %v3219_v7 = vor.u32 %v3360_v24, %v3216_v19  ;;  %v917_v37 = vmul.f32 1.442695, %v807_v1  ;;  %v3211_v38 = vor.u32 %v3358_v30, %v3208_v32  ;;  %v3627_v24 = vpop.eup %3626  ;;  %v3200_v30 = vld [vmem:[#allocation16 + $0x8] sm:$0xf0] }
 0x2b4   :  { %v4589_v46 = vadd.f32 %v1758_v63, %v1570_v25  ;;  %v1803_v3 = vmul.f32 %v3623_v44, %v4586_v8  ;;  %266 = vmatpush.bf16.msra.mxu1 %v3227_v27  ;;  %v808_v63 = vmul.f32 %v4537_v0, %v720_v47  ;;  %v1456_v44 = vrot.slane %v4342_v2, 6 }
 0x2b5   :  { %2294 = vperm.xlu0 %3474, %v5140_v9   ;;  %v810_v47 = vmul.f32 %v4537_v0, %v721_v31  ;;  %3628 = vpow2.f32 %v917_v37 }
 0x2b6   :  { %v1781_v49 = vmul.f32 %v3625_v40, %v4589_v46  ;;  %v919_v27 = vmul.f32 1.442695, %v808_v63  ;;  %v1487_v1 = vperm.slane %v1456_v44, 0  ;;  %v3356_v63 = vld [vmem:[#allocation16 + $0x4] sm:$0xf] }
 0x2b7   :  { %1418 = vperm.xlu2 %3454, %v5190_v13   ;;  %v5141_v13 = vperm.slane %v4337_v53, 2  ;;  %v923_v59 = vmul.f32 1.442695, %v810_v47 }
 0x2b8   :  { %267 = vmatpush.bf16.msra.mxu1 %v3219_v7  ;;  %3630 = vpow2.f32 %v919_v27 }
 0x2b9   :  { %3459 = vset.pattern.permute.xlu1 %v4043_v17  ;;  %3632 = vpow2.f32 %v923_v59 }
 0x2bb   :  { %v1302_v39 = vpop.permute.xlu1 %1301  ;;  %v3629_v9 = vpop.eup %3628 }
 0x2bc   :  { %v1572_v25 = vmul.f32 %v4427_v41, %v1302_v39  ;;  %v809_v41 = vmul.f32 %v4504_v20, %v721_v31  ;;  %268 = vmatpush.bf16.msra.mxu1 %v3211_v38  ;;  %v690_v39 = vrot.slane %v4486_v21, 1  ;;  %v3203_v31 = vor.u32 %v3356_v63, %v3200_v30 }
 0x2bd   :  { %3479 = vset.pattern.permute.xlu0 %v4047_v18 }
 0x2be   :  { %v4606_v40 = vadd.f32 %v1781_v49, %v1572_v25  ;;  %v4617_v49 = vld [vmem:[#allocation7 + $0x10] sm:$0xff]  ;;  %v921_v44 = vmul.f32 1.442695, %v809_v41  ;;  %v3631_v63 = vpop.eup %3630 }
 0x2bf   :  { %v1426_v19 = vpop.permute.xlu0 %1425  ;;  %3457 = vset.pattern.permute.xlu2 %v4043_v17  ;;  %v5143_v25 = vperm.slane %v4617_v49, 2 }
 0x2c0   :  { %v4614_v2 = vmul.f32 %v4608_v6, %v1426_v19  ;;  %v1804_v7 = vmul.f32 %v3627_v24, %v4606_v40  ;;  %269 = vmatpush.bf16.msra.mxu1 %v3203_v31  ;;  %3634 = vpow2.f32 %v921_v44 }
 0x2c1   :  { %2125 = vperm.xlu1 %3459, %v5141_v13   ;;  %v1309_v32 = vpop.permute.xlu2 %1308  ;;  %v722_v13 = vperm.slane %v690_v39, 0 }
 0x2c2   :  { %v1573_v37 = vmul.f32 %v1487_v1, %v1309_v32  ;;  %v3633_v32 = vpop.eup %3632 }
 0x2c3   :  { %v1315_v38 = vpop.permute.xlu1 %1314  ;;  %270 = vmatmul.bf16.vlgmr.msra.gmra.mxu1 %v3976_v26  ;;  %v811_v30 = vmul.f32 %v4504_v20, %v722_v13 }
 0x2c4   :  { %v4623_v24 = vadd.f32 %v1803_v3, %v1573_v37  ;;  %v1574_v19 = vmul.f32 %v1487_v1, %v1315_v38  ;;  %v2133_v3 = vperm.slane %v4337_v53, 3 }
 0x2c5   :  { %2339 = vperm.xlu0 %3479, %v5143_v25   ;;  %v925_v38 = vmul.f32 1.442695, %v811_v30 }
 0x2c6   :  { %v4627_v27 = vadd.f32 %v1804_v7, %v1574_v19  ;;  %v1826_v47 = vmul.f32 %v3629_v9, %v4623_v24  ;;  %v691_v7 = vrot.slane %v4486_v21, 2  ;;  %v3635_v31 = vpop.eup %3634 }
 0x2c7   :  { %2099 = vperm.xlu2 %3457, %v2094_v54   ;;  %v5142_v54 = vperm.slane %v4617_v49, 4  ;;  %3636 = vpow2.f32 %v925_v38  ;;  %v5194_v38 = vperm.slane %v4337_v53, 4 }
 0x2c8   :  { %v1827_v41 = vmul.f32 %v3631_v63, %v4627_v27  ;;  %v723_v37 = vperm.slane %v691_v7, 0 }
 0x2c9   :  { %2138 = vperm.xlu1 %3459, %v2133_v3   ;;  %v1322_v1 = vpop.permute.xlu2 %1321 }
 0x2ca   :  { %v1575_v9 = vmul.f32 %v4473_v50, %v1322_v1  ;;  %v4641_v26 = vadd.f32 %v1827_v41, %v4480_v55  ;;  %v5193_v50 = vperm.slane %v4337_v53, 1  ;;  %v812_v55 = vmul.f32 %v4537_v0, %v722_v13 }
 0x2cb   :  { %v813_v19 = vmul.f32 %v4504_v20, %v723_v37 }
 0x2cc   :  { %5191 = vst [vmem:[#allocation54_spill] sm:$0xff] %v4641_v26  ;;  %v4644_v59 = vadd.f32 %v1826_v47, %v1575_v9  ;;  %v1850_v39 = vmul.f32 %v3633_v32, %v4641_v26  ;;  %v1489_v47 = vperm.slane %v4497_v5, 0  ;;  %v927_v41 = vmul.f32 1.442695, %v812_v55 }
 0x2cd   :  { %2365 = vperm.xlu0 %3479, %v5142_v54   ;;  %v929_v7 = vmul.f32 1.442695, %v813_v19  ;;  %v1458_v9 = vrot.slane %v4497_v5, 1  ;;  %v3637_v13 = vpop.eup %3636  ;;  %v814_v32 = vmul.f32 %v4537_v0, %v723_v37 }
 0x2ce   :  { %5192 = vst [vmem:[#allocation55_spill] sm:$0xff] %v4644_v59  ;;  %v1849_v44 = vmul.f32 %v3635_v31, %v4644_v59  ;;  %3638 = vpow2.f32 %v927_v41 }
 0x2cf   :  { %2112 = vperm.xlu2 %3457, %v5193_v50   ;;  %3640 = vpow2.f32 %v929_v7  ;;  %v1490_v19 = vperm.slane %v1458_v9, 0  ;;  %v2159_v9 = vperm.slane %v4337_v53, 5 }
 0x2d1   :  { %3462 = vset.pattern.permute.xlu1 %v4047_v18 }
 0x2d3   :  { %v1335_v63 = vpop.permute.xlu1 %1334  ;;  %275 = vmatmul.bf16.gmra.mxu1 %v3979_v29  ;;  %v5144_v29 = vperm.slane %v4617_v49, 5 }
 0x2d4   :  { %v1577_v1 = vmul.f32 %v1489_v47, %v1335_v63  ;;  %v3639_v25 = vpop.eup %3638 }
 0x2d5   :  { %3482 = vset.pattern.permute.xlu0 %v4043_v17 }
 0x2d6   :  { %v4657_v30 = vadd.f32 %v1849_v44, %v1577_v1  ;;  %v692_v44 = vrot.slane %v4486_v21, 3  ;;  %v931_v1 = vmul.f32 1.442695, %v814_v32  ;;  %v4681_v32 = vld [vmem:[#allocation7 + $0x18] sm:$0xff] }
 0x2d7   :  { %3460 = vset.pattern.permute.xlu2 %v4047_v18 }
 0x2d8   :  { %v1872_v31 = vmul.f32 %v3637_v13, %v4657_v30  ;;  %v724_v37 = vperm.slane %v692_v44, 0  ;;  %3642 = vpow2.f32 %v931_v1  ;;  %v693_v44 = vrot.slane %v4486_v21, 4 }
 0x2d9   :  { %2157 = vperm.xlu1 %3462, %v5194_v38   ;;  %v1341_v50 = vpop.permute.xlu2 %1340  ;;  %v3641_v38 = vpop.eup %3640 }
 0x2da   :  { %v1578_v55 = vmul.f32 %v1489_v47, %v1341_v50  ;;  %v5196_v47 = vperm.slane %v4337_v53, 2  ;;  %v4690_v1 = vperm.slane %v693_v44, 0  ;;  %v5149_v44 = vperm.slane %v4681_v32, 3 }
 0x2db   :  { %v1348_v63 = vpop.permute.xlu1 %1347 }
 0x2dc   :  { %v4668_v54 = vadd.f32 %v1850_v39, %v1578_v55  ;;  %v1579_v41 = vmul.f32 %v1490_v19, %v1348_v63 }
 0x2dd   :  { %2372 = vperm.xlu0 %3482, %v5144_v29  }
 0x2de   :  { %v4672_v13 = vadd.f32 %v1872_v31, %v1579_v41  ;;  %v1873_v7 = vmul.f32 %v3639_v25, %v4668_v54  ;;  %v816_v31 = vmul.f32 %v4537_v0, %v724_v37  ;;  %v5145_v25 = vperm.slane %v4681_v32, 0  ;;  %v3643_v41 = vpop.eup %3642 }
 0x2df   :  { %2131 = vperm.xlu2 %3460, %v5196_v47   ;;  %v694_v47 = vrot.slane %v4486_v21, 5 }
 0x2e0   :  { %5195 = vst [vmem:[#allocation56_spill] sm:$0xff] %v4672_v13  ;;  %v4679_v39 = vmul.f32 %v3641_v38, %v4672_v13  ;;  %v935_v38 = vmul.f32 1.442695, %v816_v31 }
 0x2e1   :  { %2170 = vperm.xlu1 %3462, %v2159_v9   ;;  %v1354_v50 = vpop.permute.xlu2 %1353 }
 0x2e2   :  { %v1580_v55 = vmul.f32 %v1490_v19, %v1354_v50  ;;  %v818_v19 = vmul.f32 %v4537_v0, %v4690_v1  ;;  %3644 = vpow2.f32 %v935_v38  ;;  %v2185_v38 = vperm.slane %v4337_v53, 7 }
 0x2e4   :  { %v4686_v63 = vadd.f32 %v1873_v7, %v1580_v55  ;;  %v4699_v7 = vperm.slane %v694_v47, 0  ;;  %v1460_v55 = vrot.slane %v4497_v5, 3 }
 0x2e5   :  { %2411 = vperm.xlu0 %3482, %v5145_v25  }
 0x2e6   :  { %5197 = vst [vmem:[#allocation57_spill] sm:$0xff] %v4686_v63  ;;  %v1896_v29 = vmul.f32 %v3643_v41, %v4686_v63  ;;  %v939_v41 = vmul.f32 1.442695, %v818_v19  ;;  %v1492_v47 = vperm.slane %v1460_v55, 0  ;;  %v2198_v63 = vperm.slane %v4451_v61, 0 }
 0x2e7   :  { %2144 = vperm.xlu2 %3460, %v2133_v3   ;;  %v820_v3 = vmul.f32 %v4537_v0, %v4699_v7  ;;  %v695_v55 = vrot.slane %v4486_v21, 6 }
 0x2e8   :  { %v3645_v26 = vpop.eup %3644  ;;  %3646 = vpow2.f32 %v939_v41 }
 0x2e9   :  { %3465 = vset.pattern.permute.xlu1 %v4043_v17 }
 0x2eb   :  { %v1367_v50 = vpop.permute.xlu1 %1366 }
 0x2ec   :  { %v1582_v31 = vmul.f32 %v4529_v15, %v1367_v50  ;;  %v943_v50 = vmul.f32 1.442695, %v820_v3 }
 0x2ed   :  { %2450 = vperm.xlu0 %3482, %v5149_v44  }
 0x2ee   :  { %v4708_v25 = vadd.f32 %v1896_v29, %v1582_v31  ;;  %3648 = vpow2.f32 %v943_v50  ;;  %v3647_v31 = vpop.eup %3646 }
 0x2ef   :  { %3463 = vset.pattern.permute.xlu2 %v4043_v17 }
 0x2f0   :  { %5198 = vst [vmem:[#allocation58_spill] sm:$0xff] %v4708_v25  ;;  %v1919_v59 = vmul.f32 %v3645_v26, %v4708_v25  ;;  %v815_v25 = vmul.f32 %v4504_v20, %v724_v37  ;;  %v5200_v37 = vperm.slane %v4337_v53, 6 }
 0x2f1   :  { %2190 = vperm.xlu1 %3465, %v2185_v38   ;;  %v1374_v15 = vpop.permute.xlu2 %1373 }
 0x2f2   :  { %v1583_v13 = vmul.f32 %v1492_v47, %v1374_v15  ;;  %v727_v15 = vperm.slane %v695_v55, 0  ;;  %v933_v50 = vmul.f32 1.442695, %v815_v25  ;;  %v4735_v25 = vadd.f32 %v4679_v39, %v4542_v60 }
 0x2f3   :  { %v1380_v44 = vpop.permute.xlu1 %1379 }
 0x2f4   :  { %v1584_v19 = vmul.f32 %v1492_v47, %v1380_v44  ;;  %v3649_v47 = vpop.eup %3648  ;;  %3650 = vpow2.f32 %v933_v50  ;;  %5201 = vst [vmem:[#allocation60_spill] sm:$0xff] %v4735_v25  ;;  %v5202_v50 = vperm.slane %v4451_v61, 1 }
 0x2f5   :  { %3498 = vset.pattern.permute.xlu0 %v4047_v18 }
 0x2f6   :  { %v4714_v29 = vadd.f32 %v1919_v59, %v1584_v19  ;;  %v5152_v59 = vperm.slane %v4681_v32, 7  ;;  %v1462_v19 = vrot.slane %v4497_v5, 5 }
 0x2f7   :  { %2164 = vperm.xlu2 %3463, %v2159_v9  }
 0x2f8   :  { %v1942_v26 = vmul.f32 %v3647_v31, %v4714_v29 }
 0x2f9   :  { %2203 = vperm.xlu1 %3465, %v2198_v63   ;;  %v1387_v41 = vpop.permute.xlu2 %1386 }
 0x2fa   :  { %v1585_v3 = vmul.f32 %v4571_v62, %v1387_v41  ;;  %v4722_v44 = vadd.f32 %v1942_v26, %v4580_v16  ;;  %v822_v62 = vmul.f32 %v4537_v0, %v727_v15  ;;  %v1494_v16 = vperm.slane %v1462_v19, 0  ;;  %v3651_v41 = vpop.eup %3650 }
 0x2fb   :  { %v1918_v53 = vmul.f32 %v3651_v41, %v4735_v25 }
 0x2fc   :  { %5199 = vst [vmem:[#allocation59_spill] sm:$0xff] %v4722_v44  ;;  %v1965_v9 = vmul.f32 %v3649_v47, %v4722_v44  ;;  %v947_v26 = vmul.f32 1.442695, %v822_v62  ;;  %v1463_v47 = vrot.slane %v4497_v5, 6  ;;  %v817_v5 = vmul.f32 %v4504_v20, %v4690_v1 }
 0x2fd   :  { %2508 = vperm.xlu0 %3498, %v5152_v59   ;;  %v4755_v1 = vadd.f32 %v1918_v53, %v1583_v13 }
 0x2fe   :  { %3652 = vpow2.f32 %v947_v26  ;;  %v1495_v59 = vperm.slane %v1463_v47, 0  ;;  %v2224_v26 = vperm.slane %v4451_v61, 2  ;;  %v2250_v47 = vperm.slane %v4451_v61, 4 }
 0x2ff   :  { %2177 = vperm.xlu2 %3463, %v5200_v37  }
 0x301   :  { %3468 = vset.pattern.permute.xlu1 %v4047_v18 }
 0x303   :  { %v1400_v31 = vpop.permute.xlu1 %1399 }
 0x304   :  { %v1587_v55 = vmul.f32 %v1494_v16, %v1400_v31  ;;  %v3653_v60 = vpop.eup %3652 }
 0x307   :  { %3466 = vset.pattern.permute.xlu2 %v4047_v18 }
 0x309   :  { %2222 = vperm.xlu1 %3468, %v5202_v50   ;;  %v1406_v37 = vpop.permute.xlu2 %1405  ;;  %v937_v50 = vmul.f32 1.442695, %v817_v5 }
 0x30a   :  { %v1588_v19 = vmul.f32 %v1494_v16, %v1406_v37 }
 0x30b   :  { %v1413_v62 = vpop.permute.xlu1 %1412  ;;  %3654 = vpow2.f32 %v937_v50 }
 0x30c   :  { %v4742_v31 = vadd.f32 %v1965_v9, %v1588_v19  ;;  %v4744_v44 = vmul.f32 %v1495_v59, %v1413_v62  ;;  %v819_v9 = vmul.f32 %v4504_v20, %v4699_v7 }
 0x30e   :  { %v1988_v39 = vmul.f32 %v3653_v60, %v4742_v31  ;;  %v941_v37 = vmul.f32 1.442695, %v819_v9  ;;  %v821_v60 = vmul.f32 %v4504_v20, %v727_v15  ;;  %v2119_v9 = vpop.permute.xlu0 %2118 }
 0x30f   :  { %2196 = vperm.xlu2 %3466, %v2185_v38  }
 0x310   :  { %3656 = vpow2.f32 %v941_v37  ;;  %v945_v7 = vmul.f32 1.442695, %v821_v60  ;;  %v2263_v37 = vperm.slane %v4451_v61, 5 }
 0x311   :  { %2235 = vperm.xlu1 %3468, %v2224_v26   ;;  %v1419_v41 = vpop.permute.xlu2 %1418  ;;  %v3655_v38 = vpop.eup %3654 }
 0x312   :  { %v1590_v25 = vmul.f32 %v1495_v59, %v1419_v41  ;;  %v1941_v59 = vmul.f32 %v3655_v38, %v4755_v1  ;;  %3658 = vpow2.f32 %v945_v7 }
 0x314   :  { %v4750_v16 = vadd.f32 %v1988_v39, %v1590_v25  ;;  %v696_v25 = vrot.slane %v4486_v21, 7  ;;  %v4766_v5 = vadd.f32 %v1941_v59, %v1585_v3  ;;  %v2513_v3 = vmul.f32 %v2119_v9, %v4169_v36 }
 0x316   :  { %v728_v13 = vperm.slane %v696_v25, 0 }
 0x317   :  { %2209 = vperm.xlu2 %3466, %v2198_v63  }
 0x318   :  { %v823_v15 = vmul.f32 %v4504_v20, %v728_v13 }
 0x319   :  { %2261 = vperm.xlu1 %3468, %v2250_v47  }
 0x31b   :  { %v1432_v19 = vpop.permute.xlu1 %1431 }
 0x31c   :  { %v4758_v62 = vmul.f32 %v4608_v6, %v1432_v19  ;;  %v3657_v6 = vpop.eup %3656 }
 0x31d   :  { %v1964_v21 = vmul.f32 %v3657_v6, %v4766_v5  ;;  %v3659_v60 = vpop.eup %3658  ;;  %v5203_v6 = vperm.slane %v4451_v61, 3 }
 0x31f   :  { %3469 = vset.pattern.permute.xlu2 %v4043_v17 }
 0x321   :  { %3471 = vset.pattern.permute.xlu1 %v4043_v17  ;;  %v2100_v63 = vpop.permute.xlu2 %2099 }
 0x322   :  { %v2510_v53 = vmul.f32 %v2100_v63, %v4128_v28  ;;  %v949_v28 = vmul.f32 1.442695, %v823_v15  ;;  %v824_v63 = vmul.f32 %v4537_v0, %v728_v13 }
 0x323   :  { %v2106_v39 = vpop.permute.xlu1 %2105 }
 0x324   :  { %v2511_v41 = vmul.f32 %v2106_v39, %v4155_v22  ;;  %v4774_v22 = vadd.f32 %v1964_v21, %v1587_v55  ;;  %3660 = vpow2.f32 %v949_v28  ;;  %v951_v39 = vmul.f32 1.442695, %v824_v63 }
 0x326   :  { %v2574_v50 = vadd.f32 %v2511_v41, %v2510_v53  ;;  %3662 = vpow2.f32 %v951_v39 }
 0x327   :  { %2229 = vperm.xlu2 %3469, %v2224_v26   ;;  %v1987_v26 = vmul.f32 %v3659_v60, %v4774_v22 }
 0x328   :  { %v2575_v38 = vrot.slane %v2574_v50, 4 }
 0x329   :  { %2268 = vperm.xlu1 %3471, %v2263_v37   ;;  %v2113_v19 = vpop.permute.xlu2 %2112  ;;  %v4782_v55 = vadd.f32 %v1987_v26, %v4744_v44  ;;  %v5204_v44 = vperm.slane %v4451_v61, 7 }
 0x32a   :  { %v2576_v59 = vadd.f32 %v2575_v38, %v2574_v50  ;;  %v2512_v25 = vmul.f32 %v2113_v19, %v4141_v48  ;;  %v3661_v21 = vpop.eup %3660 }
 0x32b   :  { %v2010_v9 = vmul.f32 %v3661_v21, %v4782_v55 }
 0x32c   :  { %v2577_v20 = vrot.slane %v2576_v59, 2  ;;  %v2581_v7 = vadd.f32 %v2513_v3, %v2512_v25 }
 0x32d   :  { %v4787_v19 = vadd.f32 %v2010_v9, %v4614_v2 }
 0x32e   :  { %v2582_v53 = vrot.slane %v2581_v7, 4  ;;  %v2578_v41 = vadd.f32 %v2577_v20, %v2576_v59  ;;  %v3663_v59 = vpop.eup %3662 }
 0x32f   :  { %2242 = vperm.xlu2 %3469, %v5203_v6   ;;  %v2011_v20 = vmul.f32 %v3663_v59, %v4750_v16 }
 0x330   :  { %v2583_v36 = vadd.f32 %v2582_v53, %v2581_v7  ;;  %v2579_v13 = vrot.slane %v2578_v41, 1 }
 0x331   :  { %3475 = vset.pattern.permute.xlu1 %v4047_v18  ;;  %v4798_v6 = vadd.f32 %v2011_v20, %v4758_v62 }
 0x332   :  { %v2584_v48 = vrot.slane %v2583_v36, 2  ;;  %v2580_v28 = vadd.f32 %v2579_v13, %v2578_v41 }
 0x333   :  { %v2126_v0 = vpop.permute.xlu1 %2125 }
 0x334   :  { %v2585_v15 = vadd.f32 %v2584_v48, %v2583_v36  ;;  %v2514_v50 = vmul.f32 %v2126_v0, %v4157_v23 }
 0x336   :  { %v2586_v38 = vrot.slane %v2585_v15, 1 }
 0x337   :  { %2255 = vperm.xlu2 %3469, %v2250_v47  }
 0x338   :  { %v2587_v3 = vadd.f32 %v2586_v38, %v2585_v15  ;;  %v2152_v15 = vpop.permute.xlu0 %2151 }
 0x339   :  { %2300 = vperm.xlu1 %3475, %v5204_v44   ;;  %v2132_v25 = vpop.permute.xlu2 %2131  ;;  %v2518_v38 = vmul.f32 %v2152_v15, %v4184_v14 }
 0x33a   :  { %v2831_v60 = vsel %vm2830_vm1, %v2587_v3, %v2580_v28  ;;  %v2515_v63 = vmul.f32 %v2132_v25, %v4182_v12 }
 0x33b   :  { %v2139_v23 = vpop.permute.xlu1 %2138 }
 0x33c   :  { %v2588_v7 = vadd.f32 %v2515_v63, %v2514_v50  ;;  %v2516_v2 = vmul.f32 %v2139_v23, %v4171_v43  ;;  %v2302_v43 = vperm.slane %v4617_v49, 0 }
 0x33e   :  { %v2589_v26 = vrot.slane %v2588_v7, 4 }
 0x33f   :  { %3472 = vset.pattern.permute.xlu2 %v4047_v18 }
 0x340   :  { %v2590_v47 = vadd.f32 %v2589_v26, %v2588_v7 }
 0x341   :  { %3476 = vset.pattern.permute.xlu1 %v4043_v17  ;;  %v2145_v53 = vpop.permute.xlu2 %2144 }
 0x342   :  { %v2591_v39 = vrot.slane %v2590_v47, 2  ;;  %v2517_v41 = vmul.f32 %v2145_v53, %v4198_v56  ;;  %v5205_v53 = vperm.slane %v4451_v61, 6 }
 0x344   :  { %v2592_v12 = vadd.f32 %v2591_v39, %v2590_v47  ;;  %v2595_v36 = vadd.f32 %v2517_v41, %v2516_v2  ;;  %v2184_v47 = vpop.permute.xlu0 %2183  ;;  %v2341_v39 = vperm.slane %v4617_v49, 3 }
 0x346   :  { %v2593_v48 = vrot.slane %v2592_v12, 1  ;;  %v2596_v21 = vrot.slane %v2595_v36, 4 }
 0x347   :  { %2274 = vperm.xlu2 %3472, %v2263_v37   ;;  %v2315_v37 = vperm.slane %v4617_v49, 1 }
 0x348   :  { %v2594_v0 = vadd.f32 %v2593_v48, %v2592_v12  ;;  %v2597_v13 = vadd.f32 %v2596_v21, %v2595_v36 }
 0x349   :  { %2307 = vperm.xlu1 %3476, %v2302_v43  }
 0x34a   :  { %v2833_v50 = vsel %vm2832_vm2, %v2594_v0, %v2831_v60  ;;  %v2598_v9 = vrot.slane %v2597_v13, 2 }
 0x34b   :  { %v2158_v62 = vpop.permute.xlu1 %2157 }
 0x34c   :  { %v2599_v28 = vadd.f32 %v2598_v9, %v2597_v13  ;;  %v2519_v56 = vmul.f32 %v2158_v62, %v4216_v4 }
 0x34e   :  { %v2600_v3 = vrot.slane %v2599_v28, 1  ;;  %v2602_v59 = vadd.f32 %v2519_v56, %v2518_v38  ;;  %v5206_v38 = vperm.slane %v4617_v49, 5 }
 0x34f   :  { %3473 = vset.pattern.permute.xlu2 %v4043_v17 }
 0x350   :  { %v2601_v44 = vadd.f32 %v2600_v3, %v2599_v28  ;;  %v2603_v25 = vrot.slane %v2602_v59, 4  ;;  %v5207_v28 = vld [vmem:[#allocation35_spill] sm:$0xff]  ;;  %v5208_v3 = vld [vmem:[#allocation34_spill] sm:$0xff] }
 0x351   :  { %2320 = vperm.xlu1 %3476, %v2315_v37   ;;  %v2165_v63 = vpop.permute.xlu2 %2164 }
 0x352   :  { %v2835_v60 = vsel %vm2834_vm3, %v2601_v44, %v2833_v50  ;;  %v2604_v23 = vadd.f32 %v2603_v25, %v2602_v59  ;;  %v2520_v20 = vmul.f32 %v2165_v63, %v4200_v42  ;;  %v2523_v42 = vmul.f32 %v2184_v47, %v4240_v57 }
 0x353   :  { %v2171_v14 = vpop.permute.xlu1 %2170 }
 0x354   :  { %v2605_v7 = vrot.slane %v2604_v23, 2  ;;  %v2521_v4 = vmul.f32 %v2171_v14, %v4228_v35 }
 0x356   :  { %v2606_v2 = vadd.f32 %v2605_v7, %v2604_v23  ;;  %v2609_v26 = vadd.f32 %v2521_v4, %v2520_v20  ;;  %v5210_v20 = vld [vmem:[#allocation36_spill] sm:$0xff]  ;;  %v2380_v4 = vperm.slane %v4617_v49, 6 }
 0x357   :  { %2281 = vperm.xlu2 %3473, %v5205_v53   ;;  %v5211_v53 = vld [vmem:[#allocation38_spill] sm:$0xff] }
 0x358   :  { %v2607_v41 = vrot.slane %v2606_v2, 1  ;;  %v2610_v12 = vrot.slane %v2609_v26, 4 }
 0x359   :  { %2346 = vperm.xlu1 %3476, %v2341_v39   ;;  %v2178_v36 = vpop.permute.xlu2 %2177 }
 0x35a   :  { %v2608_v48 = vadd.f32 %v2607_v41, %v2606_v2  ;;  %v2611_v21 = vadd.f32 %v2610_v12, %v2609_v26  ;;  %v2522_v35 = vmul.f32 %v2178_v36, %v4218_v58  ;;  %v2217_v26 = vpop.permute.xlu0 %2216  ;;  %v5212_v36 = vld [vmem:[#allocation39_spill] sm:$0xff] }
 0x35b   :  { %v2528_v41 = vmul.f32 %v2217_v26, %v5211_v53  ;;  %v5217_v26 = vperm.slane %v4681_v32, 0 }
 0x35c   :  { %v2837_v0 = vsel %vm2836_vm4, %v2608_v48, %v2835_v60  ;;  %v2612_v13 = vrot.slane %v2611_v21, 2  ;;  %v2616_v61 = vadd.f32 %v2523_v42, %v2522_v35  ;;  %v5209_v60 = vld [vmem:[#allocation37_spill] sm:$0xff]  ;;  %v5213_v35 = vperm.slane %v4617_v49, 2 }
 0x35e   :  { %v2613_v15 = vadd.f32 %v2612_v13, %v2611_v21  ;;  %v2617_v2 = vrot.slane %v2616_v61, 4 }
 0x35f   :  { %3477 = vset.pattern.permute.xlu2 %v4047_v18 }
 0x360   :  { %v2614_v50 = vrot.slane %v2613_v15, 1  ;;  %v2618_v12 = vadd.f32 %v2617_v2, %v2616_v61  ;;  %v5215_v61 = vld [vmem:[#allocation42_spill] sm:$0xff] }
 0x361   :  { %3483 = vset.pattern.permute.xlu1 %v4047_v18 }
 0x362   :  { %v2615_v9 = vadd.f32 %v2614_v50, %v2613_v15 }
 0x363   :  { %v2191_v57 = vpop.permute.xlu1 %2190 }
 0x364   :  { %v4821_v62 = vsel %vm2838_vm5, %v2615_v9, %v2837_v0  ;;  %v2524_v56 = vmul.f32 %v2191_v57, %v5207_v28  ;;  %v2619_v0 = vrot.slane %v2618_v12, 2  ;;  %v5214_v57 = vld [vmem:[#allocation40_spill] sm:$0xff] }
 0x366   :  { %v2620_v28 = vadd.f32 %v2619_v0, %v2618_v12 }
 0x367   :  { %2313 = vperm.xlu2 %3477, %v2302_v43  }
 0x369   :  { %2378 = vperm.xlu1 %3483, %v5206_v38   ;;  %v2197_v58 = vpop.permute.xlu2 %2196 }
 0x36a   :  { %v2525_v59 = vmul.f32 %v2197_v58, %v5208_v3 }
 0x36b   :  { %v2204_v25 = vpop.permute.xlu1 %2203 }
 0x36c   :  { %v2623_v44 = vadd.f32 %v2525_v59, %v2524_v56  ;;  %v2526_v23 = vmul.f32 %v2204_v25, %v5209_v60  ;;  %v2249_v59 = vpop.permute.xlu0 %2248 }
 0x36e   :  { %v2624_v2 = vrot.slane %v2623_v44, 4 }
 0x36f   :  { %2326 = vperm.xlu2 %3477, %v2315_v37  }
 0x371   :  { %3484 = vset.pattern.permute.xlu1 %v4043_v17  ;;  %v2210_v63 = vpop.permute.xlu2 %2209 }
 0x372   :  { %v2527_v14 = vmul.f32 %v2210_v63, %v5210_v20 }
 0x374   :  { %v2630_v7 = vadd.f32 %v2527_v14, %v2526_v23  ;;  %v2621_v23 = vrot.slane %v2620_v28, 1 }
 0x376   :  { %v2631_v43 = vrot.slane %v2630_v7, 4 }
 0x377   :  { %3478 = vset.pattern.permute.xlu2 %v4043_v17 }
 0x378   :  { %v2632_v47 = vadd.f32 %v2631_v43, %v2630_v7  ;;  %v5216_v7 = vld [vmem:[#allocation43_spill] sm:$0xff] }
 0x379   :  { %2385 = vperm.xlu1 %3484, %v2380_v4   ;;  %v2533_v43 = vmul.f32 %v2249_v59, %v5216_v7 }
 0x37a   :  { %v2633_v48 = vrot.slane %v2632_v47, 2 }
 0x37b   :  { %v2223_v37 = vpop.permute.xlu1 %2222 }
 0x37c   :  { %v2529_v42 = vmul.f32 %v2223_v37, %v5212_v36  ;;  %v2634_v50 = vadd.f32 %v2633_v48, %v2632_v47  ;;  %v4845_v37 = vpop.f32.mrf.mxu1  ;;  %v5218_v36 = vld [vmem:[#allocation41_spill] sm:$0xff]  ;;  %v2622_v48 = vadd.f32 %v2621_v23, %v2620_v28 }
 0x37d   :  { %v5220_v23 = vld [vmem:[#allocation45_spill] sm:$0xff] }
 0x37e   :  { %v2637_v21 = vadd.f32 %v2529_v42, %v2528_v41  ;;  %v2635_v25 = vrot.slane %v2634_v50, 1  ;;  %v2841_v28 = vsel %vm2840_vm6, %v2622_v48, %v4821_v62 }
 0x37f   :  { %2333 = vperm.xlu2 %3478, %v5213_v35  }
 0x380   :  { %v2638_v13 = vrot.slane %v2637_v21, 4  ;;  %v2636_v53 = vadd.f32 %v2635_v25, %v2634_v50  ;;  %v2419_v50 = vperm.slane %v4681_v32, 1 }
 0x381   :  { %3487 = vset.pattern.permute.xlu1 %v4047_v18  ;;  %v2230_v15 = vpop.permute.xlu2 %2229 }
 0x382   :  { %v2639_v9 = vadd.f32 %v2638_v13, %v2637_v21  ;;  %v2530_v38 = vmul.f32 %v2230_v15, %v5214_v57  ;;  %v2889_v13 = vsub.f32 0.0, %v4845_v37  ;;  %v2625_v15 = vadd.f32 %v2624_v2, %v2623_v44 }
 0x383   :  { %v2236_v58 = vpop.permute.xlu1 %2235 }
 0x384   :  { %v2640_v56 = vrot.slane %v2639_v9, 2  ;;  %v2531_v3 = vmul.f32 %v2236_v58, %v5215_v61  ;;  %v2893_v61 = vmul.f32 1.442695, %v2889_v13  ;;  %v3394_v13 = vld [vmem:[#allocation22 + $0x30] sm:$0xff] }
 0x386   :  { %v2641_v63 = vadd.f32 %v2640_v56, %v2639_v9  ;;  %v2644_v60 = vadd.f32 %v2531_v3, %v2530_v38  ;;  %v2626_v3 = vrot.slane %v2625_v15, 2  ;;  %3664 = vpow2.f32 %v2893_v61 }
 0x387   :  { %3480 = vset.pattern.permute.xlu2 %v4047_v18  ;;  %v2432_v61 = vperm.slane %v4681_v32, 2 }
 0x388   :  { %v2642_v20 = vrot.slane %v2641_v63, 1  ;;  %v2645_v14 = vrot.slane %v2644_v60, 4  ;;  %v2627_v2 = vadd.f32 %v2626_v3, %v2625_v15 }
 0x389   :  { %2417 = vperm.xlu1 %3487, %v5217_v26   ;;  %v2243_v47 = vpop.permute.xlu2 %2242 }
 0x38a   :  { %v2643_v41 = vadd.f32 %v2642_v20, %v2641_v63  ;;  %v2646_v12 = vadd.f32 %v2645_v14, %v2644_v60  ;;  %v2532_v42 = vmul.f32 %v2243_v47, %v5218_v36  ;;  %v5219_v63 = vld [vmem:[#allocation46_spill] sm:$0xff]  ;;  %v4859_v20 = vpop.f32.mrf.mxu1  ;;  %v2628_v36 = vrot.slane %v2627_v2, 1 }
 0x38b   :  { %v2262_v38 = vpop.permute.xlu1 %2261  ;;  %v2890_v14 = vsub.f32 0.0, %v4859_v20 }
 0x38c   :  { %v2844_v21 = vsel %vm2830_vm1, %v2643_v41, %v2636_v53  ;;  %v2647_v35 = vrot.slane %v2646_v12, 2  ;;  %v2651_v0 = vadd.f32 %v2533_v43, %v2532_v42  ;;  %v2535_v60 = vmul.f32 %v2262_v38, %v5219_v63 }
 0x38d   :  { %v2895_v26 = vmul.f32 1.442695, %v2890_v14 }
 0x38e   :  { %v2648_v9 = vadd.f32 %v2647_v35, %v2646_v12  ;;  %v2652_v57 = vrot.slane %v2651_v0, 4  ;;  %v3395_v35 = vld [vmem:[#allocation22 + $0x38] sm:$0xff] }
 0x38f   :  { %2352 = vperm.xlu2 %3480, %v2341_v39   ;;  %3666 = vpow2.f32 %v2895_v26  ;;  %3039 = vmatpush.bf16.msrb.mxu0 %v3395_v35 }
 0x390   :  { %v2649_v58 = vrot.slane %v2648_v9, 1  ;;  %v2653_v56 = vadd.f32 %v2652_v57, %v2651_v0  ;;  %3396 = vmatpush.bf16.msrb.mxu1 %v3395_v35 }
 0x391   :  { %2430 = vperm.xlu1 %3487, %v2419_v50   ;;  %v2256_v44 = vpop.permute.xlu2 %2255 }
 0x392   :  { %v2650_v59 = vadd.f32 %v2649_v58, %v2648_v9  ;;  %v2654_v25 = vrot.slane %v2653_v56, 2  ;;  %v2534_v39 = vmul.f32 %v2256_v44, %v5220_v23  ;;  %v2629_v9 = vadd.f32 %v2628_v36, %v2627_v2  ;;  %v2288_v44 = vpop.permute.xlu0 %2287 }
 0x393   :  { %3040 = vmatpush.bf16.msrb.mxu0 %v3394_v13 }
 0x394   :  { %v2845_v7 = vsel %vm2832_vm2, %v2650_v59, %v2844_v21  ;;  %v2655_v43 = vadd.f32 %v2654_v25, %v2653_v56  ;;  %v2658_v62 = vadd.f32 %v2535_v60, %v2534_v39  ;;  %v3665_v21 = vpop.eup %3664  ;;  %v5221_v56 = vperm.slane %v4617_v49, 4  ;;  %v3393_v25 = vld [vmem:[#allocation22 + $0x28] sm:$0xff]  ;;  %3397 = vmatpush.bf16.msrb.mxu1 %v3394_v13 }
 0x395   :  { %v3667_v15 = vpop.eup %3666  ;;  %v4866_v57 = vadd.f32 1.0, %v3665_v21  ;;  %v4876_v60 = vsel %vm2842_vm7, %v2629_v9, %v2841_v28  ;;  %v5222_v39 = vld [vmem:[#allocation47_spill] sm:$0xff] }
 0x396   :  { %v2656_v47 = vrot.slane %v2655_v43, 1  ;;  %v2659_v53 = vrot.slane %v2658_v62, 4  ;;  %v4871_v3 = vadd.f32 1.0, %v3667_v15 }
 0x397   :  { %3481 = vset.pattern.permute.xlu2 %v4043_v17  ;;  %3668 = vrcp.f32 %v4866_v57  ;;  %3041 = vmatpush.bf16.msrb.mxu0 %v3393_v25  ;;  %vm2910_vm8 = vweird.f32 %v4866_v57 }
 0x398   :  { %v2657_v41 = vadd.f32 %v2656_v47, %v2655_v43  ;;  %v2660_v12 = vadd.f32 %v2659_v53, %v2658_v62  ;;  %3670 = vrcp.f32 %v4871_v3  ;;  %v3392_v62 = vld [vmem:[#allocation22 + $0x20] sm:$0xff]  ;;  %3398 = vmatpush.bf16.msrb.mxu1 %v3393_v25  ;;  %v3391_v53 = vld [vmem:[#allocation22 + $0x18] sm:$0xff]  ;;  %vm2925_vm10 = vweird.f32 %v4871_v3 }
 0x399   :  { %3488 = vset.pattern.permute.xlu1 %v4043_v17 }
 0x39a   :  { %v2846_v42 = vsel %vm2834_vm3, %v2657_v41, %v2845_v7  ;;  %v2661_v48 = vrot.slane %v2660_v12, 2  ;;  %v2295_v28 = vpop.permute.xlu0 %2294 }
 0x39b   :  { %v2269_v58 = vpop.permute.xlu1 %2268  ;;  %3042 = vmatpush.bf16.msrb.mxu0 %v3392_v62 }
 0x39c   :  { %v2662_v0 = vadd.f32 %v2661_v48, %v2660_v12  ;;  %v2536_v14 = vmul.f32 %v2269_v58, %v5222_v39  ;;  %3399 = vmatpush.bf16.msrb.mxu1 %v3392_v62  ;;  %v2540_v12 = vmul.f32 %v2295_v28, %v4546_v33 }
 0x39d   :  { %v4884_v26 = vpop.eup %3668 }
 0x39e   :  { %v2663_v38 = vrot.slane %v2662_v0, 1  ;;  %v4886_v41 = vpop.eup %3670  ;;  %v2906_v36 = vmul.f32 %v4884_v26, %v4866_v57  ;;  %vm2911_vm9 = vweird.f32 %v4884_v26 }
 0x39f   :  { %2359 = vperm.xlu2 %3481, %v5221_v56   ;;  %v2921_v35 = vmul.f32 %v4886_v41, %v4871_v3  ;;  %3043 = vmatpush.bf16.msrb.mxu0 %v3391_v53  ;;  %v3389_v56 = vld [vmem:[#allocation22 + $0x8] sm:$0xff]  ;;  %vm2926_vm11 = vweird.f32 %v4886_v41  ;;  %vm4913_vm12 = vmor %vm2910_vm8, %vm2911_vm9 }
 0x3a0   :  { %v2664_v59 = vadd.f32 %v2663_v38, %v2662_v0  ;;  %v3390_v0 = vld [vmem:[#allocation22 + $0x10] sm:$0xff]  ;;  %3400 = vmatpush.bf16.msrb.mxu1 %v3391_v53  ;;  %v2907_v9 = vsub.f32 1.0, %v2906_v36  ;;  %v2929_v53 = vand.u32 2147483647, %v4871_v3  ;;  %vm4919_vm13 = vmor %vm2925_vm10, %vm2926_vm11 }
 0x3a1   :  { %2437 = vperm.xlu1 %3488, %v2432_v61   ;;  %v2275_v63 = vpop.permute.xlu2 %2274  ;;  %v2922_v38 = vsub.f32 1.0, %v2921_v35 }
 0x3a2   :  { %v2847_v23 = vsel %vm2836_vm4, %v2664_v59, %v2846_v42  ;;  %v2537_v7 = vmul.f32 %v2275_v63, %v4459_v45  ;;  %v5223_v59 = vperm.slane %v4681_v32, 3  ;;  %v2908_v49 = vmul.f32 %v4884_v26, %v2907_v9  ;;  %v4934_v9 = vld [vmem:[%s5093_s7] ss:$0 sm:$0xff] }
 0x3a3   :  { %3044 = vmatpush.bf16.msrb.mxu0 %v3390_v0  ;;  %vm2930_vm15 = vcmp.eq.f32.partialorder %v2929_v53, 8.507059e+37  ;;  %v5232_v53 = vld [vmem:[#allocation49_spill] sm:$0xff] }
 0x3a4   :  { %v2665_v43 = vadd.f32 %v2537_v7, %v2536_v14  ;;  %3401 = vmatpush.bf16.msrb.mxu1 %v3390_v0 }
 0x3a6   :  { %v2666_v2 = vrot.slane %v2665_v43, 4 }
 0x3a7   :  { %3485 = vset.pattern.permute.xlu2 %v4047_v18  ;;  %3045 = vmatpush.bf16.msrb.mxu0 %v3389_v56 }
 0x3a8   :  { %v2667_v47 = vadd.f32 %v2666_v2, %v2665_v43  ;;  %v3388_v43 = vld [vmem:[#allocation22] sm:$0xff]  ;;  %3402 = vmatpush.bf16.msrb.mxu1 %v3389_v56  ;;  %v2931_v2 = vand.u32 2147483648, %v4871_v3 }
 0x3a9   :  { %3490 = vset.pattern.permute.xlu1 %v4047_v18 }
 0x3aa   :  { %v2668_v45 = vrot.slane %v2667_v47, 2  ;;  %v2932_v35 = vor.u32 1.1754944e-38, %v2931_v2 }
 0x3ab   :  { %v2301_v42 = vpop.permute.xlu1 %2300  ;;  %3046 = vmatpush.bf16.msrb.mxu0 %v3388_v43 }
 0x3ac   :  { %v2669_v48 = vadd.f32 %v2668_v45, %v2667_v47  ;;  %v2541_v21 = vmul.f32 %v2301_v42, %v4563_v11  ;;  %v2539_v11 = vmul.f32 %v2288_v44, %v4533_v10  ;;  %v2916_v10 = vand.u32 2147483648, %v4866_v57  ;;  %3403 = vmatpush.bf16.msrb.mxu1 %v3388_v43 }
 0x3ad   :  { %v2909_v44 = vadd.f32 %v4884_v26, %v2908_v49 }
 0x3ae   :  { %v2670_v13 = vrot.slane %v2669_v48, 1  ;;  %v2679_v15 = vadd.f32 %v2541_v21, %v2540_v12  ;;  %v2917_v36 = vor.u32 1.1754944e-38, %v2916_v10  ;;  %v5231_v10 = vld [vmem:[#allocation48_spill] sm:$0xff] }
 0x3af   :  { %2391 = vperm.xlu2 %3485, %v2380_v4   ;;  %v2923_v4 = vmul.f32 %v4886_v41, %v2922_v38  ;;  %v4936_v38 = vld [vmem:[#allocation7 + $0x10] sm:$0xff] }
 0x3b0   :  { %v2671_v33 = vadd.f32 %v2670_v13, %v2669_v48  ;;  %v2680_v58 = vrot.slane %v2679_v15, 4  ;;  %v2913_v48 = vsel %vm4913_vm12, %v4884_v26, %v2909_v44  ;;  %v5228_v13 = vld [vmem:[#allocation44_spill] sm:$0xff]  ;;  %v2393_v26 = vperm.slane %v4936_v38, 7 }
 0x3b1   :  { %2456 = vperm.xlu1 %3490, %v5223_v59   ;;  %v2282_v25 = vpop.permute.xlu2 %2281  ;;  %v2924_v47 = vadd.f32 %v4886_v41, %v2923_v4 }
 0x3b2   :  { %v2848_v63 = vsel %vm2838_vm5, %v2671_v33, %v2847_v23  ;;  %v2681_v39 = vadd.f32 %v2680_v58, %v2679_v15  ;;  %v2538_v14 = vmul.f32 %v2282_v25, %v4410_v52  ;;  %v2914_v23 = vand.u32 2147483647, %v4866_v57 }
 0x3b3   :  { %v2928_v3 = vsel %vm4919_vm13, %v4886_v41, %v2924_v47  ;;  %v2458_v41 = vperm.slane %v4681_v32, 4 }
 0x3b4   :  { %v2672_v7 = vadd.f32 %v2539_v11, %v2538_v14  ;;  %v2682_v62 = vrot.slane %v2681_v39, 2  ;;  %vm2915_vm14 = vcmp.eq.f32.partialorder %v2914_v23, 8.507059e+37  ;;  %v2933_v59 = vsel %vm2930_vm15, %v2932_v35, %v2928_v3  ;;  %v5229_v11 = vld [vmem:[#allocation30_spill] sm:$0xff] }
 0x3b5   :  { %v2918_v58 = vsel %vm2915_vm14, %v2917_v36, %v2913_v48 }
 0x3b6   :  { %v2673_v52 = vrot.slane %v2672_v7, 4  ;;  %v2683_v57 = vadd.f32 %v2682_v62, %v2681_v39  ;;  %v2881_v39 = vmul.f32 %v4934_v9, %v5229_v11  ;;  %v2965_v14 = vmul.f32 %v2918_v58, %v4845_v37 }
 0x3b7   :  { %3486 = vset.pattern.permute.xlu2 %v4043_v17  ;;  %v2966_v62 = vmul.f32 %v2933_v59, %v4859_v20  ;;  %v2471_v58 = vperm.slane %v4681_v32, 5 }
 0x3b8   :  { %v2674_v45 = vadd.f32 %v2673_v52, %v2672_v7  ;;  %v2684_v33 = vrot.slane %v2683_v57, 1  ;;  %v5230_v7 = vld [vmem:[#allocation31_spill] sm:$0xff]  ;;  %v2885_v23 = vadd.f32 %v2881_v39, %v4876_v60  ;;  %v5233_v60 = vld [vmem:[#allocation50_spill] sm:$0xff] }
 0x3b9   :  { %3491 = vset.pattern.permute.xlu1 %v4043_v17  ;;  %v2882_v43 = vmul.f32 %v4934_v9, %v5230_v7 }
 0x3ba   :  { %v2675_v42 = vrot.slane %v2674_v45, 2  ;;  %v2685_v49 = vadd.f32 %v2684_v33, %v2683_v57  ;;  %v2969_v57 = vmul.f32 %v2965_v14, %v2885_v23 }
 0x3bb   :  { %v2308_v21 = vpop.permute.xlu1 %2307 }
 0x3bc   :  { %v2676_v0 = vadd.f32 %v2675_v42, %v2674_v45  ;;  %v2542_v15 = vmul.f32 %v2308_v21, %v5228_v13  ;;  %v2340_v42 = vpop.permute.xlu0 %2339  ;;  %v5234_v13 = vld [vmem:[#allocation53_spill] sm:$0xff] }
 0x3be   :  { %v2677_v56 = vrot.slane %v2676_v0, 1 }
 0x3bf   :  { %2398 = vperm.xlu2 %3486, %v2393_v26  }
 0x3c0   :  { %v2678_v25 = vadd.f32 %v2677_v56, %v2676_v0 }
 0x3c1   :  { %2463 = vperm.xlu1 %3491, %v2458_v41   ;;  %v2314_v4 = vpop.permute.xlu2 %2313 }
 0x3c2   :  { %v2543_v52 = vmul.f32 %v2314_v4, %v5231_v10  ;;  %v2849_v44 = vsel %vm2840_vm6, %v2678_v25, %v2848_v63 }
 0x3c3   :  { %v2321_v2 = vpop.permute.xlu1 %2320  ;;  %v2850_v28 = vsel %vm2842_vm7, %v2685_v49, %v2849_v44  ;;  %v5236_v44 = vld [vmem:[#allocation52_spill] sm:$0xff] }
 0x3c4   :  { %v2686_v47 = vadd.f32 %v2543_v52, %v2542_v15  ;;  %v2544_v37 = vmul.f32 %v2321_v2, %v5232_v53  ;;  %v2886_v45 = vadd.f32 %v2882_v43, %v2850_v28  ;;  %v2366_v59 = vpop.permute.xlu0 %2365 }
 0x3c6   :  { %v2687_v12 = vrot.slane %v2686_v47, 4  ;;  %v2970_v36 = vmul.f32 %v2966_v62, %v2886_v45  ;;  %v5235_v62 = vld [vmem:[#allocation51_spill] sm:$0xff]  ;;  %v2484_v45 = vperm.slane %v4681_v32, 6 }
 0x3c7   :  { %2424 = vperm.xlu2 %3486, %v2419_v50   ;;  %v2547_v10 = vmul.f32 %v2340_v42, %v5235_v62 }
 0x3c8   :  { %v2688_v20 = vadd.f32 %v2687_v12, %v2686_v47  ;;  %v2973_v48 = vpack.c.bf16 %v2970_v36, %v2969_v57 }
 0x3c9   :  { %3493 = vset.pattern.permute.xlu1 %v4047_v18  ;;  %v2327_v63 = vpop.permute.xlu2 %2326 }
 0x3ca   :  { %v2545_v35 = vmul.f32 %v2327_v63, %v5233_v60  ;;  %3047 = vmatmul.bf16.vlgmr.msrb.gmra.mxu0 %v2973_v48  ;;  %v2689_v3 = vrot.slane %v2688_v20, 2 }
 0x3cb   :  { %v2347_v21 = vpop.permute.xlu1 %2346 }
 0x3cc   :  { %v2693_v0 = vadd.f32 %v2545_v35, %v2544_v37  ;;  %v2548_v15 = vmul.f32 %v2347_v21, %v5234_v13  ;;  %v2690_v56 = vadd.f32 %v2689_v3, %v2688_v20  ;;  %v2373_v7 = vpop.permute.xlu0 %2372 }
 0x3cd   :  { %v2552_v28 = vmul.f32 %v2373_v7, %v4586_v8 }
 0x3ce   :  { %v2694_v33 = vrot.slane %v2693_v0, 4  ;;  %v2691_v11 = vrot.slane %v2690_v56, 1 }
 0x3cf   :  { %3489 = vset.pattern.permute.xlu2 %v4047_v18 }
 0x3d0   :  { %v2695_v50 = vadd.f32 %v2694_v33, %v2693_v0  ;;  %v2692_v49 = vadd.f32 %v2691_v11, %v2690_v56 }
 0x3d1   :  { %2482 = vperm.xlu1 %3493, %v2471_v58  }
 0x3d2   :  { %v2696_v25 = vrot.slane %v2695_v50, 2 }
 0x3d4   :  { %v2697_v39 = vadd.f32 %v2696_v25, %v2695_v50  ;;  %v2412_v33 = vpop.permute.xlu0 %2411  ;;  %v2551_v50 = vmul.f32 %v2366_v59, %v4589_v46 }
 0x3d5   :  { %v2558_v25 = vmul.f32 %v2412_v33, %v4657_v30 }
 0x3d6   :  { %v2698_v14 = vrot.slane %v2697_v39, 1 }
 0x3d7   :  { %2443 = vperm.xlu2 %3489, %v2432_v61  }
 0x3d8   :  { %v2699_v4 = vadd.f32 %v2698_v14, %v2697_v39 }
 0x3d9   :  { %3494 = vset.pattern.permute.xlu1 %v4043_v17  ;;  %v2334_v43 = vpop.permute.xlu2 %2333 }
 0x3da   :  { %v2851_v52 = vsel %vm2830_vm1, %v2699_v4, %v2692_v49  ;;  %v2546_v23 = vmul.f32 %v2334_v43, %v5236_v44 }
 0x3db   :  { %v2379_v2 = vpop.permute.xlu1 %2378 }
 0x3dc   :  { %v2700_v47 = vadd.f32 %v2547_v10, %v2546_v23  ;;  %v2553_v53 = vmul.f32 %v2379_v2, %v4606_v40  ;;  %v2451_v2 = vpop.permute.xlu0 %2450 }
 0x3de   :  { %v2701_v37 = vrot.slane %v2700_v47, 4  ;;  %v2721_v61 = vadd.f32 %v2553_v53, %v2552_v28  ;;  %v5238_v53 = vld [vmem:[#allocation57_spill] sm:$0xff] }
 0x3df   :  { %2469 = vperm.xlu2 %3489, %v2458_v41  }
 0x3e0   :  { %v2702_v12 = vadd.f32 %v2701_v37, %v2700_v47  ;;  %v2722_v44 = vrot.slane %v2721_v61, 4  ;;  %v5239_v37 = vld [vmem:[#allocation56_spill] sm:$0xff] }
 0x3e1   :  { %2489 = vperm.xlu1 %3494, %v2484_v45  }
 0x3e2   :  { %v2703_v57 = vrot.slane %v2702_v12, 2 }
 0x3e4   :  { %v2704_v36 = vadd.f32 %v2703_v57, %v2702_v12 }
 0x3e6   :  { %v2705_v42 = vrot.slane %v2704_v36, 1 }
 0x3e7   :  { %3492 = vset.pattern.permute.xlu2 %v4043_v17 }
 0x3e8   :  { %v2706_v20 = vadd.f32 %v2705_v42, %v2704_v36 }
 0x3e9   :  { %3495 = vset.pattern.permute.xlu1 %v4047_v18  ;;  %v2353_v48 = vpop.permute.xlu2 %2352 }
 0x3ea   :  { %v2852_v8 = vsel %vm2832_vm2, %v2706_v20, %v2851_v52  ;;  %v2549_v40 = vmul.f32 %v2353_v48, %v4566_v51 }
 0x3eb   :  { %v2386_v21 = vpop.permute.xlu1 %2385 }
 0x3ec   :  { %v2707_v63 = vadd.f32 %v2549_v40, %v2548_v15  ;;  %v2554_v7 = vmul.f32 %v2386_v21, %v4623_v24 }
 0x3ee   :  { %v2708_v60 = vrot.slane %v2707_v63, 4 }
 0x3ef   :  { %2476 = vperm.xlu2 %3492, %v2471_v58  }
 0x3f0   :  { %v2709_v41 = vadd.f32 %v2708_v60, %v2707_v63 }
 0x3f1   :  { %2404 = vperm.xlu1 %3495, %v2393_v26  }
 0x3f2   :  { %v2710_v35 = vrot.slane %v2709_v41, 2 }
 0x3f4   :  { %v2711_v3 = vadd.f32 %v2710_v35, %v2709_v41 }
 0x3f6   :  { %v2712_v0 = vrot.slane %v2711_v3, 1 }
 0x3f7   :  { %3496 = vset.pattern.permute.xlu2 %v4047_v18 }
 0x3f8   :  { %v2713_v13 = vadd.f32 %v2712_v0, %v2711_v3 }
 0x3f9   :  { %v2360_v56 = vpop.permute.xlu2 %2359 }
 0x3fa   :  { %v2853_v51 = vsel %vm2834_vm3, %v2713_v13, %v2852_v8  ;;  %v2550_v15 = vmul.f32 %v2360_v56, %v4569_v34 }
 0x3fb   :  { %v2418_v58 = vpop.permute.xlu1 %2417 }
 0x3fc   :  { %v2714_v38 = vadd.f32 %v2551_v50, %v2550_v15  ;;  %v2559_v26 = vmul.f32 %v2418_v58, %v4668_v54  ;;  %v5237_v54 = vperm.slane %v4681_v32, 7 }
 0x3fe   :  { %v2715_v11 = vrot.slane %v2714_v38, 4  ;;  %v2742_v39 = vadd.f32 %v2559_v26, %v2558_v25 }
 0x3ff   :  { %2495 = vperm.xlu2 %3496, %v2484_v45  }
 0x400   :  { %v2716_v14 = vadd.f32 %v2715_v11, %v2714_v38  ;;  %v2743_v23 = vrot.slane %v2742_v39, 4  ;;  %v5241_v38 = vld [vmem:[#allocation58_spill] sm:$0xff] }
 0x402   :  { %v2717_v18 = vrot.slane %v2716_v14, 2  ;;  %v2744_v28 = vadd.f32 %v2743_v23, %v2742_v39 }
 0x403   :  { %v2431_v62 = vpop.permute.xlu1 %2430 }
 0x404   :  { %v2718_v49 = vadd.f32 %v2717_v18, %v2716_v14  ;;  %v2561_v24 = vmul.f32 %v2431_v62, %v5238_v53  ;;  %v2745_v32 = vrot.slane %v2744_v28, 2 }
 0x406   :  { %v2719_v4 = vrot.slane %v2718_v49, 1  ;;  %v2746_v40 = vadd.f32 %v2745_v32, %v2744_v28 }
 0x407   :  { %3497 = vset.pattern.permute.xlu2 %v4043_v17  ;;  %v2723_v17 = vadd.f32 %v2722_v44, %v2721_v61 }
 0x408   :  { %v2720_v46 = vadd.f32 %v2719_v4, %v2718_v49  ;;  %v2747_v35 = vrot.slane %v2746_v40, 1 }
 0x409   :  { %v2392_v59 = vpop.permute.xlu2 %2391  ;;  %v2724_v57 = vrot.slane %v2723_v17, 2 }
 0x40a   :  { %v2854_v34 = vsel %vm2836_vm4, %v2720_v46, %v2853_v51  ;;  %v2555_v30 = vmul.f32 %v2392_v59, %v4627_v27  ;;  %v2564_v27 = vmul.f32 %v2451_v2, %v4755_v1  ;;  %v2748_v33 = vadd.f32 %v2747_v35, %v2746_v40 }
 0x40b   :  { %v2725_v8 = vadd.f32 %v2724_v57, %v2723_v17 }
 0x40c   :  { %v2728_v43 = vadd.f32 %v2555_v30, %v2554_v7 }
 0x40d   :  { %v2726_v41 = vrot.slane %v2725_v8, 1 }
 0x40e   :  { %v2729_v63 = vrot.slane %v2728_v43, 4 }
 0x40f   :  { %2502 = vperm.xlu2 %3497, %v5237_v54   ;;  %v2727_v1 = vadd.f32 %v2726_v41, %v2725_v8 }
 0x410   :  { %v2730_v21 = vadd.f32 %v2729_v63, %v2728_v43  ;;  %v4997_v43 = vpop.f32.mrf.mxu1 }
 0x411   :  { %v2855_v11 = vsel %vm2838_vm5, %v2727_v1, %v2854_v34 }
 0x412   :  { %v2731_v56 = vrot.slane %v2730_v21, 2 }
 0x413   :  { %v2438_v52 = vpop.permute.xlu1 %2437 }
 0x414   :  { %v2732_v39 = vadd.f32 %v2731_v56, %v2730_v21 }
 0x416   :  { %v2733_v46 = vrot.slane %v2732_v39, 1 }
 0x418   :  { %v2734_v23 = vadd.f32 %v2733_v46, %v2732_v39 }
 0x419   :  { %v4987_v10 = vpop.permute.xlu2 %2398 }
 0x421   :  { %v2425_v47 = vpop.permute.xlu2 %2424 }
 0x422   :  { %v2560_v45 = vmul.f32 %v2425_v47, %v5239_v37  ;;  %v5002_v37 = vsel %vm2840_vm6, %v2734_v23, %v2855_v11 }
 0x423   :  { %v2457_v12 = vpop.permute.xlu1 %2456 }
 0x424   :  { %v2749_v36 = vadd.f32 %v2561_v24, %v2560_v45  ;;  %v2565_v42 = vmul.f32 %v2457_v12, %v4714_v29  ;;  %v5240_v29 = vld [vmem:[#allocation60_spill] sm:$0xff] }
 0x425   :  { %v2562_v58 = vmul.f32 %v2438_v52, %v5240_v29  ;;  %v5242_v52 = vld [vmem:[#allocation59_spill] sm:$0xff] }
 0x426   :  { %v2750_v20 = vrot.slane %v2749_v36, 4  ;;  %v2763_v48 = vadd.f32 %v2565_v42, %v2564_v27 }
 0x428   :  { %v2751_v61 = vadd.f32 %v2750_v20, %v2749_v36  ;;  %v2764_v0 = vrot.slane %v2763_v48, 4  ;;  %v2891_v36 = vsub.f32 0.0, %v4997_v43 }
 0x42a   :  { %v2752_v60 = vrot.slane %v2751_v61, 2  ;;  %v2765_v51 = vadd.f32 %v2764_v0, %v2763_v48 }
 0x42c   :  { %v2753_v3 = vadd.f32 %v2752_v60, %v2751_v61  ;;  %v2766_v18 = vrot.slane %v2765_v51, 2  ;;  %v2897_v61 = vmul.f32 1.442695, %v2891_v36 }
 0x42e   :  { %v2754_v13 = vrot.slane %v2753_v3, 1  ;;  %v2767_v7 = vadd.f32 %v2766_v18, %v2765_v51  ;;  %3672 = vpow2.f32 %v2897_v61 }
 0x430   :  { %v2755_v50 = vadd.f32 %v2754_v13, %v2753_v3  ;;  %v2768_v34 = vrot.slane %v2767_v7, 1 }
 0x431   :  { %v2444_v15 = vpop.permute.xlu2 %2443 }
 0x432   :  { %v2858_v25 = vsel %vm2830_vm1, %v2755_v50, %v2748_v33  ;;  %v2563_v26 = vmul.f32 %v2444_v15, %v5241_v38  ;;  %v2769_v45 = vadd.f32 %v2768_v34, %v2767_v7  ;;  %v2509_v34 = vpop.permute.xlu0 %2508 }
 0x433   :  { %v2464_v4 = vpop.permute.xlu1 %2463 }
 0x434   :  { %v2756_v14 = vadd.f32 %v2563_v26, %v2562_v58  ;;  %v2566_v62 = vmul.f32 %v2464_v4, %v4766_v5  ;;  %v5006_v5 = vpop.f32.mrf.mxu1  ;;  %v3673_v50 = vpop.eup %3672 }
 0x435   :  { %v2892_v20 = vsub.f32 0.0, %v5006_v5  ;;  %v2903_v29 = vadd.f32 1.0, %v3673_v50 }
 0x436   :  { %v2757_v49 = vrot.slane %v2756_v14, 4 }
 0x437   :  { %v2899_v21 = vmul.f32 1.442695, %v2892_v20  ;;  %vm2940_vm0 = vweird.f32 %v2903_v29  ;;  %v2946_v61 = vand.u32 2147483648, %v2903_v29 }
 0x438   :  { %v2758_v59 = vadd.f32 %v2757_v49, %v2756_v14 }
 0x439   :  { %v2470_v30 = vpop.permute.xlu2 %2469  ;;  %3674 = vpow2.f32 %v2899_v21 }
 0x43a   :  { %v2759_v54 = vrot.slane %v2758_v59, 2  ;;  %v2567_v44 = vmul.f32 %v2470_v30, %v5242_v52  ;;  %3676 = vrcp.f32 %v2903_v29 }
 0x43c   :  { %v2760_v2 = vadd.f32 %v2759_v54, %v2758_v59  ;;  %v2770_v17 = vadd.f32 %v2567_v44, %v2566_v62  ;;  %v5243_v54 = vld [vmem:[#allocation55_spill] sm:$0xff]  ;;  %v5244_v44 = vld [vmem:[#allocation54_spill] sm:$0xff] }
 0x43d   :  { %v2556_v62 = vmul.f32 %v4987_v10, %v5243_v54 }
 0x43e   :  { %v2761_v28 = vrot.slane %v2760_v2, 1  ;;  %v2771_v47 = vrot.slane %v2770_v17, 4 }
 0x440   :  { %v2762_v53 = vadd.f32 %v2761_v28, %v2760_v2  ;;  %v2772_v24 = vadd.f32 %v2771_v47, %v2770_v17 }
 0x442   :  { %v2859_v27 = vsel %vm2832_vm2, %v2762_v53, %v2858_v25  ;;  %v2773_v12 = vrot.slane %v2772_v24, 2 }
 0x443   :  { %v2860_v57 = vsel %vm2834_vm3, %v2769_v45, %v2859_v27  ;;  %v2483_v48 = vpop.permute.xlu1 %2482  ;;  %v2573_v27 = vmul.f32 %v2509_v34, %v4798_v6 }
 0x444   :  { %v2774_v32 = vadd.f32 %v2773_v12, %v2772_v24  ;;  %v2569_v41 = vmul.f32 %v2483_v48, %v4742_v31  ;;  %v3675_v31 = vpop.eup %3674 }
 0x445   :  { %v5023_v25 = vadd.f32 1.0, %v3675_v31  ;;  %v3677_v46 = vpop.eup %3676 }
 0x446   :  { %v2775_v42 = vrot.slane %v2774_v32, 1  ;;  %v2936_v2 = vmul.f32 %v3677_v46, %v2903_v29  ;;  %vm2941_vm1 = vweird.f32 %v3677_v46 }
 0x447   :  { %v5010_v8 = vpop.f32.mrf.mxu0  ;;  %3678 = vrcp.f32 %v5023_v25  ;;  %vm2955_vm2 = vweird.f32 %v5023_v25  ;;  %v2961_v6 = vand.u32 2147483648, %v5023_v25 }
 0x448   :  { %v2776_v40 = vadd.f32 %v2775_v42, %v2774_v32  ;;  %3058 = vadd.xlane.f32.xlu1 %v5010_v8  ;;  %v3070_v0 = vmul.f32 %v5010_v8, %v5010_v8  ;;  %v2937_v53 = vsub.f32 1.0, %v2936_v2 }
 0x449   :  { %v2477_v63 = vpop.permute.xlu2 %2476  ;;  %v2962_v31 = vor.u32 1.1754944e-38, %v2961_v6 }
 0x44a   :  { %v2861_v60 = vsel %vm2836_vm4, %v2776_v40, %v2860_v57  ;;  %v2568_v35 = vmul.f32 %v2477_v63, %v4774_v22  ;;  %v2938_v42 = vmul.f32 %v3677_v46, %v2937_v53  ;;  %v2944_v63 = vand.u32 2147483647, %v2903_v29  ;;  %vm5038_vm4 = vmor %vm2940_vm0, %vm2941_vm1 }
 0x44c   :  { %v2777_v3 = vadd.f32 %v2569_v41, %v2568_v35 }
 0x44d   :  { %v3679_v59 = vpop.eup %3678 }
 0x44e   :  { %v2778_v13 = vrot.slane %v2777_v3, 4  ;;  %vm2956_vm3 = vweird.f32 %v3679_v59 }
 0x44f   :  { %v5018_v1 = vpop.f32.mrf.mxu0 }
 0x450   :  { %v2779_v33 = vadd.f32 %v2778_v13, %v2777_v3  ;;  %3074 = vadd.xlane.f32.xlu1 %v3070_v0  ;;  %3060 = vadd.xlane.f32.xlu2 %v5018_v1  ;;  %v3071_v22 = vmul.f32 %v5018_v1, %v5018_v1  ;;  %v2959_v3 = vand.u32 2147483647, %v5023_v25  ;;  %v5071_v0 = vld [vmem:[%s5096_s10] ss:$0 sm:$0xff] }
 0x452   :  { %v2780_v56 = vrot.slane %v2779_v33, 2  ;;  %vm2960_vm8 = vcmp.eq.f32.partialorder %v2959_v3, 8.507059e+37 }
 0x453   :  { %v2490_v58 = vpop.permute.xlu1 %2489 }
 0x454   :  { %v2781_v51 = vadd.f32 %v2780_v56, %v2779_v33  ;;  %v2570_v39 = vmul.f32 %v2490_v58, %v4782_v55  ;;  %v2951_v55 = vmul.f32 %v3679_v59, %v5023_v25  ;;  %v5249_v56 = vld [vmem:[#allocation32_spill] sm:$0xff] }
 0x455   :  { %v2883_v50 = vmul.f32 %v4934_v9, %v5249_v56  ;;  %v3691_v56 = vld [vmem:[#allocation13] sm:$0xff] }
 0x456   :  { %v2782_v15 = vrot.slane %v2781_v51, 1  ;;  %v2952_v24 = vsub.f32 1.0, %v2951_v55 }
 0x458   :  { %v2783_v38 = vadd.f32 %v2782_v15, %v2781_v51  ;;  %3076 = vadd.xlane.f32.xlu2 %v3071_v22  ;;  %v2953_v20 = vmul.f32 %v3679_v59, %v2952_v24  ;;  %v2947_v51 = vor.u32 1.1754944e-38, %v2946_v61 }
 0x459   :  { %v2496_v26 = vpop.permute.xlu2 %2495 }
 0x45a   :  { %v2862_v11 = vsel %vm2838_vm5, %v2783_v38, %v2861_v60  ;;  %v2571_v14 = vmul.f32 %v2496_v26, %v4750_v16  ;;  %v2954_v21 = vadd.f32 %v3679_v59, %v2953_v20  ;;  %vm5043_vm5 = vmor %vm2955_vm2, %vm2956_vm3 }
 0x45c   :  { %v2784_v18 = vadd.f32 %v2571_v14, %v2570_v39  ;;  %v2958_v58 = vsel %vm5043_vm5, %v3679_v59, %v2954_v21  ;;  %v5250_v14 = vld [vmem:[#allocation33_spill] sm:$0xff] }
 0x45e   :  { %v2785_v49 = vrot.slane %v2784_v18, 4 }
 0x460   :  { %v2786_v4 = vadd.f32 %v2785_v49, %v2784_v18  ;;  %v2884_v18 = vmul.f32 %v4934_v9, %v5250_v14 }
 0x462   :  { %v2787_v7 = vrot.slane %v2786_v4, 2 }
 0x463   :  { %v2405_v30 = vpop.permute.xlu1 %2404 }
 0x464   :  { %v2788_v52 = vadd.f32 %v2787_v7, %v2786_v4  ;;  %v2557_v23 = vmul.f32 %v2405_v30, %v5244_v44 }
 0x466   :  { %v2789_v16 = vrot.slane %v2788_v52, 1  ;;  %v2735_v17 = vadd.f32 %v2557_v23, %v2556_v62 }
 0x468   :  { %v2790_v28 = vadd.f32 %v2789_v16, %v2788_v52  ;;  %v2736_v47 = vrot.slane %v2735_v17, 4 }
 0x469   :  { %v2503_v45 = vpop.permute.xlu2 %2502 }
 0x46a   :  { %v2737_v12 = vadd.f32 %v2736_v47, %v2735_v17  ;;  %v2572_v57 = vmul.f32 %v2503_v45, %v4787_v19  ;;  %v2863_v10 = vsel %vm2840_vm6, %v2790_v28, %v2862_v11  ;;  %v2939_v19 = vadd.f32 %v3677_v46, %v2938_v42 }
 0x46b   :  { %vm2945_vm6 = vcmp.eq.f32.partialorder %v2944_v63, 8.507059e+37  ;;  %v2963_v11 = vsel %vm2960_vm8, %v2962_v31, %v2958_v58 }
 0x46c   :  { %v2738_v32 = vrot.slane %v2737_v12, 2  ;;  %v2791_v36 = vadd.f32 %v2573_v27, %v2572_v57  ;;  %v2943_v29 = vsel %vm5038_vm4, %v3677_v46, %v2939_v19 }
 0x46d   :  { %v2948_v26 = vsel %vm2945_vm6, %v2947_v51, %v2943_v29 }
 0x46e   :  { %v2739_v48 = vadd.f32 %v2738_v32, %v2737_v12  ;;  %v2792_v40 = vrot.slane %v2791_v36, 4  ;;  %v2967_v4 = vmul.f32 %v2948_v26, %v4997_v43 }
 0x470   :  { %v2740_v60 = vrot.slane %v2739_v48, 1  ;;  %v2793_v41 = vadd.f32 %v2792_v40, %v2791_v36 }
 0x472   :  { %v2741_v13 = vadd.f32 %v2740_v60, %v2739_v48  ;;  %v2794_v33 = vrot.slane %v2793_v41, 2  ;;  %v5064_v60 = vld [vmem:[%s5095_s9] ss:$0 sm:$0xff]  ;;  %s3885_s9 = smov [#allocation24]  }
 0x473   :  { %s3178_s10 = sshll.u32 %s3885_s9, 4  ;;  %s3179_s10 = int_to_ptr.vmem [resolvable:$true] %s3178_s10 }
 0x474   :  { %v2795_v15 = vadd.f32 %v2794_v33, %v2793_v41  ;;  %v2857_v22 = vsel %vm2842_vm7, %v2741_v13, %v5002_v37  ;;  %v2968_v37 = vmul.f32 %v2963_v11, %v5006_v5 }
 0x475   :  { %v2887_v25 = vadd.f32 %v2883_v50, %v2857_v22 }
 0x476   :  { %v2796_v38 = vrot.slane %v2795_v15, 1 }
 0x477   :  { %v2971_v46 = vmul.f32 %v2967_v4, %v2887_v25 }
 0x478   :  { %v2797_v39 = vadd.f32 %v2796_v38, %v2795_v15 }
 0x47a   :  { %v2864_v49 = vsel %vm2842_vm7, %v2797_v39, %v2863_v10 }
 0x47b   :  { %v2888_v7 = vadd.f32 %v2884_v18, %v2864_v49 }
 0x47d   :  { %v2972_v30 = vmul.f32 %v2968_v37, %v2888_v7 }
 0x47f   :  { %v2974_v54 = vpack.c.bf16 %v2972_v30, %v2971_v46 }
 0x481   :  { %3052 = vmatmul.bf16.vlgmr.msrb.gmra.mxu1 %v2974_v54 }
 0x4bb   :  { %v3059_v59 = vpop.xlane.xlu1 %3058 }
 0x4bc   :  { %v3066_v44 = vmul.f32 0.015625, %v3059_v59 }
 0x4be   :  { %v3086_v2 = vmul.f32 %v3066_v44, %v3066_v44  ;;  %v3098_v63 = vsub.f32 %v5010_v8, %v3066_v44 }
 0x4c3   :  { %v3061_v62 = vpop.xlane.xlu2 %3060  ;;  %v3075_v52 = vpop.xlane.xlu1 %3074 }
 0x4c4   :  { %v3082_v23 = vmul.f32 0.015625, %v3075_v52  ;;  %v3067_v9 = vmul.f32 0.015625, %v3061_v62 }
 0x4c6   :  { %v3090_v55 = vsub.f32 %v3082_v23, %v3086_v2  ;;  %v3087_v28 = vmul.f32 %v3067_v9, %v3067_v9  ;;  %v3099_v3 = vsub.f32 %v5018_v1, %v3067_v9  ;;  %v3692_v1 = vld [vmem:[#allocation13 + $0x8] sm:$0xff] }
 0x4c8   :  { %v3094_v17 = vmax.f32 %v3090_v55, 0.0 }
 0x4ca   :  { %v3102_v43 = vadd.f32 1e-06, %v3094_v17 }
 0x4cb   :  { %v3077_v16 = vpop.xlane.xlu2 %3076 }
 0x4cc   :  { %v3083_v34 = vmul.f32 0.015625, %v3077_v16  ;;  %3680 = vrsqrt.f32 %v3102_v43  ;;  %vm3112_vm9 = vweird.f32 %v3102_v43 }
 0x4ce   :  { %v3091_v47 = vsub.f32 %v3083_v34, %v3087_v28 }
 0x4d0   :  { %v3095_v5 = vmax.f32 %v3091_v47, 0.0 }
 0x4d2   :  { %v3103_v53 = vadd.f32 1e-06, %v3095_v5  ;;  %v3681_v24 = vpop.eup %3680  ;;  %v3693_v5 = vld [vmem:[#allocation13 + $0x10] sm:$0xff] }
 0x4d3   :  { %v3107_v45 = vmul.f32 %v3681_v24, %v3102_v43  ;;  %vm3113_vm7 = vweird.f32 %v3681_v24 }
 0x4d4   :  { %3682 = vrsqrt.f32 %v3103_v53  ;;  %vm3114_vm10 = vmor %vm3112_vm9, %vm3113_vm7  ;;  %vm3122_vm12 = vweird.f32 %v3103_v53 }
 0x4d5   :  { %v3108_v27 = vmul.f32 %v3681_v24, %v3107_v45 }
 0x4d7   :  { %v3109_v57 = vmul.f32 0.5, %v3108_v27 }
 0x4d9   :  { %v3110_v32 = vsub.f32 1.5, %v3109_v57 }
 0x4da   :  { %v3683_v12 = vpop.eup %3682 }
 0x4db   :  { %v3117_v10 = vmul.f32 %v3683_v12, %v3103_v53  ;;  %v3111_v42 = vmul.f32 %v3681_v24, %v3110_v32  ;;  %vm3123_vm11 = vweird.f32 %v3683_v12 }
 0x4dc   :  { %vm3124_vm13 = vmor %vm3122_vm12, %vm3123_vm11 }
 0x4dd   :  { %v3118_v36 = vmul.f32 %v3683_v12, %v3117_v10  ;;  %v3115_v48 = vsel %vm3114_vm10, %v3681_v24, %v3111_v42  ;;  %v3694_v42 = vld [vmem:[#allocation13 + $0x18] sm:$0xff] }
 0x4de   :  { %v3146_v41 = vmul.f32 %v3115_v48, %v3098_v63 }
 0x4df   :  { %v3119_v20 = vmul.f32 0.5, %v3118_v36 }
 0x4e0   :  { %v3154_v35 = vmul.f32 %v5064_v60, %v3146_v41 }
 0x4e1   :  { %v3120_v40 = vsub.f32 1.5, %v3119_v20 }
 0x4e2   :  { %v3162_v33 = vadd.f32 %v5071_v0, %v3154_v35 }
 0x4e3   :  { %v3121_v19 = vmul.f32 %v3683_v12, %v3120_v40 }
 0x4e4   :  { %v3166_v50 = vadd.f32 %v3691_v56, %v3162_v33 }
 0x4e5   :  { %v3125_v21 = vsel %vm3124_vm13, %v3683_v12, %v3121_v19 }
 0x4e6   :  { %v3147_v13 = vmul.f32 %v3125_v21, %v3099_v3  ;;  %3170 = vst [vmem:[#allocation24] sm:$0xff] %v3166_v50 }
 0x4e8   :  { %v3155_v51 = vmul.f32 %v5064_v60, %v3147_v13 }
 0x4ea   :  { %v3163_v15 = vadd.f32 %v5071_v0, %v3155_v51 }
 0x4ec   :  { %v3167_v22 = vadd.f32 %v3692_v1, %v3163_v15 }
 0x4ee   :  { %3171 = vst [vmem:[#allocation24 + $0x8] sm:$0xff] %v3167_v22 }
 0x4fe   :  { %v3053_v61 = vpop.f32.mrf.mxu1 }
 0x4ff   :  { %v3072_v6 = vmul.f32 %v3053_v61, %v3053_v61  ;;  %3062 = vadd.xlane.f32.xlu0 %v3053_v61 }
 0x501   :  { %3078 = vadd.xlane.f32.xlu1 %v3072_v6 }
 0x506   :  { %v3055_v8 = vpop.f32.mrf.mxu1 }
 0x507   :  { %3064 = vadd.xlane.f32.xlu2 %v3055_v8  ;;  %v3073_v31 = vmul.f32 %v3055_v8, %v3055_v8 }
 0x50f   :  { %3080 = vadd.xlane.f32.xlu2 %v3073_v31 }
 0x572   :  { %v3063_v29 = vpop.xlane.xlu0 %3062 }
 0x573   :  { %v3068_v58 = vmul.f32 0.015625, %v3063_v29 }
 0x574   :  { %v3079_v25 = vpop.xlane.xlu1 %3078 }
 0x575   :  { %v3088_v38 = vmul.f32 %v3068_v58, %v3068_v58  ;;  %v3084_v26 = vmul.f32 0.015625, %v3079_v25  ;;  %v3100_v55 = vsub.f32 %v3053_v61, %v3068_v58 }
 0x577   :  { %v3092_v11 = vsub.f32 %v3084_v26, %v3088_v38 }
 0x579   :  { %v3096_v39 = vmax.f32 %v3092_v11, 0.0 }
 0x57a   :  { %v3065_v14 = vpop.xlane.xlu2 %3064 }
 0x57b   :  { %v3104_v18 = vadd.f32 1e-06, %v3096_v39  ;;  %v3069_v49 = vmul.f32 0.015625, %v3065_v14 }
 0x57d   :  { %3684 = vrsqrt.f32 %v3104_v18  ;;  %v3089_v7 = vmul.f32 %v3069_v49, %v3069_v49  ;;  %vm3132_vm15 = vweird.f32 %v3104_v18  ;;  %v3101_v12 = vsub.f32 %v3055_v8, %v3069_v49 }
 0x582   :  { %v3081_v4 = vpop.xlane.xlu2 %3080 }
 0x583   :  { %v3685_v37 = vpop.eup %3684  ;;  %v3085_v46 = vmul.f32 0.015625, %v3081_v4 }
 0x584   :  { %v3127_v30 = vmul.f32 %v3685_v37, %v3104_v18  ;;  %vm3133_vm14 = vweird.f32 %v3685_v37 }
 0x585   :  { %v3093_v54 = vsub.f32 %v3085_v46, %v3089_v7  ;;  %vm3134_vm0 = vmor %vm3132_vm15, %vm3133_vm14 }
 0x586   :  { %v3128_v59 = vmul.f32 %v3685_v37, %v3127_v30 }
 0x587   :  { %v3097_v62 = vmax.f32 %v3093_v54, 0.0 }
 0x588   :  { %v3129_v52 = vmul.f32 0.5, %v3128_v59 }
 0x589   :  { %v3105_v44 = vadd.f32 1e-06, %v3097_v62 }
 0x58a   :  { %v3130_v23 = vsub.f32 1.5, %v3129_v52 }
 0x58b   :  { %3686 = vrsqrt.f32 %v3105_v44  ;;  %vm3142_vm2 = vweird.f32 %v3105_v44 }
 0x58c   :  { %v3131_v2 = vmul.f32 %v3685_v37, %v3130_v23 }
 0x58e   :  { %v3135_v16 = vsel %vm3134_vm0, %v3685_v37, %v3131_v2 }
 0x58f   :  { %v3148_v9 = vmul.f32 %v3135_v16, %v3100_v55 }
 0x591   :  { %v3687_v17 = vpop.eup %3686  ;;  %v3156_v34 = vmul.f32 %v5064_v60, %v3148_v9 }
 0x592   :  { %v3137_v28 = vmul.f32 %v3687_v17, %v3105_v44  ;;  %vm3143_vm1 = vweird.f32 %v3687_v17 }
 0x593   :  { %v3164_v43 = vadd.f32 %v5071_v0, %v3156_v34  ;;  %vm3144_vm3 = vmor %vm3142_vm2, %vm3143_vm1 }
 0x594   :  { %v3138_v47 = vmul.f32 %v3687_v17, %v3137_v28 }
 0x595   :  { %v3168_v53 = vadd.f32 %v3693_v5, %v3164_v43 }
 0x596   :  { %v3139_v24 = vmul.f32 0.5, %v3138_v47 }
 0x597   :  { %3172 = vst [vmem:[#allocation24 + $0x10] sm:$0xff] %v3168_v53 }
 0x598   :  { %v3140_v45 = vsub.f32 1.5, %v3139_v24 }
 0x59a   :  { %v3141_v27 = vmul.f32 %v3687_v17, %v3140_v45 }
 0x59c   :  { %v3145_v57 = vsel %vm3144_vm3, %v3687_v17, %v3141_v27 }
 0x59d   :  { %v3149_v10 = vmul.f32 %v3145_v57, %v3101_v12 }
 0x59f   :  { %v3157_v32 = vmul.f32 %v5064_v60, %v3149_v10 }
 0x5a1   :  { %v3165_v36 = vadd.f32 %v5071_v0, %v3157_v32 }
 0x5a3   :  { %v3169_v20 = vadd.f32 %v3694_v42, %v3165_v36 }
 0x5a5   :  { %3173 = vst [vmem:[#allocation24 + $0x18] sm:$0xff] %v3169_v20 }
 0x5a6   :  { %3186 = dma.vmem_to_hbm [thread:$0]  %s3179_s10, 512, %s3181_s0, [#allocation15], %s3874_s25, %s3874_s25, %s3875_s26  }
 0x5a7   :  { %3871 = dma.done.wait [#allocation15], 512  }
 0x5a8   :  { %3872 = vsyncadd [#allocation15], 4294966784 }
 0x5a9   :  { %3191 = vsyncpa [#allocation14], 1 }
 0x5aa   :  { %3192 = vsyncpa [#allocation17], 1 }
 0x5ab   :  { %3193 = vsyncpa [#allocation20], 1 }
 0x5ac   :  { %3194 = vsyncpa [#allocation23], 1 }
 0x5ad   :  { %3195 = vsyncpa [#allocation15], 1 }

</bundles_post_ra>
